<compile_context>
chip_gen: v6e
topology: v6e:2x2x1
jax: 0.10.0
libtpu: 0.0.40
codegen_flags: <defaults>
</compile_context>

<pallas_src>
import functools
import math

import jax
import jax.numpy as jnp
from jax import lax
from jax.experimental import pallas as pl
from jax.experimental.pallas import tpu as pltpu

EPS = 1e-5  # nn.LayerNorm default eps


def _vmem_limit_bytes():
    # v7x: 64 MiB physical VMEM per TensorCore; v5e/v6e: 128 MiB.
    try:
        cap = getattr(pltpu.get_tpu_info(), "vmem_capacity_bytes", 64 * 1024 * 1024)
    except Exception:  # interpret mode / no device info
        cap = 64 * 1024 * 1024
    return int(min(cap * 3 // 4, 100 * 1024 * 1024))


def _layer_norm(x, gamma, beta):
    mean = jnp.mean(x, axis=-1, keepdims=True)
    xc = x - mean
    var = jnp.mean(xc * xc, axis=-1, keepdims=True)
    return xc * lax.rsqrt(var + EPS) * gamma + beta


# --------------------------------------------------------------------------
# Fused encoder-block kernel (one grid step = block_b sequences)
# --------------------------------------------------------------------------
def encoder_block_kernel(
    x_ref, pe_ref, mask_ref,
    cg_ref, cb_ref, cw_ref, cbias_ref,
    ag_ref, ab_ref, wqkv_ref, bqkv_ref, wo_ref, bo_ref,
    fg_ref, fb_ref, w1_ref, b1_ref, w2_ref, b2_ref,
    o_ref,
    col_ref, ctx_ref,
    *, num_conv_layers: int, kernel_size: int, num_heads: int,
    block_b: int, seq_len: int,
):
    L, K, H = num_conv_layers, kernel_size, num_heads
    Bt, S = block_b, seq_len
    R, C = x_ref.shape
    Dh = C // H
    pad = K // 2
    scale = 1.0 / math.sqrt(Dh)
    f32, bf16 = jnp.float32, jnp.bfloat16

    # ---- positional encoding (pe already tiled to (Bt*S, C) on the host) ----
    x = x_ref[...] + pe_ref[...]                                   # (R, C) f32

    # ---- conv layers: LN -> im2col -> ONE (R,K*C)@(K*C,C) matmul -> ReLU -> +res
    for l in range(L):
        xn = _layer_norm(x, cg_ref[l], cb_ref[l]).astype(bf16)     # (R, C)
        for b in range(Bt):                                        # static loops
            base = b * S
            for k in range(K):
                shift = k - pad
                lo_dst = max(0, -shift)
                hi_dst = S - max(0, shift)
                lo_src = max(0, shift)
                n = hi_dst - lo_dst
                # main shifted window (lane-dense full-C store)
                col_ref[pl.ds(base + lo_dst, n), pl.ds(k * C, C)] = (
                    xn[base + lo_src:base + lo_src + n, :])
                # zero the "same"-padding halo rows of this tap's column block
                if lo_dst > 0:
                    col_ref[pl.ds(base, lo_dst), pl.ds(k * C, C)] = (
                        jnp.zeros((lo_dst, C), bf16))
                if hi_dst < S:
                    col_ref[pl.ds(base + hi_dst, S - hi_dst), pl.ds(k * C, C)] = (
                        jnp.zeros((S - hi_dst, C), bf16))
        y = jnp.dot(col_ref[...], cw_ref[l], preferred_element_type=f32)
        x = jnp.maximum(y + cbias_ref[l], 0.0) + x                 # ReLU + residual

    # ---- self-attention: LN -> fused QKV -> per-(seq, head) softmax(QK^T)V ----
    xn = _layer_norm(x, ag_ref[...], ab_ref[...]).astype(bf16)
    qkv = jnp.dot(xn, wqkv_ref[...], preferred_element_type=f32) + bqkv_ref[...]
    for b in range(Bt):
        rows = slice(b * S, (b + 1) * S)
        q = qkv[rows, 0:C] * scale
        k = qkv[rows, C:2 * C]
        v = qkv[rows, 2 * C:3 * C]
        # key_padding_mask: positions where mask == 0 are ignored.
        # NOTE: a fully-masked sequence yields a uniform softmax here (PyTorch → NaN).
        neg = jnp.where(mask_ref[b] == 0.0, -1e30, 0.0)            # (1, S) f32
        head_ctx = []
        for h in range(H):
            lo = h * Dh
            qh = q[:, lo:lo + Dh].astype(bf16)
            kh = k[:, lo:lo + Dh].astype(bf16)
            vh = v[:, lo:lo + Dh].astype(bf16)
            s = lax.dot_general(qh, kh, (((1,), (1,)), ((), ())),
                                preferred_element_type=f32)        # (S, S), no .T
            s = s + neg
            s = s - jnp.max(s, axis=-1, keepdims=True)
            p = jnp.exp(s)
            p = p * pl.reciprocal(jnp.sum(p, axis=-1, keepdims=True), approx=True)
            ctx_h = jnp.dot(p.astype(bf16), vh, preferred_element_type=f32)
            head_ctx.append(ctx_h.astype(bf16))
        # lane-concat heads -> (S, C), full-width aligned store into scratch
        ctx_ref[pl.ds(b * S, S), :] = jnp.concatenate(head_ctx, axis=-1)
    # single output projection with M = R rows
    attn = jnp.dot(ctx_ref[...], wo_ref[...], preferred_element_type=f32) + bo_ref[...]
    x = attn + x                                                   # residual

    # ---- FFN: LN -> Linear -> ReLU -> Linear -> +res ----
    xn = _layer_norm(x, fg_ref[...], fb_ref[...]).astype(bf16)
    h1 = jnp.maximum(
        jnp.dot(xn, w1_ref[...], preferred_element_type=f32) + b1_ref[...], 0.0)
    y = jnp.dot(h1.astype(bf16), w2_ref[...], preferred_element_type=f32) + b2_ref[...]
    o_ref[...] = y + x


# --------------------------------------------------------------------------
# Host wrapper: parameter packing + pallas_call
# --------------------------------------------------------------------------
def text_encoder_block(x, mask, params, *, kernel_size: int, num_heads: int,
                       block_b=None):
    """x: (B, S, C) f32; mask: (B, S) (1 = valid, 0 = padded)."""
    B, S, C = x.shape
    K = kernel_size
    H = num_heads
    L = len(params['conv_layers'])
    assert C % 128 == 0, "hidden dim must be lane-dense (multiple of 128)"
    assert C % H == 0

    if block_b is None:
        # Keep the grid a multiple of 2 when possible (v7x: 2 TensorCores);
        # a single big step is already fine on v5e/v6e (1 TC).
        block_b = B // 2 if (B % 2 == 0 and B >= 2) else B
    assert B % block_b == 0
    R = block_b * S
    assert (R % 8 == 0) or block_b == B

    f32, bf16 = jnp.float32, jnp.bfloat16

    # ---- host-side parameter packing ----
    pe = params['pe'][:S].astype(f32)
    pe_blk = jnp.tile(pe, (block_b, 1))                            # (R, C)

    cg, cb, cw, cbias = [], [], [], []
    for cp in params['conv_layers']:
        dw2 = cp['dw_weight'].reshape(C, K).astype(f32)            # (C_in, K)
        pw2 = cp['pw_weight'].reshape(C, C).astype(f32)            # (C_out, C_in)
        # Wf[k*C + ci, co] = dw[ci, k] * pw[co, ci]   (depthwise ⊗ pointwise)
        wf = (dw2.T[:, :, None] * pw2.T[None, :, :]).reshape(K * C, C)
        cw.append(wf.astype(bf16))
        cg.append(cp['gamma'].reshape(1, C).astype(f32))
        cb.append(cp['beta'].reshape(1, C).astype(f32))
        cbias.append(cp['pw_bias'].reshape(1, C).astype(f32))
    cg = jnp.stack(cg); cb = jnp.stack(cb)
    cw = jnp.stack(cw); cbias = jnp.stack(cbias)

    ap = params['attn']
    wqkv = ap['in_proj_weight'].T.astype(bf16)                     # (C, 3C)
    bqkv = ap['in_proj_bias'].reshape(1, 3 * C).astype(f32)
    wo = ap['out_proj_weight'].T.astype(bf16)
    bo = ap['out_proj_bias'].reshape(1, C).astype(f32)
    ag = ap['gamma'].reshape(1, C).astype(f32)
    ab = ap['beta'].reshape(1, C).astype(f32)

    fp = params['ffn']
    w1 = fp['w1'].T.astype(bf16); b1 = fp['b1'].reshape(1, C).astype(f32)
    w2 = fp['w2'].T.astype(bf16); b2 = fp['b2'].reshape(1, C).astype(f32)
    fg = fp['gamma'].reshape(1, C).astype(f32)
    fb = fp['beta'].reshape(1, C).astype(f32)

    x2 = x.reshape(B * S, C).astype(f32)
    mask3 = mask.reshape(B, 1, S).astype(f32)

    kern = functools.partial(
        encoder_block_kernel, num_conv_layers=L, kernel_size=K,
        num_heads=H, block_b=block_b, seq_len=S)

    def bcast(shape):
        nd = len(shape)
        return pl.BlockSpec(shape, lambda i, _nd=nd: (0,) * _nd)

    in_specs = [
        pl.BlockSpec((R, C), lambda i: (i, 0)),              # x (residual stream)
        bcast((R, C)),                                       # positional encoding
        pl.BlockSpec((block_b, 1, S), lambda i: (i, 0, 0)),  # key-padding mask
        bcast((L, 1, C)), bcast((L, 1, C)),                  # conv LN gamma/beta
        bcast((L, K * C, C)), bcast((L, 1, C)),              # fused conv W (bf16), bias
        bcast((1, C)), bcast((1, C)),                        # attn LN gamma/beta
        bcast((C, 3 * C)), bcast((1, 3 * C)),                # Wqkv (bf16), bqkv
        bcast((C, C)), bcast((1, C)),                        # Wo (bf16), bo
        bcast((1, C)), bcast((1, C)),                        # ffn LN gamma/beta
        bcast((C, C)), bcast((1, C)),                        # W1 (bf16), b1
        bcast((C, C)), bcast((1, C)),                        # W2 (bf16), b2
    ]

    out2 = pl.pallas_call(
        kern,
        out_shape=jax.ShapeDtypeStruct((B * S, C), f32),
        grid_spec=pltpu.PrefetchScalarGridSpec(
            num_scalar_prefetch=0,
            grid=(B // block_b,),
            in_specs=in_specs,
            out_specs=pl.BlockSpec((R, C), lambda i: (i, 0)),
            scratch_shapes=[pltpu.VMEM((R, K * C), bf16),    # im2col operand
                            pltpu.VMEM((R, C), bf16)],       # concatenated heads
        ),
        compiler_params=pltpu.CompilerParams(
            dimension_semantics=("parallel",),
            vmem_limit_bytes=_vmem_limit_bytes()),
    )(x2, pe_blk, mask3, cg, cb, cw, cbias,
      ag, ab, wqkv, bqkv, wo, bo,
      fg, fb, w1, b1, w2, b2)
    return out2.reshape(B, S, C)


# --------------------------------------------------------------------------
# Positional encoding (tensor2tensor variant)
# --------------------------------------------------------------------------
def positional_encoding(channels, max_len, min_timescale=1.0, max_timescale=10000.0):
    position = jnp.arange(max_len, dtype=jnp.float32)[:, None]
    num_timescales = channels // 2
    log_inc = math.log(max_timescale / min_timescale) / (num_timescales - 1)
    inv = min_timescale * jnp.exp(
        jnp.arange(num_timescales, dtype=jnp.float32) * -log_inc)[None, :]
    scaled = position * inv
    return jnp.concatenate([jnp.sin(scaled), jnp.cos(scaled)], axis=1)   # (max_len, C)


# --------------------------------------------------------------------------
# Pure-JAX f32 reference reproducing the PyTorch forward pass
# --------------------------------------------------------------------------
def _layer_norm_ref(x, gamma, beta):
    mean = jnp.mean(x, axis=-1, keepdims=True)
    var = jnp.mean((x - mean) ** 2, axis=-1, keepdims=True)
    return (x - mean) / jnp.sqrt(var + EPS) * gamma + beta


def reference_forward(x, mask, params, *, kernel_size, num_heads):
    B, S, C = x.shape
    K = kernel_size
    pad = K // 2
    H = num_heads
    Dh = C // H

    out = x + params['pe'][:S][None]

    for cp in params['conv_layers']:
        res = out
        xn = _layer_norm_ref(out, cp['gamma'], cp['beta'])
        dw = cp['dw_weight'].reshape(C, K)
        xp = jnp.pad(xn, ((0, 0), (pad, pad), (0, 0)))
        acc = jnp.zeros_like(xn)
        for k in range(K):
            acc = acc + xp[:, k:k + S, :] * dw[:, k][None, None, :]
        pw = cp['pw_weight'].reshape(C, C)
        y = jnp.einsum('bsc,oc->bso', acc, pw) + cp['pw_bias']
        out = jnp.maximum(y, 0.0) + res

    ap = params['attn']
    res = out
    xn = _layer_norm_ref(out, ap['gamma'], ap['beta'])
    W, bW = ap['in_proj_weight'], ap['in_proj_bias']
    q = (xn @ W[:C].T + bW[:C]).reshape(B, S, H, Dh)
    k = (xn @ W[C:2 * C].T + bW[C:2 * C]).reshape(B, S, H, Dh)
    v = (xn @ W[2 * C:].T + bW[2 * C:]).reshape(B, S, H, Dh)
    scores = jnp.einsum('bqhd,bkhd->bhqk', q, k) / math.sqrt(Dh)
    scores = scores + jnp.where(mask == 0, -1e30, 0.0)[:, None, None, :]
    p = jax.nn.softmax(scores, axis=-1)
    ctx = jnp.einsum('bhqk,bkhd->bqhd', p, v).reshape(B, S, C)
    out = ctx @ ap['out_proj_weight'].T + ap['out_proj_bias'] + res

    fp = params['ffn']
    res = out
    xn = _layer_norm_ref(out, fp['gamma'], fp['beta'])
    h = jnp.maximum(xn @ fp['w1'].T + fp['b1'], 0.0)
    out = h @ fp['w2'].T + fp['b2'] + res
    return out


if __name__ == "__main__":
    # Small but lane-dense shapes (C = 128 fills the 128-lane vregs).
    B, S, C = 4, 32, 128
    K, H, L = 5, 4, 2      # kernel_size, num_heads, num_conv_layers

    keys = iter(jax.random.split(jax.random.PRNGKey(0), 32))

    def nrm(shape, scale):
        return scale * jax.random.normal(next(keys), shape, dtype=jnp.float32)

    x = nrm((B, S, C), 1.0)
    mask = jnp.ones((B, S), jnp.float32)
    mask = mask.at[1, 24:].set(0.0).at[3, 16:].set(0.0)   # some padded positions

    wscale = 0.5 / math.sqrt(C)
    params = {
        'pe': positional_encoding(C, 512),
        'conv_layers': [
            dict(gamma=1.0 + nrm((C,), 0.1), beta=nrm((C,), 0.05),
                 dw_weight=nrm((C, 1, K), 0.3),
                 pw_weight=nrm((C, C, 1), wscale),
                 pw_bias=nrm((C,), 0.05))
            for _ in range(L)
        ],
        'attn': dict(gamma=1.0 + nrm((C,), 0.1), beta=nrm((C,), 0.05),
                     in_proj_weight=nrm((3 * C, C), wscale),
                     in_proj_bias=nrm((3 * C,), 0.05),
                     out_proj_weight=nrm((C, C), wscale),
                     out_proj_bias=nrm((C,), 0.05)),
        'ffn': dict(gamma=1.0 + nrm((C,), 0.1), beta=nrm((C,), 0.05),
                    w1=nrm((C, C), wscale), b1=nrm((C,), 0.05),
                    w2=nrm((C, C), wscale), b2=nrm((C,), 0.05)),
    }

    out = text_encoder_block(x, mask, params, kernel_size=K, num_heads=H)
    out = jax.block_until_ready(out)

    ref = reference_forward(x, mask, params, kernel_size=K, num_heads=H)
    assert out.shape == (B, S, C)
    assert bool(jnp.all(jnp.isfinite(out)))
    # bf16 MXU operands vs f32 reference: errors compound across conv+attn+FFN,
    # tolerance loosened accordingly.
    assert jnp.allclose(out, ref, atol=1e-1, rtol=5e-2), \
        float(jnp.max(jnp.abs(out - ref)))

    print("KERNEL_OK")
</pallas_src>

<mosaic_0001>
module attributes {stable_mosaic.version = 11 : i64} {
  func.func @encoder_block_kernel(%arg0: i32, %arg1: memref<64x128xf32, #tpu.memory_space<vmem>>, %arg2: memref<64x128xf32, #tpu.memory_space<vmem>>, %arg3: memref<2x1x32xf32, #tpu.memory_space<vmem>>, %arg4: memref<2x1x128xf32, #tpu.memory_space<vmem>>, %arg5: memref<2x1x128xf32, #tpu.memory_space<vmem>>, %arg6: memref<2x640x128xbf16, #tpu.memory_space<vmem>>, %arg7: memref<2x1x128xf32, #tpu.memory_space<vmem>>, %arg8: memref<1x128xf32, #tpu.memory_space<vmem>>, %arg9: memref<1x128xf32, #tpu.memory_space<vmem>>, %arg10: memref<128x384xbf16, #tpu.memory_space<vmem>>, %arg11: memref<1x384xf32, #tpu.memory_space<vmem>>, %arg12: memref<128x128xbf16, #tpu.memory_space<vmem>>, %arg13: memref<1x128xf32, #tpu.memory_space<vmem>>, %arg14: memref<1x128xf32, #tpu.memory_space<vmem>>, %arg15: memref<1x128xf32, #tpu.memory_space<vmem>>, %arg16: memref<128x128xbf16, #tpu.memory_space<vmem>>, %arg17: memref<1x128xf32, #tpu.memory_space<vmem>>, %arg18: memref<128x128xbf16, #tpu.memory_space<vmem>>, %arg19: memref<1x128xf32, #tpu.memory_space<vmem>>, %arg20: memref<64x128xf32, #tpu.memory_space<vmem>>, %arg21: memref<64x640xbf16, #tpu.memory_space<vmem>>, %arg22: memref<64x128xbf16, #tpu.memory_space<vmem>>) attributes {dimension_semantics = [#tpu.dimension_semantics<parallel>], iteration_bounds = array<i64: 2>, scalar_prefetch = 0 : i64, scratch_operands = 2 : i64, tpu.core_type = #tpu.core_type<tc>, window_params = [{transform_indices = @transform_0, window_bounds = array<i64: 64, 128>}, {pipeline_mode = #tpu.pipeline_mode<synchronous>, transform_indices = @transform_1, window_bounds = array<i64: 64, 128>}, {transform_indices = @transform_2, window_bounds = array<i64: 2, 1, 32>}, {pipeline_mode = #tpu.pipeline_mode<synchronous>, transform_indices = @transform_3, window_bounds = array<i64: 2, 1, 128>}, {pipeline_mode = #tpu.pipeline_mode<synchronous>, transform_indices = @transform_4, window_bounds = array<i64: 2, 1, 128>}, {pipeline_mode = #tpu.pipeline_mode<synchronous>, transform_indices = @transform_5, window_bounds = array<i64: 2, 640, 128>}, {pipeline_mode = #tpu.pipeline_mode<synchronous>, transform_indices = @transform_6, window_bounds = array<i64: 2, 1, 128>}, {pipeline_mode = #tpu.pipeline_mode<synchronous>, transform_indices = @transform_7, window_bounds = array<i64: 1, 128>}, {pipeline_mode = #tpu.pipeline_mode<synchronous>, transform_indices = @transform_8, window_bounds = array<i64: 1, 128>}, {pipeline_mode = #tpu.pipeline_mode<synchronous>, transform_indices = @transform_9, window_bounds = array<i64: 128, 384>}, {pipeline_mode = #tpu.pipeline_mode<synchronous>, transform_indices = @transform_10, window_bounds = array<i64: 1, 384>}, {pipeline_mode = #tpu.pipeline_mode<synchronous>, transform_indices = @transform_11, window_bounds = array<i64: 128, 128>}, {pipeline_mode = #tpu.pipeline_mode<synchronous>, transform_indices = @transform_12, window_bounds = array<i64: 1, 128>}, {pipeline_mode = #tpu.pipeline_mode<synchronous>, transform_indices = @transform_13, window_bounds = array<i64: 1, 128>}, {pipeline_mode = #tpu.pipeline_mode<synchronous>, transform_indices = @transform_14, window_bounds = array<i64: 1, 128>}, {pipeline_mode = #tpu.pipeline_mode<synchronous>, transform_indices = @transform_15, window_bounds = array<i64: 128, 128>}, {pipeline_mode = #tpu.pipeline_mode<synchronous>, transform_indices = @transform_16, window_bounds = array<i64: 1, 128>}, {pipeline_mode = #tpu.pipeline_mode<synchronous>, transform_indices = @transform_17, window_bounds = array<i64: 128, 128>}, {pipeline_mode = #tpu.pipeline_mode<synchronous>, transform_indices = @transform_18, window_bounds = array<i64: 1, 128>}, {transform_indices = @transform_19, window_bounds = array<i64: 64, 128>}]} {
    %c0 = arith.constant 0 : index
    %c0_0 = arith.constant 0 : index
    %0 = vector.load %arg1[%c0, %c0_0] : memref<64x128xf32, #tpu.memory_space<vmem>>, vector<64x128xf32>
    %c0_1 = arith.constant 0 : index
    %c0_2 = arith.constant 0 : index
    %1 = vector.load %arg2[%c0_1, %c0_2] : memref<64x128xf32, #tpu.memory_space<vmem>>, vector<64x128xf32>
    %2 = arith.addf %0, %1 : vector<64x128xf32>
    %c0_3 = arith.constant 0 : index
    %c0_4 = arith.constant 0 : index
    %c0_5 = arith.constant 0 : index
    %3 = vector.load %arg4[%c0_3, %c0_4, %c0_5] : memref<2x1x128xf32, #tpu.memory_space<vmem>>, vector<1x1x128xf32>
    %4 = vector.shape_cast %3 : vector<1x1x128xf32> to vector<1x128xf32>
    %c0_6 = arith.constant 0 : index
    %c0_7 = arith.constant 0 : index
    %c0_8 = arith.constant 0 : index
    %5 = vector.load %arg5[%c0_6, %c0_7, %c0_8] : memref<2x1x128xf32, #tpu.memory_space<vmem>>, vector<1x1x128xf32>
    %6 = vector.shape_cast %5 : vector<1x1x128xf32> to vector<1x128xf32>
    %cst = arith.constant dense<0.000000e+00> : vector<64xf32>
    %7 = vector.multi_reduction <add>, %2, %cst [1] : vector<64x128xf32> to vector<64xf32>
    %8 = vector.shape_cast %7 : vector<64xf32> to vector<64x1xf32>
    %cst_9 = arith.constant 1.280000e+02 : f32
    %9 = vector.broadcast %cst_9 : f32 to vector<64x1xf32>
    %10 = arith.divf %8, %9 : vector<64x1xf32>
    %11 = vector.broadcast %10 : vector<64x1xf32> to vector<64x128xf32>
    %12 = arith.subf %2, %11 : vector<64x128xf32>
    %13 = arith.mulf %12, %12 : vector<64x128xf32>
    %cst_10 = arith.constant dense<0.000000e+00> : vector<64xf32>
    %14 = vector.multi_reduction <add>, %13, %cst_10 [1] : vector<64x128xf32> to vector<64xf32>
    %15 = vector.shape_cast %14 : vector<64xf32> to vector<64x1xf32>
    %cst_11 = arith.constant 1.280000e+02 : f32
    %16 = vector.broadcast %cst_11 : f32 to vector<64x1xf32>
    %17 = arith.divf %15, %16 : vector<64x1xf32>
    %cst_12 = arith.constant 9.99999974E-6 : f32
    %18 = vector.broadcast %cst_12 : f32 to vector<64x1xf32>
    %19 = arith.addf %17, %18 : vector<64x1xf32>
    %20 = math.rsqrt %19 : vector<64x1xf32>
    %21 = vector.broadcast %20 : vector<64x1xf32> to vector<64x128xf32>
    %22 = arith.mulf %12, %21 : vector<64x128xf32>
    %23 = vector.broadcast %4 : vector<1x128xf32> to vector<64x128xf32>
    %24 = arith.mulf %22, %23 : vector<64x128xf32>
    %25 = vector.broadcast %6 : vector<1x128xf32> to vector<64x128xf32>
    %26 = arith.addf %24, %25 : vector<64x128xf32>
    %27 = arith.truncf %26 : vector<64x128xf32> to vector<64x128xbf16>
    %28 = vector.extract_strided_slice %27 {offsets = [0, 0], sizes = [30, 128], strides = [1, 1]} : vector<64x128xbf16> to vector<30x128xbf16>
    %c2 = arith.constant 2 : index
    %c0_13 = arith.constant 0 : index
    %29 = vector.load %arg21[%c2, %c0_13] : memref<64x640xbf16, #tpu.memory_space<vmem>>, vector<30x128xbf16>
    tpu.vector_store %arg21[%c2, %c0_13], %28 {strides = array<i32>} : memref<64x640xbf16, #tpu.memory_space<vmem>>, vector<30x128xbf16>,
    %cst_14 = arith.constant 0.000000e+00 : bf16
    %30 = vector.broadcast %cst_14 : bf16 to vector<2x128xbf16>
    %c0_15 = arith.constant 0 : index
    %c0_16 = arith.constant 0 : index
    %31 = vector.load %arg21[%c0_15, %c0_16] : memref<64x640xbf16, #tpu.memory_space<vmem>>, vector<2x128xbf16>
    tpu.vector_store %arg21[%c0_15, %c0_16], %30 {strides = array<i32>} : memref<64x640xbf16, #tpu.memory_space<vmem>>, vector<2x128xbf16>,
    %32 = vector.extract_strided_slice %27 {offsets = [0, 0], sizes = [31, 128], strides = [1, 1]} : vector<64x128xbf16> to vector<31x128xbf16>
    %c1 = arith.constant 1 : index
    %c128 = arith.constant 128 : index
    %33 = vector.load %arg21[%c1, %c128] : memref<64x640xbf16, #tpu.memory_space<vmem>>, vector<31x128xbf16>
    tpu.vector_store %arg21[%c1, %c128], %32 {strides = array<i32>} : memref<64x640xbf16, #tpu.memory_space<vmem>>, vector<31x128xbf16>,
    %cst_17 = arith.constant 0.000000e+00 : bf16
    %34 = vector.broadcast %cst_17 : bf16 to vector<1x128xbf16>
    %c0_18 = arith.constant 0 : index
    %c128_19 = arith.constant 128 : index
    %35 = vector.load %arg21[%c0_18, %c128_19] : memref<64x640xbf16, #tpu.memory_space<vmem>>, vector<1x128xbf16>
    tpu.vector_store %arg21[%c0_18, %c128_19], %34 {strides = array<i32>} : memref<64x640xbf16, #tpu.memory_space<vmem>>, vector<1x128xbf16>,
    %36 = vector.extract_strided_slice %27 {offsets = [0, 0], sizes = [32, 128], strides = [1, 1]} : vector<64x128xbf16> to vector<32x128xbf16>
    %c0_20 = arith.constant 0 : index
    %c256 = arith.constant 256 : index
    %37 = vector.load %arg21[%c0_20, %c256] : memref<64x640xbf16, #tpu.memory_space<vmem>>, vector<32x128xbf16>
    tpu.vector_store %arg21[%c0_20, %c256], %36 {strides = array<i32>} : memref<64x640xbf16, #tpu.memory_space<vmem>>, vector<32x128xbf16>,
    %38 = vector.extract_strided_slice %27 {offsets = [1, 0], sizes = [31, 128], strides = [1, 1]} : vector<64x128xbf16> to vector<31x128xbf16>
    %c0_21 = arith.constant 0 : index
    %c384 = arith.constant 384 : index
    %39 = vector.load %arg21[%c0_21, %c384] : memref<64x640xbf16, #tpu.memory_space<vmem>>, vector<31x128xbf16>
    tpu.vector_store %arg21[%c0_21, %c384], %38 {strides = array<i32>} : memref<64x640xbf16, #tpu.memory_space<vmem>>, vector<31x128xbf16>,
    %cst_22 = arith.constant 0.000000e+00 : bf16
    %40 = vector.broadcast %cst_22 : bf16 to vector<1x128xbf16>
    %c31 = arith.constant 31 : index
    %c384_23 = arith.constant 384 : index
    %41 = vector.load %arg21[%c31, %c384_23] : memref<64x640xbf16, #tpu.memory_space<vmem>>, vector<1x128xbf16>
    tpu.vector_store %arg21[%c31, %c384_23], %40 {strides = array<i32>} : memref<64x640xbf16, #tpu.memory_space<vmem>>, vector<1x128xbf16>,
    %42 = vector.extract_strided_slice %27 {offsets = [2, 0], sizes = [30, 128], strides = [1, 1]} : vector<64x128xbf16> to vector<30x128xbf16>
    %c0_24 = arith.constant 0 : index
    %c512 = arith.constant 512 : index
    %43 = vector.load %arg21[%c0_24, %c512] : memref<64x640xbf16, #tpu.memory_space<vmem>>, vector<30x128xbf16>
    tpu.vector_store %arg21[%c0_24, %c512], %42 {strides = array<i32>} : memref<64x640xbf16, #tpu.memory_space<vmem>>, vector<30x128xbf16>,
    %cst_25 = arith.constant 0.000000e+00 : bf16
    %44 = vector.broadcast %cst_25 : bf16 to vector<2x128xbf16>
    %c30 = arith.constant 30 : index
    %c512_26 = arith.constant 512 : index
    %45 = vector.load %arg21[%c30, %c512_26] : memref<64x640xbf16, #tpu.memory_space<vmem>>, vector<2x128xbf16>
    tpu.vector_store %arg21[%c30, %c512_26], %44 {strides = array<i32>} : memref<64x640xbf16, #tpu.memory_space<vmem>>, vector<2x128xbf16>,
    %46 = vector.extract_strided_slice %27 {offsets = [32, 0], sizes = [30, 128], strides = [1, 1]} : vector<64x128xbf16> to vector<30x128xbf16>
    %c34 = arith.constant 34 : index
    %c0_27 = arith.constant 0 : index
    %47 = vector.load %arg21[%c34, %c0_27] : memref<64x640xbf16, #tpu.memory_space<vmem>>, vector<30x128xbf16>
    tpu.vector_store %arg21[%c34, %c0_27], %46 {strides = array<i32>} : memref<64x640xbf16, #tpu.memory_space<vmem>>, vector<30x128xbf16>,
    %cst_28 = arith.constant 0.000000e+00 : bf16
    %48 = vector.broadcast %cst_28 : bf16 to vector<2x128xbf16>
    %c32 = arith.constant 32 : index
    %c0_29 = arith.constant 0 : index
    %49 = vector.load %arg21[%c32, %c0_29] : memref<64x640xbf16, #tpu.memory_space<vmem>>, vector<2x128xbf16>
    tpu.vector_store %arg21[%c32, %c0_29], %48 {strides = array<i32>} : memref<64x640xbf16, #tpu.memory_space<vmem>>, vector<2x128xbf16>,
    %50 = vector.extract_strided_slice %27 {offsets = [32, 0], sizes = [31, 128], strides = [1, 1]} : vector<64x128xbf16> to vector<31x128xbf16>
    %c33 = arith.constant 33 : index
    %c128_30 = arith.constant 128 : index
    %51 = vector.load %arg21[%c33, %c128_30] : memref<64x640xbf16, #tpu.memory_space<vmem>>, vector<31x128xbf16>
    tpu.vector_store %arg21[%c33, %c128_30], %50 {strides = array<i32>} : memref<64x640xbf16, #tpu.memory_space<vmem>>, vector<31x128xbf16>,
    %cst_31 = arith.constant 0.000000e+00 : bf16
    %52 = vector.broadcast %cst_31 : bf16 to vector<1x128xbf16>
    %c32_32 = arith.constant 32 : index
    %c128_33 = arith.constant 128 : index
    %53 = vector.load %arg21[%c32_32, %c128_33] : memref<64x640xbf16, #tpu.memory_space<vmem>>, vector<1x128xbf16>
    tpu.vector_store %arg21[%c32_32, %c128_33], %52 {strides = array<i32>} : memref<64x640xbf16, #tpu.memory_space<vmem>>, vector<1x128xbf16>,
    %54 = vector.extract_strided_slice %27 {offsets = [32, 0], sizes = [32, 128], strides = [1, 1]} : vector<64x128xbf16> to vector<32x128xbf16>
    %c32_34 = arith.constant 32 : index
    %c256_35 = arith.constant 256 : index
    %55 = vector.load %arg21[%c32_34, %c256_35] : memref<64x640xbf16, #tpu.memory_space<vmem>>, vector<32x128xbf16>
    tpu.vector_store %arg21[%c32_34, %c256_35], %54 {strides = array<i32>} : memref<64x640xbf16, #tpu.memory_space<vmem>>, vector<32x128xbf16>,
    %56 = vector.extract_strided_slice %27 {offsets = [33, 0], sizes = [31, 128], strides = [1, 1]} : vector<64x128xbf16> to vector<31x128xbf16>
    %c32_36 = arith.constant 32 : index
    %c384_37 = arith.constant 384 : index
    %57 = vector.load %arg21[%c32_36, %c384_37] : memref<64x640xbf16, #tpu.memory_space<vmem>>, vector<31x128xbf16>
    tpu.vector_store %arg21[%c32_36, %c384_37], %56 {strides = array<i32>} : memref<64x640xbf16, #tpu.memory_space<vmem>>, vector<31x128xbf16>,
    %cst_38 = arith.constant 0.000000e+00 : bf16
    %58 = vector.broadcast %cst_38 : bf16 to vector<1x128xbf16>
    %c63 = arith.constant 63 : index
    %c384_39 = arith.constant 384 : index
    %59 = vector.load %arg21[%c63, %c384_39] : memref<64x640xbf16, #tpu.memory_space<vmem>>, vector<1x128xbf16>
    tpu.vector_store %arg21[%c63, %c384_39], %58 {strides = array<i32>} : memref<64x640xbf16, #tpu.memory_space<vmem>>, vector<1x128xbf16>,
    %60 = vector.extract_strided_slice %27 {offsets = [34, 0], sizes = [30, 128], strides = [1, 1]} : vector<64x128xbf16> to vector<30x128xbf16>
    %c32_40 = arith.constant 32 : index
    %c512_41 = arith.constant 512 : index
    %61 = vector.load %arg21[%c32_40, %c512_41] : memref<64x640xbf16, #tpu.memory_space<vmem>>, vector<30x128xbf16>
    tpu.vector_store %arg21[%c32_40, %c512_41], %60 {strides = array<i32>} : memref<64x640xbf16, #tpu.memory_space<vmem>>, vector<30x128xbf16>,
    %cst_42 = arith.constant 0.000000e+00 : bf16
    %62 = vector.broadcast %cst_42 : bf16 to vector<2x128xbf16>
    %c62 = arith.constant 62 : index
    %c512_43 = arith.constant 512 : index
    %63 = vector.load %arg21[%c62, %c512_43] : memref<64x640xbf16, #tpu.memory_space<vmem>>, vector<2x128xbf16>
    tpu.vector_store %arg21[%c62, %c512_43], %62 {strides = array<i32>} : memref<64x640xbf16, #tpu.memory_space<vmem>>, vector<2x128xbf16>,
    %c0_44 = arith.constant 0 : index
    %c0_45 = arith.constant 0 : index
    %64 = vector.load %arg21[%c0_44, %c0_45] : memref<64x640xbf16, #tpu.memory_space<vmem>>, vector<64x640xbf16>
    %c0_46 = arith.constant 0 : index
    %c0_47 = arith.constant 0 : index
    %c0_48 = arith.constant 0 : index
    %65 = vector.load %arg6[%c0_46, %c0_47, %c0_48] : memref<2x640x128xbf16, #tpu.memory_space<vmem>>, vector<1x640x128xbf16>
    %66 = vector.shape_cast %65 : vector<1x640x128xbf16> to vector<640x128xbf16>
    %cst_49 = arith.constant dense<0.000000e+00> : vector<64x128xf32>
    %67 = tpu.matmul %64, %66, %cst_49 {dimension_numbers = #tpu.dot_dimension_numbers<[1], [0], [0], [1], [0, 0, 1, 1], [], []>} : vector<64x640xbf16>, vector<640x128xbf16>, vector<64x128xf32> -> vector<64x128xf32>
    %c0_50 = arith.constant 0 : index
    %c0_51 = arith.constant 0 : index
    %c0_52 = arith.constant 0 : index
    %68 = vector.load %arg7[%c0_50, %c0_51, %c0_52] : memref<2x1x128xf32, #tpu.memory_space<vmem>>, vector<1x1x128xf32>
    %69 = vector.shape_cast %68 : vector<1x1x128xf32> to vector<1x128xf32>
    %70 = vector.broadcast %69 : vector<1x128xf32> to vector<64x128xf32>
    %71 = arith.addf %67, %70 : vector<64x128xf32>
    %cst_53 = arith.constant 0.000000e+00 : f32
    %72 = vector.broadcast %cst_53 : f32 to vector<64x128xf32>
    %73 = arith.maximumf %71, %72 : vector<64x128xf32>
    %74 = arith.addf %73, %2 : vector<64x128xf32>
    %c1_54 = arith.constant 1 : index
    %c0_55 = arith.constant 0 : index
    %c0_56 = arith.constant 0 : index
    %75 = vector.load %arg4[%c1_54, %c0_55, %c0_56] : memref<2x1x128xf32, #tpu.memory_space<vmem>>, vector<1x1x128xf32>
    %76 = vector.shape_cast %75 : vector<1x1x128xf32> to vector<1x128xf32>
    %c1_57 = arith.constant 1 : index
    %c0_58 = arith.constant 0 : index
    %c0_59 = arith.constant 0 : index
    %77 = vector.load %arg5[%c1_57, %c0_58, %c0_59] : memref<2x1x128xf32, #tpu.memory_space<vmem>>, vector<1x1x128xf32>
    %78 = vector.shape_cast %77 : vector<1x1x128xf32> to vector<1x128xf32>
    %cst_60 = arith.constant dense<0.000000e+00> : vector<64xf32>
    %79 = vector.multi_reduction <add>, %74, %cst_60 [1] : vector<64x128xf32> to vector<64xf32>
    %80 = vector.shape_cast %79 : vector<64xf32> to vector<64x1xf32>
    %cst_61 = arith.constant 1.280000e+02 : f32
    %81 = vector.broadcast %cst_61 : f32 to vector<64x1xf32>
    %82 = arith.divf %80, %81 : vector<64x1xf32>
    %83 = vector.broadcast %82 : vector<64x1xf32> to vector<64x128xf32>
    %84 = arith.subf %74, %83 : vector<64x128xf32>
    %85 = arith.mulf %84, %84 : vector<64x128xf32>
    %cst_62 = arith.constant dense<0.000000e+00> : vector<64xf32>
    %86 = vector.multi_reduction <add>, %85, %cst_62 [1] : vector<64x128xf32> to vector<64xf32>
    %87 = vector.shape_cast %86 : vector<64xf32> to vector<64x1xf32>
    %cst_63 = arith.constant 1.280000e+02 : f32
    %88 = vector.broadcast %cst_63 : f32 to vector<64x1xf32>
    %89 = arith.divf %87, %88 : vector<64x1xf32>
    %cst_64 = arith.constant 9.99999974E-6 : f32
    %90 = vector.broadcast %cst_64 : f32 to vector<64x1xf32>
    %91 = arith.addf %89, %90 : vector<64x1xf32>
    %92 = math.rsqrt %91 : vector<64x1xf32>
    %93 = vector.broadcast %92 : vector<64x1xf32> to vector<64x128xf32>
    %94 = arith.mulf %84, %93 : vector<64x128xf32>
    %95 = vector.broadcast %76 : vector<1x128xf32> to vector<64x128xf32>
    %96 = arith.mulf %94, %95 : vector<64x128xf32>
    %97 = vector.broadcast %78 : vector<1x128xf32> to vector<64x128xf32>
    %98 = arith.addf %96, %97 : vector<64x128xf32>
    %99 = arith.truncf %98 : vector<64x128xf32> to vector<64x128xbf16>
    %100 = vector.extract_strided_slice %99 {offsets = [0, 0], sizes = [30, 128], strides = [1, 1]} : vector<64x128xbf16> to vector<30x128xbf16>
    %c2_65 = arith.constant 2 : index
    %c0_66 = arith.constant 0 : index
    %101 = vector.load %arg21[%c2_65, %c0_66] : memref<64x640xbf16, #tpu.memory_space<vmem>>, vector<30x128xbf16>
    tpu.vector_store %arg21[%c2_65, %c0_66], %100 {strides = array<i32>} : memref<64x640xbf16, #tpu.memory_space<vmem>>, vector<30x128xbf16>,
    %cst_67 = arith.constant 0.000000e+00 : bf16
    %102 = vector.broadcast %cst_67 : bf16 to vector<2x128xbf16>
    %c0_68 = arith.constant 0 : index
    %c0_69 = arith.constant 0 : index
    %103 = vector.load %arg21[%c0_68, %c0_69] : memref<64x640xbf16, #tpu.memory_space<vmem>>, vector<2x128xbf16>
    tpu.vector_store %arg21[%c0_68, %c0_69], %102 {strides = array<i32>} : memref<64x640xbf16, #tpu.memory_space<vmem>>, vector<2x128xbf16>,
    %104 = vector.extract_strided_slice %99 {offsets = [0, 0], sizes = [31, 128], strides = [1, 1]} : vector<64x128xbf16> to vector<31x128xbf16>
    %c1_70 = arith.constant 1 : index
    %c128_71 = arith.constant 128 : index
    %105 = vector.load %arg21[%c1_70, %c128_71] : memref<64x640xbf16, #tpu.memory_space<vmem>>, vector<31x128xbf16>
    tpu.vector_store %arg21[%c1_70, %c128_71], %104 {strides = array<i32>} : memref<64x640xbf16, #tpu.memory_space<vmem>>, vector<31x128xbf16>,
    %cst_72 = arith.constant 0.000000e+00 : bf16
    %106 = vector.broadcast %cst_72 : bf16 to vector<1x128xbf16>
    %c0_73 = arith.constant 0 : index
    %c128_74 = arith.constant 128 : index
    %107 = vector.load %arg21[%c0_73, %c128_74] : memref<64x640xbf16, #tpu.memory_space<vmem>>, vector<1x128xbf16>
    tpu.vector_store %arg21[%c0_73, %c128_74], %106 {strides = array<i32>} : memref<64x640xbf16, #tpu.memory_space<vmem>>, vector<1x128xbf16>,
    %108 = vector.extract_strided_slice %99 {offsets = [0, 0], sizes = [32, 128], strides = [1, 1]} : vector<64x128xbf16> to vector<32x128xbf16>
    %c0_75 = arith.constant 0 : index
    %c256_76 = arith.constant 256 : index
    %109 = vector.load %arg21[%c0_75, %c256_76] : memref<64x640xbf16, #tpu.memory_space<vmem>>, vector<32x128xbf16>
    tpu.vector_store %arg21[%c0_75, %c256_76], %108 {strides = array<i32>} : memref<64x640xbf16, #tpu.memory_space<vmem>>, vector<32x128xbf16>,
    %110 = vector.extract_strided_slice %99 {offsets = [1, 0], sizes = [31, 128], strides = [1, 1]} : vector<64x128xbf16> to vector<31x128xbf16>
    %c0_77 = arith.constant 0 : index
    %c384_78 = arith.constant 384 : index
    %111 = vector.load %arg21[%c0_77, %c384_78] : memref<64x640xbf16, #tpu.memory_space<vmem>>, vector<31x128xbf16>
    tpu.vector_store %arg21[%c0_77, %c384_78], %110 {strides = array<i32>} : memref<64x640xbf16, #tpu.memory_space<vmem>>, vector<31x128xbf16>,
    %cst_79 = arith.constant 0.000000e+00 : bf16
    %112 = vector.broadcast %cst_79 : bf16 to vector<1x128xbf16>
    %c31_80 = arith.constant 31 : index
    %c384_81 = arith.constant 384 : index
    %113 = vector.load %arg21[%c31_80, %c384_81] : memref<64x640xbf16, #tpu.memory_space<vmem>>, vector<1x128xbf16>
    tpu.vector_store %arg21[%c31_80, %c384_81], %112 {strides = array<i32>} : memref<64x640xbf16, #tpu.memory_space<vmem>>, vector<1x128xbf16>,
    %114 = vector.extract_strided_slice %99 {offsets = [2, 0], sizes = [30, 128], strides = [1, 1]} : vector<64x128xbf16> to vector<30x128xbf16>
    %c0_82 = arith.constant 0 : index
    %c512_83 = arith.constant 512 : index
    %115 = vector.load %arg21[%c0_82, %c512_83] : memref<64x640xbf16, #tpu.memory_space<vmem>>, vector<30x128xbf16>
    tpu.vector_store %arg21[%c0_82, %c512_83], %114 {strides = array<i32>} : memref<64x640xbf16, #tpu.memory_space<vmem>>, vector<30x128xbf16>,
    %cst_84 = arith.constant 0.000000e+00 : bf16
    %116 = vector.broadcast %cst_84 : bf16 to vector<2x128xbf16>
    %c30_85 = arith.constant 30 : index
    %c512_86 = arith.constant 512 : index
    %117 = vector.load %arg21[%c30_85, %c512_86] : memref<64x640xbf16, #tpu.memory_space<vmem>>, vector<2x128xbf16>
    tpu.vector_store %arg21[%c30_85, %c512_86], %116 {strides = array<i32>} : memref<64x640xbf16, #tpu.memory_space<vmem>>, vector<2x128xbf16>,
    %118 = vector.extract_strided_slice %99 {offsets = [32, 0], sizes = [30, 128], strides = [1, 1]} : vector<64x128xbf16> to vector<30x128xbf16>
    %c34_87 = arith.constant 34 : index
    %c0_88 = arith.constant 0 : index
    %119 = vector.load %arg21[%c34_87, %c0_88] : memref<64x640xbf16, #tpu.memory_space<vmem>>, vector<30x128xbf16>
    tpu.vector_store %arg21[%c34_87, %c0_88], %118 {strides = array<i32>} : memref<64x640xbf16, #tpu.memory_space<vmem>>, vector<30x128xbf16>,
    %cst_89 = arith.constant 0.000000e+00 : bf16
    %120 = vector.broadcast %cst_89 : bf16 to vector<2x128xbf16>
    %c32_90 = arith.constant 32 : index
    %c0_91 = arith.constant 0 : index
    %121 = vector.load %arg21[%c32_90, %c0_91] : memref<64x640xbf16, #tpu.memory_space<vmem>>, vector<2x128xbf16>
    tpu.vector_store %arg21[%c32_90, %c0_91], %120 {strides = array<i32>} : memref<64x640xbf16, #tpu.memory_space<vmem>>, vector<2x128xbf16>,
    %122 = vector.extract_strided_slice %99 {offsets = [32, 0], sizes = [31, 128], strides = [1, 1]} : vector<64x128xbf16> to vector<31x128xbf16>
    %c33_92 = arith.constant 33 : index
    %c128_93 = arith.constant 128 : index
    %123 = vector.load %arg21[%c33_92, %c128_93] : memref<64x640xbf16, #tpu.memory_space<vmem>>, vector<31x128xbf16>
    tpu.vector_store %arg21[%c33_92, %c128_93], %122 {strides = array<i32>} : memref<64x640xbf16, #tpu.memory_space<vmem>>, vector<31x128xbf16>,
    %cst_94 = arith.constant 0.000000e+00 : bf16
    %124 = vector.broadcast %cst_94 : bf16 to vector<1x128xbf16>
    %c32_95 = arith.constant 32 : index
    %c128_96 = arith.constant 128 : index
    %125 = vector.load %arg21[%c32_95, %c128_96] : memref<64x640xbf16, #tpu.memory_space<vmem>>, vector<1x128xbf16>
    tpu.vector_store %arg21[%c32_95, %c128_96], %124 {strides = array<i32>} : memref<64x640xbf16, #tpu.memory_space<vmem>>, vector<1x128xbf16>,
    %126 = vector.extract_strided_slice %99 {offsets = [32, 0], sizes = [32, 128], strides = [1, 1]} : vector<64x128xbf16> to vector<32x128xbf16>
    %c32_97 = arith.constant 32 : index
    %c256_98 = arith.constant 256 : index
    %127 = vector.load %arg21[%c32_97, %c256_98] : memref<64x640xbf16, #tpu.memory_space<vmem>>, vector<32x128xbf16>
    tpu.vector_store %arg21[%c32_97, %c256_98], %126 {strides = array<i32>} : memref<64x640xbf16, #tpu.memory_space<vmem>>, vector<32x128xbf16>,
    %128 = vector.extract_strided_slice %99 {offsets = [33, 0], sizes = [31, 128], strides = [1, 1]} : vector<64x128xbf16> to vector<31x128xbf16>
    %c32_99 = arith.constant 32 : index
    %c384_100 = arith.constant 384 : index
    %129 = vector.load %arg21[%c32_99, %c384_100] : memref<64x640xbf16, #tpu.memory_space<vmem>>, vector<31x128xbf16>
    tpu.vector_store %arg21[%c32_99, %c384_100], %128 {strides = array<i32>} : memref<64x640xbf16, #tpu.memory_space<vmem>>, vector<31x128xbf16>,
    %cst_101 = arith.constant 0.000000e+00 : bf16
    %130 = vector.broadcast %cst_101 : bf16 to vector<1x128xbf16>
    %c63_102 = arith.constant 63 : index
    %c384_103 = arith.constant 384 : index
    %131 = vector.load %arg21[%c63_102, %c384_103] : memref<64x640xbf16, #tpu.memory_space<vmem>>, vector<1x128xbf16>
    tpu.vector_store %arg21[%c63_102, %c384_103], %130 {strides = array<i32>} : memref<64x640xbf16, #tpu.memory_space<vmem>>, vector<1x128xbf16>,
    %132 = vector.extract_strided_slice %99 {offsets = [34, 0], sizes = [30, 128], strides = [1, 1]} : vector<64x128xbf16> to vector<30x128xbf16>
    %c32_104 = arith.constant 32 : index
    %c512_105 = arith.constant 512 : index
    %133 = vector.load %arg21[%c32_104, %c512_105] : memref<64x640xbf16, #tpu.memory_space<vmem>>, vector<30x128xbf16>
    tpu.vector_store %arg21[%c32_104, %c512_105], %132 {strides = array<i32>} : memref<64x640xbf16, #tpu.memory_space<vmem>>, vector<30x128xbf16>,
    %cst_106 = arith.constant 0.000000e+00 : bf16
    %134 = vector.broadcast %cst_106 : bf16 to vector<2x128xbf16>
    %c62_107 = arith.constant 62 : index
    %c512_108 = arith.constant 512 : index
    %135 = vector.load %arg21[%c62_107, %c512_108] : memref<64x640xbf16, #tpu.memory_space<vmem>>, vector<2x128xbf16>
    tpu.vector_store %arg21[%c62_107, %c512_108], %134 {strides = array<i32>} : memref<64x640xbf16, #tpu.memory_space<vmem>>, vector<2x128xbf16>,
    %c0_109 = arith.constant 0 : index
    %c0_110 = arith.constant 0 : index
    %136 = vector.load %arg21[%c0_109, %c0_110] : memref<64x640xbf16, #tpu.memory_space<vmem>>, vector<64x640xbf16>
    %c1_111 = arith.constant 1 : index
    %c0_112 = arith.constant 0 : index
    %c0_113 = arith.constant 0 : index
    %137 = vector.load %arg6[%c1_111, %c0_112, %c0_113] : memref<2x640x128xbf16, #tpu.memory_space<vmem>>, vector<1x640x128xbf16>
    %138 = vector.shape_cast %137 : vector<1x640x128xbf16> to vector<640x128xbf16>
    %cst_114 = arith.constant dense<0.000000e+00> : vector<64x128xf32>
    %139 = tpu.matmul %136, %138, %cst_114 {dimension_numbers = #tpu.dot_dimension_numbers<[1], [0], [0], [1], [0, 0, 1, 1], [], []>} : vector<64x640xbf16>, vector<640x128xbf16>, vector<64x128xf32> -> vector<64x128xf32>
    %c1_115 = arith.constant 1 : index
    %c0_116 = arith.constant 0 : index
    %c0_117 = arith.constant 0 : index
    %140 = vector.load %arg7[%c1_115, %c0_116, %c0_117] : memref<2x1x128xf32, #tpu.memory_space<vmem>>, vector<1x1x128xf32>
    %141 = vector.shape_cast %140 : vector<1x1x128xf32> to vector<1x128xf32>
    %142 = vector.broadcast %141 : vector<1x128xf32> to vector<64x128xf32>
    %143 = arith.addf %139, %142 : vector<64x128xf32>
    %cst_118 = arith.constant 0.000000e+00 : f32
    %144 = vector.broadcast %cst_118 : f32 to vector<64x128xf32>
    %145 = arith.maximumf %143, %144 : vector<64x128xf32>
    %146 = arith.addf %145, %74 : vector<64x128xf32>
    %c0_119 = arith.constant 0 : index
    %c0_120 = arith.constant 0 : index
    %147 = vector.load %arg8[%c0_119, %c0_120] : memref<1x128xf32, #tpu.memory_space<vmem>>, vector<1x128xf32>
    %c0_121 = arith.constant 0 : index
    %c0_122 = arith.constant 0 : index
    %148 = vector.load %arg9[%c0_121, %c0_122] : memref<1x128xf32, #tpu.memory_space<vmem>>, vector<1x128xf32>
    %cst_123 = arith.constant dense<0.000000e+00> : vector<64xf32>
    %149 = vector.multi_reduction <add>, %146, %cst_123 [1] : vector<64x128xf32> to vector<64xf32>
    %150 = vector.shape_cast %149 : vector<64xf32> to vector<64x1xf32>
    %cst_124 = arith.constant 1.280000e+02 : f32
    %151 = vector.broadcast %cst_124 : f32 to vector<64x1xf32>
    %152 = arith.divf %150, %151 : vector<64x1xf32>
    %153 = vector.broadcast %152 : vector<64x1xf32> to vector<64x128xf32>
    %154 = arith.subf %146, %153 : vector<64x128xf32>
    %155 = arith.mulf %154, %154 : vector<64x128xf32>
    %cst_125 = arith.constant dense<0.000000e+00> : vector<64xf32>
    %156 = vector.multi_reduction <add>, %155, %cst_125 [1] : vector<64x128xf32> to vector<64xf32>
    %157 = vector.shape_cast %156 : vector<64xf32> to vector<64x1xf32>
    %cst_126 = arith.constant 1.280000e+02 : f32
    %158 = vector.broadcast %cst_126 : f32 to vector<64x1xf32>
    %159 = arith.divf %157, %158 : vector<64x1xf32>
    %cst_127 = arith.constant 9.99999974E-6 : f32
    %160 = vector.broadcast %cst_127 : f32 to vector<64x1xf32>
    %161 = arith.addf %159, %160 : vector<64x1xf32>
    %162 = math.rsqrt %161 : vector<64x1xf32>
    %163 = vector.broadcast %162 : vector<64x1xf32> to vector<64x128xf32>
    %164 = arith.mulf %154, %163 : vector<64x128xf32>
    %165 = vector.broadcast %147 : vector<1x128xf32> to vector<64x128xf32>
    %166 = arith.mulf %164, %165 : vector<64x128xf32>
    %167 = vector.broadcast %148 : vector<1x128xf32> to vector<64x128xf32>
    %168 = arith.addf %166, %167 : vector<64x128xf32>
    %169 = arith.truncf %168 : vector<64x128xf32> to vector<64x128xbf16>
    %c0_128 = arith.constant 0 : index
    %c0_129 = arith.constant 0 : index
    %170 = vector.load %arg10[%c0_128, %c0_129] : memref<128x384xbf16, #tpu.memory_space<vmem>>, vector<128x384xbf16>
    %cst_130 = arith.constant dense<0.000000e+00> : vector<64x384xf32>
    %171 = tpu.matmul %169, %170, %cst_130 {dimension_numbers = #tpu.dot_dimension_numbers<[1], [0], [0], [1], [0, 0, 1, 1], [], []>} : vector<64x128xbf16>, vector<128x384xbf16>, vector<64x384xf32> -> vector<64x384xf32>
    %c0_131 = arith.constant 0 : index
    %c0_132 = arith.constant 0 : index
    %172 = vector.load %arg11[%c0_131, %c0_132] : memref<1x384xf32, #tpu.memory_space<vmem>>, vector<1x384xf32>
    %173 = vector.broadcast %172 : vector<1x384xf32> to vector<64x384xf32>
    %174 = arith.addf %171, %173 : vector<64x384xf32>
    %175 = vector.extract_strided_slice %174 {offsets = [0, 0], sizes = [32, 128], strides = [1, 1]} : vector<64x384xf32> to vector<32x128xf32>
    %cst_133 = arith.constant 0.176776692 : f32
    %176 = vector.broadcast %cst_133 : f32 to vector<32x128xf32>
    %177 = arith.mulf %175, %176 : vector<32x128xf32>
    %178 = vector.extract_strided_slice %174 {offsets = [0, 128], sizes = [32, 128], strides = [1, 1]} : vector<64x384xf32> to vector<32x128xf32>
    %179 = vector.extract_strided_slice %174 {offsets = [0, 256], sizes = [32, 128], strides = [1, 1]} : vector<64x384xf32> to vector<32x128xf32>
    %c0_134 = arith.constant 0 : index
    %c0_135 = arith.constant 0 : index
    %c0_136 = arith.constant 0 : index
    %180 = vector.load %arg3[%c0_134, %c0_135, %c0_136] : memref<2x1x32xf32, #tpu.memory_space<vmem>>, vector<1x1x32xf32>
    %181 = vector.shape_cast %180 : vector<1x1x32xf32> to vector<1x32xf32>
    %cst_137 = arith.constant 0.000000e+00 : f32
    %182 = vector.broadcast %cst_137 : f32 to vector<1x32xf32>
    %183 = arith.cmpf oeq, %181, %182 : vector<1x32xf32>
    %cst_138 = arith.constant -1.000000e+30 : f32
    %cst_139 = arith.constant 0.000000e+00 : f32
    %184 = vector.broadcast %cst_138 : f32 to vector<1x32xf32>
    %185 = vector.broadcast %cst_139 : f32 to vector<1x32xf32>
    %186 = arith.select %183, %184, %185 : vector<1x32xi1>, vector<1x32xf32>
    %187 = vector.extract_strided_slice %177 {offsets = [0, 0], sizes = [32, 32], strides = [1, 1]} : vector<32x128xf32> to vector<32x32xf32>
    %188 = arith.truncf %187 : vector<32x32xf32> to vector<32x32xbf16>
    %189 = vector.extract_strided_slice %178 {offsets = [0, 0], sizes = [32, 32], strides = [1, 1]} : vector<32x128xf32> to vector<32x32xf32>
    %190 = arith.truncf %189 : vector<32x32xf32> to vector<32x32xbf16>
    %191 = vector.extract_strided_slice %179 {offsets = [0, 0], sizes = [32, 32], strides = [1, 1]} : vector<32x128xf32> to vector<32x32xf32>
    %192 = arith.truncf %191 : vector<32x32xf32> to vector<32x32xbf16>
    %cst_140 = arith.constant dense<0.000000e+00> : vector<32x32xf32>
    %193 = tpu.matmul %188, %190, %cst_140 {dimension_numbers = #tpu.dot_dimension_numbers<[1], [1], [0], [0], [0, 0, 1, 0], [], []>} : vector<32x32xbf16>, vector<32x32xbf16>, vector<32x32xf32> -> vector<32x32xf32>
    %194 = vector.broadcast %186 : vector<1x32xf32> to vector<32x32xf32>
    %195 = arith.addf %193, %194 : vector<32x32xf32>
    %cst_141 = arith.constant dense<0xFF800000> : vector<32xf32>
    %196 = vector.multi_reduction <maximumf>, %195, %cst_141 [1] : vector<32x32xf32> to vector<32xf32>
    %197 = vector.shape_cast %196 : vector<32xf32> to vector<32x1xf32>
    %198 = vector.broadcast %197 : vector<32x1xf32> to vector<32x32xf32>
    %199 = arith.subf %195, %198 : vector<32x32xf32>
    %200 = math.exp %199 : vector<32x32xf32>
    %cst_142 = arith.constant dense<0.000000e+00> : vector<32xf32>
    %201 = vector.multi_reduction <add>, %200, %cst_142 [1] : vector<32x32xf32> to vector<32xf32>
    %202 = vector.shape_cast %201 : vector<32xf32> to vector<32x1xf32>
    %203 = tpu.reciprocal %202 {approx = true} : vector<32x1xf32> -> vector<32x1xf32>
    %204 = vector.broadcast %203 : vector<32x1xf32> to vector<32x32xf32>
    %205 = arith.mulf %200, %204 : vector<32x32xf32>
    %206 = arith.truncf %205 : vector<32x32xf32> to vector<32x32xbf16>
    %cst_143 = arith.constant dense<0.000000e+00> : vector<32x32xf32>
    %207 = tpu.matmul %206, %192, %cst_143 {dimension_numbers = #tpu.dot_dimension_numbers<[1], [0], [0], [1], [0, 0, 1, 1], [], []>} : vector<32x32xbf16>, vector<32x32xbf16>, vector<32x32xf32> -> vector<32x32xf32>
    %208 = arith.truncf %207 : vector<32x32xf32> to vector<32x32xbf16>
    %209 = vector.extract_strided_slice %177 {offsets = [0, 32], sizes = [32, 32], strides = [1, 1]} : vector<32x128xf32> to vector<32x32xf32>
    %210 = arith.truncf %209 : vector<32x32xf32> to vector<32x32xbf16>
    %211 = vector.extract_strided_slice %178 {offsets = [0, 32], sizes = [32, 32], strides = [1, 1]} : vector<32x128xf32> to vector<32x32xf32>
    %212 = arith.truncf %211 : vector<32x32xf32> to vector<32x32xbf16>
    %213 = vector.extract_strided_slice %179 {offsets = [0, 32], sizes = [32, 32], strides = [1, 1]} : vector<32x128xf32> to vector<32x32xf32>
    %214 = arith.truncf %213 : vector<32x32xf32> to vector<32x32xbf16>
    %cst_144 = arith.constant dense<0.000000e+00> : vector<32x32xf32>
    %215 = tpu.matmul %210, %212, %cst_144 {dimension_numbers = #tpu.dot_dimension_numbers<[1], [1], [0], [0], [0, 0, 1, 0], [], []>} : vector<32x32xbf16>, vector<32x32xbf16>, vector<32x32xf32> -> vector<32x32xf32>
    %216 = vector.broadcast %186 : vector<1x32xf32> to vector<32x32xf32>
    %217 = arith.addf %215, %216 : vector<32x32xf32>
    %cst_145 = arith.constant dense<0xFF800000> : vector<32xf32>
    %218 = vector.multi_reduction <maximumf>, %217, %cst_145 [1] : vector<32x32xf32> to vector<32xf32>
    %219 = vector.shape_cast %218 : vector<32xf32> to vector<32x1xf32>
    %220 = vector.broadcast %219 : vector<32x1xf32> to vector<32x32xf32>
    %221 = arith.subf %217, %220 : vector<32x32xf32>
    %222 = math.exp %221 : vector<32x32xf32>
    %cst_146 = arith.constant dense<0.000000e+00> : vector<32xf32>
    %223 = vector.multi_reduction <add>, %222, %cst_146 [1] : vector<32x32xf32> to vector<32xf32>
    %224 = vector.shape_cast %223 : vector<32xf32> to vector<32x1xf32>
    %225 = tpu.reciprocal %224 {approx = true} : vector<32x1xf32> -> vector<32x1xf32>
    %226 = vector.broadcast %225 : vector<32x1xf32> to vector<32x32xf32>
    %227 = arith.mulf %222, %226 : vector<32x32xf32>
    %228 = arith.truncf %227 : vector<32x32xf32> to vector<32x32xbf16>
    %cst_147 = arith.constant dense<0.000000e+00> : vector<32x32xf32>
    %229 = tpu.matmul %228, %214, %cst_147 {dimension_numbers = #tpu.dot_dimension_numbers<[1], [0], [0], [1], [0, 0, 1, 1], [], []>} : vector<32x32xbf16>, vector<32x32xbf16>, vector<32x32xf32> -> vector<32x32xf32>
    %230 = arith.truncf %229 : vector<32x32xf32> to vector<32x32xbf16>
    %231 = vector.extract_strided_slice %177 {offsets = [0, 64], sizes = [32, 32], strides = [1, 1]} : vector<32x128xf32> to vector<32x32xf32>
    %232 = arith.truncf %231 : vector<32x32xf32> to vector<32x32xbf16>
    %233 = vector.extract_strided_slice %178 {offsets = [0, 64], sizes = [32, 32], strides = [1, 1]} : vector<32x128xf32> to vector<32x32xf32>
    %234 = arith.truncf %233 : vector<32x32xf32> to vector<32x32xbf16>
    %235 = vector.extract_strided_slice %179 {offsets = [0, 64], sizes = [32, 32], strides = [1, 1]} : vector<32x128xf32> to vector<32x32xf32>
    %236 = arith.truncf %235 : vector<32x32xf32> to vector<32x32xbf16>
    %cst_148 = arith.constant dense<0.000000e+00> : vector<32x32xf32>
    %237 = tpu.matmul %232, %234, %cst_148 {dimension_numbers = #tpu.dot_dimension_numbers<[1], [1], [0], [0], [0, 0, 1, 0], [], []>} : vector<32x32xbf16>, vector<32x32xbf16>, vector<32x32xf32> -> vector<32x32xf32>
    %238 = vector.broadcast %186 : vector<1x32xf32> to vector<32x32xf32>
    %239 = arith.addf %237, %238 : vector<32x32xf32>
    %cst_149 = arith.constant dense<0xFF800000> : vector<32xf32>
    %240 = vector.multi_reduction <maximumf>, %239, %cst_149 [1] : vector<32x32xf32> to vector<32xf32>
    %241 = vector.shape_cast %240 : vector<32xf32> to vector<32x1xf32>
    %242 = vector.broadcast %241 : vector<32x1xf32> to vector<32x32xf32>
    %243 = arith.subf %239, %242 : vector<32x32xf32>
    %244 = math.exp %243 : vector<32x32xf32>
    %cst_150 = arith.constant dense<0.000000e+00> : vector<32xf32>
    %245 = vector.multi_reduction <add>, %244, %cst_150 [1] : vector<32x32xf32> to vector<32xf32>
    %246 = vector.shape_cast %245 : vector<32xf32> to vector<32x1xf32>
    %247 = tpu.reciprocal %246 {approx = true} : vector<32x1xf32> -> vector<32x1xf32>
    %248 = vector.broadcast %247 : vector<32x1xf32> to vector<32x32xf32>
    %249 = arith.mulf %244, %248 : vector<32x32xf32>
    %250 = arith.truncf %249 : vector<32x32xf32> to vector<32x32xbf16>
    %cst_151 = arith.constant dense<0.000000e+00> : vector<32x32xf32>
    %251 = tpu.matmul %250, %236, %cst_151 {dimension_numbers = #tpu.dot_dimension_numbers<[1], [0], [0], [1], [0, 0, 1, 1], [], []>} : vector<32x32xbf16>, vector<32x32xbf16>, vector<32x32xf32> -> vector<32x32xf32>
    %252 = arith.truncf %251 : vector<32x32xf32> to vector<32x32xbf16>
    %253 = vector.extract_strided_slice %177 {offsets = [0, 96], sizes = [32, 32], strides = [1, 1]} : vector<32x128xf32> to vector<32x32xf32>
    %254 = arith.truncf %253 : vector<32x32xf32> to vector<32x32xbf16>
    %255 = vector.extract_strided_slice %178 {offsets = [0, 96], sizes = [32, 32], strides = [1, 1]} : vector<32x128xf32> to vector<32x32xf32>
    %256 = arith.truncf %255 : vector<32x32xf32> to vector<32x32xbf16>
    %257 = vector.extract_strided_slice %179 {offsets = [0, 96], sizes = [32, 32], strides = [1, 1]} : vector<32x128xf32> to vector<32x32xf32>
    %258 = arith.truncf %257 : vector<32x32xf32> to vector<32x32xbf16>
    %cst_152 = arith.constant dense<0.000000e+00> : vector<32x32xf32>
    %259 = tpu.matmul %254, %256, %cst_152 {dimension_numbers = #tpu.dot_dimension_numbers<[1], [1], [0], [0], [0, 0, 1, 0], [], []>} : vector<32x32xbf16>, vector<32x32xbf16>, vector<32x32xf32> -> vector<32x32xf32>
    %260 = vector.broadcast %186 : vector<1x32xf32> to vector<32x32xf32>
    %261 = arith.addf %259, %260 : vector<32x32xf32>
    %cst_153 = arith.constant dense<0xFF800000> : vector<32xf32>
    %262 = vector.multi_reduction <maximumf>, %261, %cst_153 [1] : vector<32x32xf32> to vector<32xf32>
    %263 = vector.shape_cast %262 : vector<32xf32> to vector<32x1xf32>
    %264 = vector.broadcast %263 : vector<32x1xf32> to vector<32x32xf32>
    %265 = arith.subf %261, %264 : vector<32x32xf32>
    %266 = math.exp %265 : vector<32x32xf32>
    %cst_154 = arith.constant dense<0.000000e+00> : vector<32xf32>
    %267 = vector.multi_reduction <add>, %266, %cst_154 [1] : vector<32x32xf32> to vector<32xf32>
    %268 = vector.shape_cast %267 : vector<32xf32> to vector<32x1xf32>
    %269 = tpu.reciprocal %268 {approx = true} : vector<32x1xf32> -> vector<32x1xf32>
    %270 = vector.broadcast %269 : vector<32x1xf32> to vector<32x32xf32>
    %271 = arith.mulf %266, %270 : vector<32x32xf32>
    %272 = arith.truncf %271 : vector<32x32xf32> to vector<32x32xbf16>
    %cst_155 = arith.constant dense<0.000000e+00> : vector<32x32xf32>
    %273 = tpu.matmul %272, %258, %cst_155 {dimension_numbers = #tpu.dot_dimension_numbers<[1], [0], [0], [1], [0, 0, 1, 1], [], []>} : vector<32x32xbf16>, vector<32x32xbf16>, vector<32x32xf32> -> vector<32x32xf32>
    %274 = arith.truncf %273 : vector<32x32xf32> to vector<32x32xbf16>
    %275 = tpu.concatenate %208, %230, %252, %274 in 1 : vector<32x32xbf16>, vector<32x32xbf16>, vector<32x32xbf16>, vector<32x32xbf16> -> vector<32x128xbf16>
    %c0_156 = arith.constant 0 : index
    %c0_157 = arith.constant 0 : index
    %276 = vector.load %arg22[%c0_156, %c0_157] : memref<64x128xbf16, #tpu.memory_space<vmem>>, vector<32x128xbf16>
    tpu.vector_store %arg22[%c0_156, %c0_157], %275 {strides = array<i32>} : memref<64x128xbf16, #tpu.memory_space<vmem>>, vector<32x128xbf16>,
    %277 = vector.extract_strided_slice %174 {offsets = [32, 0], sizes = [32, 128], strides = [1, 1]} : vector<64x384xf32> to vector<32x128xf32>
    %cst_158 = arith.constant 0.176776692 : f32
    %278 = vector.broadcast %cst_158 : f32 to vector<32x128xf32>
    %279 = arith.mulf %277, %278 : vector<32x128xf32>
    %280 = vector.extract_strided_slice %174 {offsets = [32, 128], sizes = [32, 128], strides = [1, 1]} : vector<64x384xf32> to vector<32x128xf32>
    %281 = vector.extract_strided_slice %174 {offsets = [32, 256], sizes = [32, 128], strides = [1, 1]} : vector<64x384xf32> to vector<32x128xf32>
    %c1_159 = arith.constant 1 : index
    %c0_160 = arith.constant 0 : index
    %c0_161 = arith.constant 0 : index
    %282 = vector.load %arg3[%c1_159, %c0_160, %c0_161] : memref<2x1x32xf32, #tpu.memory_space<vmem>>, vector<1x1x32xf32>
    %283 = vector.shape_cast %282 : vector<1x1x32xf32> to vector<1x32xf32>
    %cst_162 = arith.constant 0.000000e+00 : f32
    %284 = vector.broadcast %cst_162 : f32 to vector<1x32xf32>
    %285 = arith.cmpf oeq, %283, %284 : vector<1x32xf32>
    %cst_163 = arith.constant -1.000000e+30 : f32
    %cst_164 = arith.constant 0.000000e+00 : f32
    %286 = vector.broadcast %cst_163 : f32 to vector<1x32xf32>
    %287 = vector.broadcast %cst_164 : f32 to vector<1x32xf32>
    %288 = arith.select %285, %286, %287 : vector<1x32xi1>, vector<1x32xf32>
    %289 = vector.extract_strided_slice %279 {offsets = [0, 0], sizes = [32, 32], strides = [1, 1]} : vector<32x128xf32> to vector<32x32xf32>
    %290 = arith.truncf %289 : vector<32x32xf32> to vector<32x32xbf16>
    %291 = vector.extract_strided_slice %280 {offsets = [0, 0], sizes = [32, 32], strides = [1, 1]} : vector<32x128xf32> to vector<32x32xf32>
    %292 = arith.truncf %291 : vector<32x32xf32> to vector<32x32xbf16>
    %293 = vector.extract_strided_slice %281 {offsets = [0, 0], sizes = [32, 32], strides = [1, 1]} : vector<32x128xf32> to vector<32x32xf32>
    %294 = arith.truncf %293 : vector<32x32xf32> to vector<32x32xbf16>
    %cst_165 = arith.constant dense<0.000000e+00> : vector<32x32xf32>
    %295 = tpu.matmul %290, %292, %cst_165 {dimension_numbers = #tpu.dot_dimension_numbers<[1], [1], [0], [0], [0, 0, 1, 0], [], []>} : vector<32x32xbf16>, vector<32x32xbf16>, vector<32x32xf32> -> vector<32x32xf32>
    %296 = vector.broadcast %288 : vector<1x32xf32> to vector<32x32xf32>
    %297 = arith.addf %295, %296 : vector<32x32xf32>
    %cst_166 = arith.constant dense<0xFF800000> : vector<32xf32>
    %298 = vector.multi_reduction <maximumf>, %297, %cst_166 [1] : vector<32x32xf32> to vector<32xf32>
    %299 = vector.shape_cast %298 : vector<32xf32> to vector<32x1xf32>
    %300 = vector.broadcast %299 : vector<32x1xf32> to vector<32x32xf32>
    %301 = arith.subf %297, %300 : vector<32x32xf32>
    %302 = math.exp %301 : vector<32x32xf32>
    %cst_167 = arith.constant dense<0.000000e+00> : vector<32xf32>
    %303 = vector.multi_reduction <add>, %302, %cst_167 [1] : vector<32x32xf32> to vector<32xf32>
    %304 = vector.shape_cast %303 : vector<32xf32> to vector<32x1xf32>
    %305 = tpu.reciprocal %304 {approx = true} : vector<32x1xf32> -> vector<32x1xf32>
    %306 = vector.broadcast %305 : vector<32x1xf32> to vector<32x32xf32>
    %307 = arith.mulf %302, %306 : vector<32x32xf32>
    %308 = arith.truncf %307 : vector<32x32xf32> to vector<32x32xbf16>
    %cst_168 = arith.constant dense<0.000000e+00> : vector<32x32xf32>
    %309 = tpu.matmul %308, %294, %cst_168 {dimension_numbers = #tpu.dot_dimension_numbers<[1], [0], [0], [1], [0, 0, 1, 1], [], []>} : vector<32x32xbf16>, vector<32x32xbf16>, vector<32x32xf32> -> vector<32x32xf32>
    %310 = arith.truncf %309 : vector<32x32xf32> to vector<32x32xbf16>
    %311 = vector.extract_strided_slice %279 {offsets = [0, 32], sizes = [32, 32], strides = [1, 1]} : vector<32x128xf32> to vector<32x32xf32>
    %312 = arith.truncf %311 : vector<32x32xf32> to vector<32x32xbf16>
    %313 = vector.extract_strided_slice %280 {offsets = [0, 32], sizes = [32, 32], strides = [1, 1]} : vector<32x128xf32> to vector<32x32xf32>
    %314 = arith.truncf %313 : vector<32x32xf32> to vector<32x32xbf16>
    %315 = vector.extract_strided_slice %281 {offsets = [0, 32], sizes = [32, 32], strides = [1, 1]} : vector<32x128xf32> to vector<32x32xf32>
    %316 = arith.truncf %315 : vector<32x32xf32> to vector<32x32xbf16>
    %cst_169 = arith.constant dense<0.000000e+00> : vector<32x32xf32>
    %317 = tpu.matmul %312, %314, %cst_169 {dimension_numbers = #tpu.dot_dimension_numbers<[1], [1], [0], [0], [0, 0, 1, 0], [], []>} : vector<32x32xbf16>, vector<32x32xbf16>, vector<32x32xf32> -> vector<32x32xf32>
    %318 = vector.broadcast %288 : vector<1x32xf32> to vector<32x32xf32>
    %319 = arith.addf %317, %318 : vector<32x32xf32>
    %cst_170 = arith.constant dense<0xFF800000> : vector<32xf32>
    %320 = vector.multi_reduction <maximumf>, %319, %cst_170 [1] : vector<32x32xf32> to vector<32xf32>
    %321 = vector.shape_cast %320 : vector<32xf32> to vector<32x1xf32>
    %322 = vector.broadcast %321 : vector<32x1xf32> to vector<32x32xf32>
    %323 = arith.subf %319, %322 : vector<32x32xf32>
    %324 = math.exp %323 : vector<32x32xf32>
    %cst_171 = arith.constant dense<0.000000e+00> : vector<32xf32>
    %325 = vector.multi_reduction <add>, %324, %cst_171 [1] : vector<32x32xf32> to vector<32xf32>
    %326 = vector.shape_cast %325 : vector<32xf32> to vector<32x1xf32>
    %327 = tpu.reciprocal %326 {approx = true} : vector<32x1xf32> -> vector<32x1xf32>
    %328 = vector.broadcast %327 : vector<32x1xf32> to vector<32x32xf32>
    %329 = arith.mulf %324, %328 : vector<32x32xf32>
    %330 = arith.truncf %329 : vector<32x32xf32> to vector<32x32xbf16>
    %cst_172 = arith.constant dense<0.000000e+00> : vector<32x32xf32>
    %331 = tpu.matmul %330, %316, %cst_172 {dimension_numbers = #tpu.dot_dimension_numbers<[1], [0], [0], [1], [0, 0, 1, 1], [], []>} : vector<32x32xbf16>, vector<32x32xbf16>, vector<32x32xf32> -> vector<32x32xf32>
    %332 = arith.truncf %331 : vector<32x32xf32> to vector<32x32xbf16>
    %333 = vector.extract_strided_slice %279 {offsets = [0, 64], sizes = [32, 32], strides = [1, 1]} : vector<32x128xf32> to vector<32x32xf32>
    %334 = arith.truncf %333 : vector<32x32xf32> to vector<32x32xbf16>
    %335 = vector.extract_strided_slice %280 {offsets = [0, 64], sizes = [32, 32], strides = [1, 1]} : vector<32x128xf32> to vector<32x32xf32>
    %336 = arith.truncf %335 : vector<32x32xf32> to vector<32x32xbf16>
    %337 = vector.extract_strided_slice %281 {offsets = [0, 64], sizes = [32, 32], strides = [1, 1]} : vector<32x128xf32> to vector<32x32xf32>
    %338 = arith.truncf %337 : vector<32x32xf32> to vector<32x32xbf16>
    %cst_173 = arith.constant dense<0.000000e+00> : vector<32x32xf32>
    %339 = tpu.matmul %334, %336, %cst_173 {dimension_numbers = #tpu.dot_dimension_numbers<[1], [1], [0], [0], [0, 0, 1, 0], [], []>} : vector<32x32xbf16>, vector<32x32xbf16>, vector<32x32xf32> -> vector<32x32xf32>
    %340 = vector.broadcast %288 : vector<1x32xf32> to vector<32x32xf32>
    %341 = arith.addf %339, %340 : vector<32x32xf32>
    %cst_174 = arith.constant dense<0xFF800000> : vector<32xf32>
    %342 = vector.multi_reduction <maximumf>, %341, %cst_174 [1] : vector<32x32xf32> to vector<32xf32>
    %343 = vector.shape_cast %342 : vector<32xf32> to vector<32x1xf32>
    %344 = vector.broadcast %343 : vector<32x1xf32> to vector<32x32xf32>
    %345 = arith.subf %341, %344 : vector<32x32xf32>
    %346 = math.exp %345 : vector<32x32xf32>
    %cst_175 = arith.constant dense<0.000000e+00> : vector<32xf32>
    %347 = vector.multi_reduction <add>, %346, %cst_175 [1] : vector<32x32xf32> to vector<32xf32>
    %348 = vector.shape_cast %347 : vector<32xf32> to vector<32x1xf32>
    %349 = tpu.reciprocal %348 {approx = true} : vector<32x1xf32> -> vector<32x1xf32>
    %350 = vector.broadcast %349 : vector<32x1xf32> to vector<32x32xf32>
    %351 = arith.mulf %346, %350 : vector<32x32xf32>
    %352 = arith.truncf %351 : vector<32x32xf32> to vector<32x32xbf16>
    %cst_176 = arith.constant dense<0.000000e+00> : vector<32x32xf32>
    %353 = tpu.matmul %352, %338, %cst_176 {dimension_numbers = #tpu.dot_dimension_numbers<[1], [0], [0], [1], [0, 0, 1, 1], [], []>} : vector<32x32xbf16>, vector<32x32xbf16>, vector<32x32xf32> -> vector<32x32xf32>
    %354 = arith.truncf %353 : vector<32x32xf32> to vector<32x32xbf16>
    %355 = vector.extract_strided_slice %279 {offsets = [0, 96], sizes = [32, 32], strides = [1, 1]} : vector<32x128xf32> to vector<32x32xf32>
    %356 = arith.truncf %355 : vector<32x32xf32> to vector<32x32xbf16>
    %357 = vector.extract_strided_slice %280 {offsets = [0, 96], sizes = [32, 32], strides = [1, 1]} : vector<32x128xf32> to vector<32x32xf32>
    %358 = arith.truncf %357 : vector<32x32xf32> to vector<32x32xbf16>
    %359 = vector.extract_strided_slice %281 {offsets = [0, 96], sizes = [32, 32], strides = [1, 1]} : vector<32x128xf32> to vector<32x32xf32>
    %360 = arith.truncf %359 : vector<32x32xf32> to vector<32x32xbf16>
    %cst_177 = arith.constant dense<0.000000e+00> : vector<32x32xf32>
    %361 = tpu.matmul %356, %358, %cst_177 {dimension_numbers = #tpu.dot_dimension_numbers<[1], [1], [0], [0], [0, 0, 1, 0], [], []>} : vector<32x32xbf16>, vector<32x32xbf16>, vector<32x32xf32> -> vector<32x32xf32>
    %362 = vector.broadcast %288 : vector<1x32xf32> to vector<32x32xf32>
    %363 = arith.addf %361, %362 : vector<32x32xf32>
    %cst_178 = arith.constant dense<0xFF800000> : vector<32xf32>
    %364 = vector.multi_reduction <maximumf>, %363, %cst_178 [1] : vector<32x32xf32> to vector<32xf32>
    %365 = vector.shape_cast %364 : vector<32xf32> to vector<32x1xf32>
    %366 = vector.broadcast %365 : vector<32x1xf32> to vector<32x32xf32>
    %367 = arith.subf %363, %366 : vector<32x32xf32>
    %368 = math.exp %367 : vector<32x32xf32>
    %cst_179 = arith.constant dense<0.000000e+00> : vector<32xf32>
    %369 = vector.multi_reduction <add>, %368, %cst_179 [1] : vector<32x32xf32> to vector<32xf32>
    %370 = vector.shape_cast %369 : vector<32xf32> to vector<32x1xf32>
    %371 = tpu.reciprocal %370 {approx = true} : vector<32x1xf32> -> vector<32x1xf32>
    %372 = vector.broadcast %371 : vector<32x1xf32> to vector<32x32xf32>
    %373 = arith.mulf %368, %372 : vector<32x32xf32>
    %374 = arith.truncf %373 : vector<32x32xf32> to vector<32x32xbf16>
    %cst_180 = arith.constant dense<0.000000e+00> : vector<32x32xf32>
    %375 = tpu.matmul %374, %360, %cst_180 {dimension_numbers = #tpu.dot_dimension_numbers<[1], [0], [0], [1], [0, 0, 1, 1], [], []>} : vector<32x32xbf16>, vector<32x32xbf16>, vector<32x32xf32> -> vector<32x32xf32>
    %376 = arith.truncf %375 : vector<32x32xf32> to vector<32x32xbf16>
    %377 = tpu.concatenate %310, %332, %354, %376 in 1 : vector<32x32xbf16>, vector<32x32xbf16>, vector<32x32xbf16>, vector<32x32xbf16> -> vector<32x128xbf16>
    %c32_181 = arith.constant 32 : index
    %c0_182 = arith.constant 0 : index
    %378 = vector.load %arg22[%c32_181, %c0_182] : memref<64x128xbf16, #tpu.memory_space<vmem>>, vector<32x128xbf16>
    tpu.vector_store %arg22[%c32_181, %c0_182], %377 {strides = array<i32>} : memref<64x128xbf16, #tpu.memory_space<vmem>>, vector<32x128xbf16>,
    %c0_183 = arith.constant 0 : index
    %c0_184 = arith.constant 0 : index
    %379 = vector.load %arg22[%c0_183, %c0_184] : memref<64x128xbf16, #tpu.memory_space<vmem>>, vector<64x128xbf16>
    %c0_185 = arith.constant 0 : index
    %c0_186 = arith.constant 0 : index
    %380 = vector.load %arg12[%c0_185, %c0_186] : memref<128x128xbf16, #tpu.memory_space<vmem>>, vector<128x128xbf16>
    %cst_187 = arith.constant dense<0.000000e+00> : vector<64x128xf32>
    %381 = tpu.matmul %379, %380, %cst_187 {dimension_numbers = #tpu.dot_dimension_numbers<[1], [0], [0], [1], [0, 0, 1, 1], [], []>} : vector<64x128xbf16>, vector<128x128xbf16>, vector<64x128xf32> -> vector<64x128xf32>
    %c0_188 = arith.constant 0 : index
    %c0_189 = arith.constant 0 : index
    %382 = vector.load %arg13[%c0_188, %c0_189] : memref<1x128xf32, #tpu.memory_space<vmem>>, vector<1x128xf32>
    %383 = vector.broadcast %382 : vector<1x128xf32> to vector<64x128xf32>
    %384 = arith.addf %381, %383 : vector<64x128xf32>
    %385 = arith.addf %384, %146 : vector<64x128xf32>
    %c0_190 = arith.constant 0 : index
    %c0_191 = arith.constant 0 : index
    %386 = vector.load %arg14[%c0_190, %c0_191] : memref<1x128xf32, #tpu.memory_space<vmem>>, vector<1x128xf32>
    %c0_192 = arith.constant 0 : index
    %c0_193 = arith.constant 0 : index
    %387 = vector.load %arg15[%c0_192, %c0_193] : memref<1x128xf32, #tpu.memory_space<vmem>>, vector<1x128xf32>
    %cst_194 = arith.constant dense<0.000000e+00> : vector<64xf32>
    %388 = vector.multi_reduction <add>, %385, %cst_194 [1] : vector<64x128xf32> to vector<64xf32>
    %389 = vector.shape_cast %388 : vector<64xf32> to vector<64x1xf32>
    %cst_195 = arith.constant 1.280000e+02 : f32
    %390 = vector.broadcast %cst_195 : f32 to vector<64x1xf32>
    %391 = arith.divf %389, %390 : vector<64x1xf32>
    %392 = vector.broadcast %391 : vector<64x1xf32> to vector<64x128xf32>
    %393 = arith.subf %385, %392 : vector<64x128xf32>
    %394 = arith.mulf %393, %393 : vector<64x128xf32>
    %cst_196 = arith.constant dense<0.000000e+00> : vector<64xf32>
    %395 = vector.multi_reduction <add>, %394, %cst_196 [1] : vector<64x128xf32> to vector<64xf32>
    %396 = vector.shape_cast %395 : vector<64xf32> to vector<64x1xf32>
    %cst_197 = arith.constant 1.280000e+02 : f32
    %397 = vector.broadcast %cst_197 : f32 to vector<64x1xf32>
    %398 = arith.divf %396, %397 : vector<64x1xf32>
    %cst_198 = arith.constant 9.99999974E-6 : f32
    %399 = vector.broadcast %cst_198 : f32 to vector<64x1xf32>
    %400 = arith.addf %398, %399 : vector<64x1xf32>
    %401 = math.rsqrt %400 : vector<64x1xf32>
    %402 = vector.broadcast %401 : vector<64x1xf32> to vector<64x128xf32>
    %403 = arith.mulf %393, %402 : vector<64x128xf32>
    %404 = vector.broadcast %386 : vector<1x128xf32> to vector<64x128xf32>
    %405 = arith.mulf %403, %404 : vector<64x128xf32>
    %406 = vector.broadcast %387 : vector<1x128xf32> to vector<64x128xf32>
    %407 = arith.addf %405, %406 : vector<64x128xf32>
    %408 = arith.truncf %407 : vector<64x128xf32> to vector<64x128xbf16>
    %c0_199 = arith.constant 0 : index
    %c0_200 = arith.constant 0 : index
    %409 = vector.load %arg16[%c0_199, %c0_200] : memref<128x128xbf16, #tpu.memory_space<vmem>>, vector<128x128xbf16>
    %cst_201 = arith.constant dense<0.000000e+00> : vector<64x128xf32>
    %410 = tpu.matmul %408, %409, %cst_201 {dimension_numbers = #tpu.dot_dimension_numbers<[1], [0], [0], [1], [0, 0, 1, 1], [], []>} : vector<64x128xbf16>, vector<128x128xbf16>, vector<64x128xf32> -> vector<64x128xf32>
    %c0_202 = arith.constant 0 : index
    %c0_203 = arith.constant 0 : index
    %411 = vector.load %arg17[%c0_202, %c0_203] : memref<1x128xf32, #tpu.memory_space<vmem>>, vector<1x128xf32>
    %412 = vector.broadcast %411 : vector<1x128xf32> to vector<64x128xf32>
    %413 = arith.addf %410, %412 : vector<64x128xf32>
    %cst_204 = arith.constant 0.000000e+00 : f32
    %414 = vector.broadcast %cst_204 : f32 to vector<64x128xf32>
    %415 = arith.maximumf %413, %414 : vector<64x128xf32>
    %416 = arith.truncf %415 : vector<64x128xf32> to vector<64x128xbf16>
    %c0_205 = arith.constant 0 : index
    %c0_206 = arith.constant 0 : index
    %417 = vector.load %arg18[%c0_205, %c0_206] : memref<128x128xbf16, #tpu.memory_space<vmem>>, vector<128x128xbf16>
    %cst_207 = arith.constant dense<0.000000e+00> : vector<64x128xf32>
    %418 = tpu.matmul %416, %417, %cst_207 {dimension_numbers = #tpu.dot_dimension_numbers<[1], [0], [0], [1], [0, 0, 1, 1], [], []>} : vector<64x128xbf16>, vector<128x128xbf16>, vector<64x128xf32> -> vector<64x128xf32>
    %c0_208 = arith.constant 0 : index
    %c0_209 = arith.constant 0 : index
    %419 = vector.load %arg19[%c0_208, %c0_209] : memref<1x128xf32, #tpu.memory_space<vmem>>, vector<1x128xf32>
    %420 = vector.broadcast %419 : vector<1x128xf32> to vector<64x128xf32>
    %421 = arith.addf %418, %420 : vector<64x128xf32>
    %422 = arith.addf %421, %385 : vector<64x128xf32>
    %c0_210 = arith.constant 0 : index
    %c0_211 = arith.constant 0 : index
    %423 = vector.load %arg20[%c0_210, %c0_211] : memref<64x128xf32, #tpu.memory_space<vmem>>, vector<64x128xf32>
    tpu.vector_store %arg20[%c0_210, %c0_211], %422 {strides = array<i32>} : memref<64x128xf32, #tpu.memory_space<vmem>>, vector<64x128xf32>,
    return
  }
  func.func @transform_0(%arg0: i32) -> (i32, i32) {
    %c0_i32 = arith.constant 0 : i32
    %c0_i32_0 = arith.constant 0 : i32
    return %arg0, %c0_i32 : i32, i32
  }
  func.func @transform_1(%arg0: i32) -> (i32, i32) {
    %c0_i32 = arith.constant 0 : i32
    %c0_i32_0 = arith.constant 0 : i32
    %c0_i32_1 = arith.constant 0 : i32
    return %c0_i32, %c0_i32_0 : i32, i32
  }
  func.func @transform_2(%arg0: i32) -> (i32, i32, i32) {
    %c0_i32 = arith.constant 0 : i32
    %c0_i32_0 = arith.constant 0 : i32
    %c0_i32_1 = arith.constant 0 : i32
    return %arg0, %c0_i32, %c0_i32_0 : i32, i32, i32
  }
  func.func @transform_3(%arg0: i32) -> (i32, i32, i32) {
    %c0_i32 = arith.constant 0 : i32
    %c0_i32_0 = arith.constant 0 : i32
    %c0_i32_1 = arith.constant 0 : i32
    %c0_i32_2 = arith.constant 0 : i32
    return %c0_i32, %c0_i32_0, %c0_i32_1 : i32, i32, i32
  }
  func.func @transform_4(%arg0: i32) -> (i32, i32, i32) {
    %c0_i32 = arith.constant 0 : i32
    %c0_i32_0 = arith.constant 0 : i32
    %c0_i32_1 = arith.constant 0 : i32
    %c0_i32_2 = arith.constant 0 : i32
    return %c0_i32, %c0_i32_0, %c0_i32_1 : i32, i32, i32
  }
  func.func @transform_5(%arg0: i32) -> (i32, i32, i32) {
    %c0_i32 = arith.constant 0 : i32
    %c0_i32_0 = arith.constant 0 : i32
    %c0_i32_1 = arith.constant 0 : i32
    %c0_i32_2 = arith.constant 0 : i32
    return %c0_i32, %c0_i32_0, %c0_i32_1 : i32, i32, i32
  }
  func.func @transform_6(%arg0: i32) -> (i32, i32, i32) {
    %c0_i32 = arith.constant 0 : i32
    %c0_i32_0 = arith.constant 0 : i32
    %c0_i32_1 = arith.constant 0 : i32
    %c0_i32_2 = arith.constant 0 : i32
    return %c0_i32, %c0_i32_0, %c0_i32_1 : i32, i32, i32
  }
  func.func @transform_7(%arg0: i32) -> (i32, i32) {
    %c0_i32 = arith.constant 0 : i32
    %c0_i32_0 = arith.constant 0 : i32
    %c0_i32_1 = arith.constant 0 : i32
    return %c0_i32, %c0_i32_0 : i32, i32
  }
  func.func @transform_8(%arg0: i32) -> (i32, i32) {
    %c0_i32 = arith.constant 0 : i32
    %c0_i32_0 = arith.constant 0 : i32
    %c0_i32_1 = arith.constant 0 : i32
    return %c0_i32, %c0_i32_0 : i32, i32
  }
  func.func @transform_9(%arg0: i32) -> (i32, i32) {
    %c0_i32 = arith.constant 0 : i32
    %c0_i32_0 = arith.constant 0 : i32
    %c0_i32_1 = arith.constant 0 : i32
    return %c0_i32, %c0_i32_0 : i32, i32
  }
  func.func @transform_10(%arg0: i32) -> (i32, i32) {
    %c0_i32 = arith.constant 0 : i32
    %c0_i32_0 = arith.constant 0 : i32
    %c0_i32_1 = arith.constant 0 : i32
    return %c0_i32, %c0_i32_0 : i32, i32
  }
  func.func @transform_11(%arg0: i32) -> (i32, i32) {
    %c0_i32 = arith.constant 0 : i32
    %c0_i32_0 = arith.constant 0 : i32
    %c0_i32_1 = arith.constant 0 : i32
    return %c0_i32, %c0_i32_0 : i32, i32
  }
  func.func @transform_12(%arg0: i32) -> (i32, i32) {
    %c0_i32 = arith.constant 0 : i32
    %c0_i32_0 = arith.constant 0 : i32
    %c0_i32_1 = arith.constant 0 : i32
    return %c0_i32, %c0_i32_0 : i32, i32
  }
  func.func @transform_13(%arg0: i32) -> (i32, i32) {
    %c0_i32 = arith.constant 0 : i32
    %c0_i32_0 = arith.constant 0 : i32
    %c0_i32_1 = arith.constant 0 : i32
    return %c0_i32, %c0_i32_0 : i32, i32
  }
  func.func @transform_14(%arg0: i32) -> (i32, i32) {
    %c0_i32 = arith.constant 0 : i32
    %c0_i32_0 = arith.constant 0 : i32
    %c0_i32_1 = arith.constant 0 : i32
    return %c0_i32, %c0_i32_0 : i32, i32
  }
  func.func @transform_15(%arg0: i32) -> (i32, i32) {
    %c0_i32 = arith.constant 0 : i32
    %c0_i32_0 = arith.constant 0 : i32
    %c0_i32_1 = arith.constant 0 : i32
    return %c0_i32, %c0_i32_0 : i32, i32
  }
  func.func @transform_16(%arg0: i32) -> (i32, i32) {
    %c0_i32 = arith.constant 0 : i32
    %c0_i32_0 = arith.constant 0 : i32
    %c0_i32_1 = arith.constant 0 : i32
    return %c0_i32, %c0_i32_0 : i32, i32
  }
  func.func @transform_17(%arg0: i32) -> (i32, i32) {
    %c0_i32 = arith.constant 0 : i32
    %c0_i32_0 = arith.constant 0 : i32
    %c0_i32_1 = arith.constant 0 : i32
    return %c0_i32, %c0_i32_0 : i32, i32
  }
  func.func @transform_18(%arg0: i32) -> (i32, i32) {
    %c0_i32 = arith.constant 0 : i32
    %c0_i32_0 = arith.constant 0 : i32
    %c0_i32_1 = arith.constant 0 : i32
    return %c0_i32, %c0_i32_0 : i32, i32
  }
  func.func @transform_19(%arg0: i32) -> (i32, i32) {
    %c0_i32 = arith.constant 0 : i32
    %c0_i32_0 = arith.constant 0 : i32
    return %arg0, %c0_i32 : i32, i32
  }
}

</mosaic_0001>

<bundles_post_ra>
// kernel: tpu_custom_call.1
= control target key start
LH: loop header
LB: loop body
LE: loop exit
PB: predicated region body
PF: predicated region fallthrough
CT: control target
= control target key end

     0   :  { %s9056_s0 = inlined_call_operand.hbm [shape: f32[128,128], index: 0, kind: input, shape index: {}]   ;;  %s9057_s1 = inlined_call_operand.hbm [shape: f32[64,128], index: 1, kind: input, shape index: {}]   ;;  %s9058_s2 = inlined_call_operand.hbm [shape: f32[4,1,32], index: 2, kind: input, shape index: {}]   ;;  %s9059_s3 = inlined_call_operand.vmem [shape: f32[2,1,128], index: 3, kind: input, shape index: {}]   ;;  %s9060_s4 = inlined_call_operand.vmem [shape: f32[2,1,128], index: 4, kind: input, shape index: {}]   ;;  %s9061_s5 = inlined_call_operand.hbm [shape: bf16[2,640,128], index: 5, kind: input, shape index: {}]   ;;  %s9062_s6 = inlined_call_operand.vmem [shape: f32[2,1,128], index: 6, kind: input, shape index: {}]   ;;  %s9063_s7 = inlined_call_operand.vmem [shape: f32[1,128], index: 7, kind: input, shape index: {}]   ;;  %s9064_s8 = inlined_call_operand.vmem [shape: f32[1,128], index: 8, kind: input, shape index: {}]   ;;  %s9065_s9 = inlined_call_operand.hbm [shape: bf16[128,384], index: 9, kind: input, shape index: {}]   ;;  %s9066_s10 = inlined_call_operand.vmem [shape: f32[1,384], index: 10, kind: input, shape index: {}]   ;;  %s9067_s11 = inlined_call_operand.hbm [shape: bf16[128,128], index: 11, kind: input, shape index: {}]   ;;  %s9068_s12 = inlined_call_operand.vmem [shape: f32[1,128], index: 12, kind: input, shape index: {}]   ;;  %s9069_s13 = inlined_call_operand.vmem [shape: f32[1,128], index: 13, kind: input, shape index: {}]   ;;  %s9070_s14 = inlined_call_operand.vmem [shape: f32[1,128], index: 14, kind: input, shape index: {}]   ;;  %s9071_s15 = inlined_call_operand.hbm [shape: bf16[128,128], index: 15, kind: input, shape index: {}]   ;;  %s9072_s16 = inlined_call_operand.vmem [shape: f32[1,128], index: 16, kind: input, shape index: {}]   ;;  %s9073_s17 = inlined_call_operand.hbm [shape: bf16[128,128], index: 17, kind: input, shape index: {}]   ;;  %s9074_s18 = inlined_call_operand.vmem [shape: f32[1,128], index: 18, kind: input, shape index: {}]   ;;  %s9075_s19 = inlined_call_operand.hbm [shape: f32[128,128], index: 19, kind: output, shape index: {}]  }
   0x1   :  { %9100 = sst [smem:[#allocation30_spill]] %s9056_s0 }
   0x2   :  { %9101 = sst [smem:[#allocation31_spill]] %s9057_s1 }
   0x3   :  { %9102 = sst [smem:[#allocation32_spill]] %s9058_s2 }
   0x4   :  { %9103 = sst [smem:[#allocation33_spill]] %s9059_s3 }
   0x5   :  { %9104 = sst [smem:[#allocation34_spill]] %s9065_s9 }
   0x6   :  { %9105 = sst [smem:[#allocation35_spill]] %s9069_s13 }
   0x7   :  { %9106 = sst [smem:[#allocation36_spill]] %s9070_s14 }
   0x8   :  { %9107 = sst [smem:[#allocation37_spill]] %s9071_s15 }
   0x9   :  { %9108 = sst [smem:[#allocation38_spill]] %s9072_s16 }
   0xa   :  { %9109 = sst [smem:[#allocation39_spill]] %s9074_s18 }
   0xb   :  { %9110 = sst [smem:[#allocation40_spill]] %s9075_s19 }
   0xc   :  { %24 = vsyncpa [#allocation5], 0 }
   0xd   :  { %26 = vsyncpa [#allocation5 + $0x1], 0 }
   0xe   :  { %27 = vsyncpa [#allocation8], 0 }
   0xf   :  { %28 = vsyncpa [#allocation12], 0 }
  0x10   :  { %29 = vsyncpa [#allocation15], 0 }
  0x11   :  { %30 = vsyncpa [#allocation6], 0 }
  0x12   :  { %32 = vsyncpa [#allocation6 + $0x1], 0  ;;  %s7484_s0 = smov 0   ;;  %s7486_s30 = smov 0  }
  0x13   :  { %s7488_s20 = smov 0   ;;  %s7490_s21 = smov 0  }
  0x14 LB: > { %9111 = sst [smem:[#allocation25_spill]] %s7346_s0  ;;  %s7360_s1 = smov [#allocation7]   ;;  %s7358_s21 = sphi %s7490_s21, %s9177_s21   ;;  %s7354_s20 = sphi %s7488_s20, %s9179_s20   ;;  %s7350_s30 = sphi %s7486_s30, %s9181_s30   ;;  %s7346_s0 = sphi %s7484_s0, %s9180_s0  }
  0x15   : > { %9112 = sst [smem:[#allocation26_spill]] %s7354_s20  ;;  %s490_s22 = sshll.u32 %s7360_s1, 4  ;;  %s491_s22 = int_to_ptr.vmem [resolvable:$true] %s490_s22 }
  0x16   : > { %s7505_s2 = sadd.s32 4294967295, %s7358_s21   ;;  %p5668_p0 = scmp.ge.s32.totalorder %s7358_s21, 1 }
  0x17   : > { %p9092_p1 = scmp.eq.s32.totalorder %s7505_s2, 0  ;;  %p478_p2 = scmp.lt.s32.totalorder %s7358_s21, 3 }
  0x18   : > { %s7361_s24 = smov [#allocation11]   ;;  %s7073_s27 = scalar_lea.vmem %s491_s22, 1024 }
  0x19   : > { %p7510_p3 = pnand %p5668_p0, %p478_p2  ;;  %s531_s25 = sshll.u32 %s7361_s24, 4  ;;  %s532_s25 = int_to_ptr.vmem [resolvable:$true] %s531_s25 }
  0x1a   : > { %p7074_p8 = scmp.ne.s32.totalorder %s491_s22, %s7073_s27  ;;  %p7081_p11 = scmp.lt.s32.totalorder %s491_s22, %s491_s22 }
  0x1b   : > { %s9113_s23 = scalar_select %p7510_p3, 1, 0 }
  0x1c   : > { %p6579_p5 = pneg %p7510_p3  ;;  %p7082_p12 = scmp.lt.s32.totalorder %s7073_s27, %s7073_s27 }
  0x1e   : > { %p7519_p6 = pnand %p6579_p5, %p9092_p1  ;;  %p7083_p13 = por %p7082_p12, %p7081_p11 }
  0x20   : > { %s9114_s3 = scalar_select %p7519_p6, 1, 0 }
  0x21   : > { %p7525_p7 = pneg %p7519_p6 }
  0x23   : > { %p7076_p9 = pnand %p7074_p8, %p7525_p7 }
  0x25   : > { %p7077_p10 = pneg %p7076_p9 }
  0x27   : > { %p7084_p0 = pnand %p7083_p13, %p7077_p10 }
  0x29   : > { %7087 = shalt.err (!%p7084_p0)
}
  0x2a   : > { %s9085_s28 = smov 128   ;;  %s9086_s29 = smov 8  }
  0x2b   : > { %s9116_s19 = sld [smem:[#allocation31_spill]]  ;;  %s7099_s18 = scalar_lea.vmem %s532_s25, 3072 }
  0x2c   : > { %p7100_p2 = scmp.ne.s32.totalorder %s532_s25, %s7099_s18  ;;  %p7107_p9 = scmp.lt.s32.totalorder %s532_s25, %s532_s25 }
  0x2d   : > { %p7108_p10 = scmp.lt.s32.totalorder %s7099_s18, %s7099_s18 }
  0x2e   : > { %p7102_p5 = pnand %p7100_p2, %p7525_p7 }
  0x2f   : > { %p7109_p11 = por %p7108_p10, %p7107_p9 }
  0x30   : > { %p7103_p8 = pneg %p7102_p5 }
  0x31   : > { %6582 = dma.hbm_to_vmem [thread:$0]  (!%p7519_p6), %s9116_s19, 1024, %s491_s22, [#allocation8], %s9085_s28, %s9085_s28, %s9086_s29  }
  0x32   : > { %p7110_p12 = pnand %p7109_p11, %p7103_p8 }
  0x34   : > { %7113 = shalt.err (!%p7110_p12)
}
  0x35   : > { %s7364_s27 = smov 192   ;;  %s7365_s16 = smov 12  }
  0x36   : > { %s9117_s9 = sld [smem:[#allocation34_spill]]  ;;  %s7366_s19 = smov [#allocation14]  }
  0x37   : > { %s569_s22 = sshll.u32 %s7366_s19, 4  ;;  %s570_s22 = int_to_ptr.vmem [resolvable:$true] %s569_s22 }
  0x38   : > { %s7125_s1 = scalar_lea.vmem %s570_s22, 1024  ;;  %p7133_p5 = scmp.lt.s32.totalorder %s570_s22, %s570_s22 }
  0x39   : > { %p7126_p13 = scmp.ne.s32.totalorder %s570_s22, %s7125_s1  ;;  %p7134_p8 = scmp.lt.s32.totalorder %s7125_s1, %s7125_s1 }
  0x3b   : > { %p7128_p0 = pnand %p7126_p13, %p7525_p7  ;;  %p7135_p9 = por %p7134_p8, %p7133_p5 }
  0x3c   : > { %6588 = dma.hbm_to_vmem [thread:$0]  (!%p7519_p6), %s9117_s9, 3072, %s532_s25, [#allocation12], %s7364_s27, %s7364_s27, %s7365_s16  }
  0x3d   : > { %p7129_p2 = pneg %p7128_p0 }
  0x3f   : > { %p7136_p10 = pnand %p7135_p9, %p7129_p2 }
  0x41   : > { %7139 = shalt.err (!%p7136_p10)
}
  0x42   : > { %s9081_s18 = smov 64   ;;  %s9083_s13 = smov 4  }
  0x43   : > { %s9118_s15 = sld [smem:[#allocation37_spill]]  ;;  %s5667_s25 = sadd.s32 4294967294, %s7358_s21  }
  0x44   : > { %s7558_s24 = sadd.s32 1, %s7358_s21   ;;  %s45_s27 = sadd.s32 1, %s7354_s20 }
  0x45   : > { %9119 = sst [smem:[#allocation27_spill]] %s7558_s24  ;;  %s42_s19 = ssub.s32 %s7358_s21, %s7558_s24 }
  0x46   : > { %p52_p11 = scmp.ne.s32.totalorder %s7354_s20, %s7350_s30  ;;  %p43_p12 = scmp.eq.s32.totalorder %s42_s19, 0 }
  0x47   : > { %p53_p13 = scmp.eq.s32.totalorder %s7358_s21, 0  ;;  %p58_p0 = scmp.ne.s32.totalorder %s7350_s30, %s7346_s0 }
  0x48   : > { %p465_p2 = scmp.eq.s32.totalorder %s7505_s2, 1  ;;  %p471_p10 = scmp.eq.s32.totalorder %s5667_s25, 1 }
  0x49   : > { %6594 = dma.hbm_to_vmem [thread:$0]  (!%p7519_p6), %s9118_s15, 1024, %s570_s22, [#allocation15], %s9081_s18, %s9081_s18, %s9083_s13  }
  0x4a   : > { %s7570_s1 = scalar_select %p43_p12, %s7354_s20, %s45_s27  }
  0x4b   : > { %p54_p5 = por %p53_p13, %p52_p11  ;;  %p7574_p8 = por %p9092_p1, %p58_p0 }
  0x4c   : > { %9120 = sst [smem:[#allocation28_spill]] %s7570_s1  ;;  %p7578_p9 = por %p465_p2, %p52_p11 }
  0x4d   : > { %s9121_s22 = scalar_select %p7574_p8, 1, 0 }
  0x4e   : > { %s9122_s14 = scalar_select %p7578_p9, 1, 0 }
  0x4f   : > { %p6615_p4 = scmp.lt.s32.totalorder %s7358_s21, 2  ;;  %s602_s16 = sand.u32 1, %s7358_s21  }
  0x50   : > { %p7584_p3 = por %p471_p10, %p58_p0  ;;  %s604_s18 = sand.u32 1, %s7354_s20  }
  0x51   : > { %s5946_s27 = sshll.u32 %s7358_s21, 10  ;;  %s5676_s13 = sshll.u32 %s604_s18, 6 }
  0x52   : > { %s9123_s19 = scalar_select %p7584_p3, 1, 0 }
  0x53   : > { %s9125_s9 = sld [smem:[#allocation30_spill]]  ;;  %p7595_p11 = pnand %p6615_p4, %p54_p5 }
  0x54   : > { %9124 = sst [smem:[#allocation29_spill]] %s9123_s19  ;;  %s606_s25 = scalar_lea.vmem [#allocation4], %s5676_s13 }
  0x55   : > { %s613_s24 = sshll.u32 %s606_s25, 4  ;;  %s7599_s19 = sshll.u32 %s604_s18, 1  ;;  %s7601_s24 = int_to_ptr.vmem [resolvable:$true] %s613_s24 }
  0x56   : > { %s7603_s20 = scalar_lea.sflag [#allocation5], %s602_s16  ;;  %p7142_p13 = pneg %p7595_p11 }
  0x59   : > { %s7593_s15 = scalar_lea.hbm %s9125_s9, %s5946_s27  ;;  %s7145_s0 = scalar_lea.hbm %s9125_s9, 2048 }
  0x5a   : > { %s7140_s28 = scalar_lea.hbm %s7593_s15, 1024  ;;  %p7146_p2 = scmp.lt.s32.totalorder %s7593_s15, %s9125_s9 }
  0x5b   : > { %p7141_p12 = scmp.ne.s32.totalorder %s7593_s15, %s7140_s28  ;;  %p7147_p5 = scmp.lt.s32.totalorder %s7145_s0, %s7140_s28 }
  0x5d   : > { %p7143_p4 = pnand %p7142_p13, %p7141_p12  ;;  %p7148_p10 = por %p7147_p5, %p7146_p2 }
  0x5f   : > { %p7144_p0 = pneg %p7143_p4 }
  0x61   : > { %p7149_p1 = pnand %p7148_p10, %p7144_p0 }
  0x63   : > { %7152 = shalt.err (!%p7149_p1)
}
  0x64   : > { %s7153_s18 = scalar_lea.vmem %s7601_s24, 1024  ;;  %s7369_s16 = smov [#allocation4]  }
  0x65   : > { %p7154_p3 = scmp.ne.s32.totalorder %s7601_s24, %s7153_s18  ;;  %s7158_s29 = sshll.u32 %s7369_s16, 4  ;;  %s7159_s29 = int_to_ptr.vmem [resolvable:$false] %s7158_s29 }
  0x66   : > { %s7160_s27 = scalar_lea.vmem %s7159_s29, 2048  ;;  %p7161_p9 = scmp.lt.s32.totalorder %s7601_s24, %s7159_s29 }
  0x67   : > { %p7156_p12 = pnand %p7154_p3, %p7142_p13  ;;  %p7162_p8 = scmp.lt.s32.totalorder %s7160_s27, %s7153_s18 }
  0x69   : > { %p7157_p4 = pneg %p7156_p12  ;;  %p7163_p6 = por %p7162_p8, %p7161_p9 }
  0x6b   : > { %p7164_p2 = pnand %p7163_p6, %p7157_p4 }
  0x6d   : > { %7167 = shalt.err (!%p7164_p2)
}
  0x6e   : > { %s9127_s0 = smov 8   ;;  %s9128_s28 = smov 128  }
  0x6f   : > { %6601 = dma.hbm_to_vmem [thread:$0]  (!%p7595_p11), %s7593_s15, 1024, %s7601_s24, %s7603_s20, %s9128_s28, %s9128_s28, %s9127_s0  }
  0x70   : > { %s627_s13 = scalar_lea.vmem [#allocation9], %s7599_s19  ;;  %s7370_s16 = smov [#allocation10]  }
  0x71   : > { %s7634_s25 = sshll.u32 %s627_s13, 4  ;;  %s509_s29 = sshll.u32 %s7370_s16, 4  ;;  %s510_s29 = int_to_ptr.vmem [resolvable:$true] %s509_s29  ;;  %s7673_s25 = int_to_ptr.vmem [resolvable:$true] %s7634_s25 }
  0x72   : > { %s7179_s18 = scalar_lea.vmem %s510_s29, 10240  ;;  %p7187_p8 = scmp.lt.s32.totalorder %s510_s29, %s510_s29 }
  0x73   : > { %p7180_p1 = scmp.ne.s32.totalorder %s510_s29, %s7179_s18  ;;  %p7188_p9 = scmp.lt.s32.totalorder %s7179_s18, %s7179_s18 }
  0x75   : > { %p7182_p3 = pnand %p7180_p1, %p7525_p7  ;;  %p7189_p0 = por %p7188_p9, %p7187_p8 }
  0x77   : > { %p7183_p6 = pneg %p7182_p3 }
  0x79   : > { %p7190_p5 = pnand %p7189_p0, %p7183_p6 }
  0x7b   : > { %7193 = shalt.err (!%p7190_p5)
}
  0x7c   : > { %p9129_p10 = scmp.ne.s32.totalorder %s9114_s3, 0  ;;  %s9130_s27 = smov 4  }
  0x7d   : > { %s9131_s15 = smov 64   ;;  %s7371_s0 = smov [#allocation13]  }
  0x7e   : > { %6585 = dma.hbm_to_vmem [thread:$0]  (!%p9129_p10), %s9061_s5, 10240, %s510_s29, [#allocation8], %s9131_s15, %s9131_s15, %s9130_s27  }
  0x7f   : > { %s547_s28 = sshll.u32 %s7371_s0, 4  ;;  %s7372_s13 = smov [#allocation16]   ;;  %s548_s28 = int_to_ptr.vmem [resolvable:$true] %s547_s28 }
  0x80   : > { %s585_s16 = sshll.u32 %s7372_s13, 4  ;;  %s7205_s9 = scalar_lea.vmem %s548_s28, 1024  ;;  %s586_s16 = int_to_ptr.vmem [resolvable:$true] %s585_s16 }
  0x81   : > { %p7206_p12 = scmp.ne.s32.totalorder %s548_s28, %s7205_s9  ;;  %p7213_p1 = scmp.lt.s32.totalorder %s548_s28, %s548_s28 }
  0x82   : > { %p7214_p3 = scmp.lt.s32.totalorder %s7205_s9, %s7205_s9 }
  0x83   : > { %p7208_p4 = pnand %p7206_p12, %p7525_p7 }
  0x84   : > { %p7215_p6 = por %p7214_p3, %p7213_p1 }
  0x85   : > { %p7209_p2 = pneg %p7208_p4 }
  0x87   : > { %p7216_p8 = pnand %p7215_p6, %p7209_p2 }
  0x89   : > { %7219 = shalt.err (!%p7216_p8)
}
  0x8a   : > { %6591 = dma.hbm_to_vmem [thread:$0]  (!%p9129_p10), %s9067_s11, 1024, %s548_s28, [#allocation12], %s9131_s15, %s9131_s15, %s9130_s27  }
  0x8b   : > { %s5947_s24 = sshll.u32 %s7358_s21, 5  ;;  %s7231_s19 = scalar_lea.vmem %s586_s16, 1024 }
  0x8c   : > { %p7232_p9 = scmp.ne.s32.totalorder %s586_s16, %s7231_s19  ;;  %p7239_p12 = scmp.lt.s32.totalorder %s586_s16, %s586_s16 }
  0x8d   : > { %p7240_p4 = scmp.lt.s32.totalorder %s7231_s19, %s7231_s19 }
  0x8e   : > { %p7234_p0 = pnand %p7232_p9, %p7525_p7 }
  0x8f   : > { %p7241_p2 = por %p7240_p4, %p7239_p12 }
  0x90   : > { %p7235_p5 = pneg %p7234_p0 }
  0x92   : > { %p7242_p1 = pnand %p7241_p2, %p7235_p5 }
  0x94   : > { %7245 = shalt.err (!%p7242_p1)
}
  0x95   : > { %6597 = dma.hbm_to_vmem [thread:$0]  (!%p9129_p10), %s9073_s17, 1024, %s586_s16, [#allocation15], %s9131_s15, %s9131_s15, %s9130_s27  }
  0x96   : > { %s9132_s13 = sld [smem:[#allocation32_spill]] }
  0x9c   : > { %s7670_s29 = scalar_lea.hbm %s9132_s13, %s5947_s24  ;;  %s7251_s27 = scalar_lea.hbm %s9132_s13, 64 }
  0x9d   : > { %s7246_s3 = scalar_lea.hbm %s7670_s29, 32  ;;  %p7252_p10 = scmp.lt.s32.totalorder %s7670_s29, %s9132_s13 }
  0x9e   : > { %p7247_p7 = scmp.ne.s32.totalorder %s7670_s29, %s7246_s3  ;;  %p7253_p8 = scmp.lt.s32.totalorder %s7251_s27, %s7246_s3 }
  0xa0   : > { %p7249_p3 = pnand %p7247_p7, %p7142_p13  ;;  %p7254_p9 = por %p7253_p8, %p7252_p10 }
  0xa2   : > { %p7250_p6 = pneg %p7249_p3 }
  0xa4   : > { %p7255_p0 = pnand %p7254_p9, %p7250_p6 }
  0xa6   : > { %7258 = shalt.err (!%p7255_p0)
}
  0xa7   : > { %s7259_s24 = scalar_lea.vmem %s7673_s25, 32  ;;  %s7373_s9 = smov [#allocation9]  }
  0xa8   : > { %p7260_p5 = scmp.ne.s32.totalorder %s7673_s25, %s7259_s24  ;;  %s7264_s0 = sshll.u32 %s7373_s9, 4  ;;  %s7265_s0 = int_to_ptr.vmem [resolvable:$false] %s7264_s0 }
  0xa9   : > { %s7266_s28 = scalar_lea.vmem %s7265_s0, 64  ;;  %p7267_p2 = scmp.lt.s32.totalorder %s7673_s25, %s7265_s0 }
  0xaa   : > { %p7262_p12 = pnand %p7260_p5, %p7142_p13  ;;  %p7268_p1 = scmp.lt.s32.totalorder %s7266_s28, %s7259_s24 }
  0xac   : > { %p7263_p4 = pneg %p7262_p12  ;;  %p7269_p7 = por %p7268_p1, %p7267_p2 }
  0xae   : > { %p7270_p3 = pnand %p7269_p7, %p7263_p4 }
  0xb0   : > { %7273 = shalt.err (!%p7270_p3)
}
  0xb1   : > { %s7374_s26 = smov 16   ;;  %s7375_s3 = smov 1  }
  0xb2   : > { %6604 = dma.hbm_to_vmem [thread:$0]  (!%p7595_p11), %s7670_s29, 32, %s7673_s25, %s7603_s20, %s7374_s26, %s7374_s26, %s7375_s3  }
  0xb3   : > { %p9133_p13 = scmp.ne.s32.totalorder %s9113_s23, 0 }
  0xb4   : > { %s648_s18 = sand.u32 (!%p9133_p13), 1, %s7505_s2   ;;  %s7702_s19 = sand.u32 (!%p9133_p13), 1, %s7350_s30  }
  0xb5   : > { %646 = sbr.rel (%p9133_p13) target bundleno = 7006 (0x1b5e), region = 96  ;;  %s5683_s27 = sshll.u32 (!%p9133_p13), %s7702_s19, 6 }
  0xb6   : > { %s649_s15 = scalar_lea.sflag (!%p9133_p13), [#allocation5], %s648_s18  ;;  %s7707_s16 = scalar_lea.vmem (!%p9133_p13), [#allocation4], %s5683_s27 }
  0xb7   : > { %p9134_p6 = scmp.ne.s32.totalorder (!%p9133_p13), %s9121_s22, 0 }
  0xba   : > { %7317 = dma.done.wait (%p9134_p6), %s649_s15, 1024  }
  0xbb   : > { %7319 = vsyncadd (%p9134_p6), %s649_s15, 4294966272  ;;  %p9135_p11 = scmp.eq.s32.totalorder %s7505_s2, 0 }
  0xbd   : > { %7321 = dma.done.wait (%p9135_p11), [#allocation8], 1024   ;;  %p9136_p10 = pmov %p9135_p11 }
  0xbe   : > { %s5685_s20 = sshll.u32 %s7702_s19, 1 }
  0xbf   : > { %7323 = vsyncadd (%p9136_p10), [#allocation8], 4294966272  ;;  %s7718_s23 = scalar_lea.vmem [#allocation9], %s5685_s20 }
  0xc0   : > { %7325 = dma.done.wait (%p9134_p6), %s649_s15, 32  }
  0xc1   : > { %7327 = vsyncadd (%p9134_p6), %s649_s15, 4294967264  ;;  %p9137_p8 = pmov %p9136_p10 }
  0xc3   : > { %7329 = dma.done.wait (%p9137_p8), [#allocation8], 10240   ;;  %p9138_p9 = pmov %p9137_p8 }
  0xc4   : > { %p9139_p0 = pmov %p9137_p8 }
  0xc5   : > { %7331 = vsyncadd (%p9138_p9), [#allocation8], 4294957056 }
  0xc6   : > { %7333 = dma.done.wait (%p9139_p0), [#allocation12], 4096   ;;  %p9140_p5 = pmov %p9139_p0 }
  0xc7   : > { %p9141_p12 = pmov %p9139_p0 }
  0xc8   : > { %7335 = vsyncadd (%p9140_p5), [#allocation12], 4294963200 }
  0xc9   : > { %7337 = dma.done.wait (%p9141_p12), [#allocation15], 2048   ;;  %p9142_p4 = pmov %p9139_p0 }
  0xca   : > { %v749_v0 = vld [vmem:[%s7707_s16] sm:$0xff]  ;;  %v750_v5 = vld [vmem:[%s7707_s16 + $0x8] sm:$0xff]  ;;  %v751_v8 = vld [vmem:[%s7707_s16 + $0x10] sm:$0xff]  ;;  %s9143_s25 = sld [smem:[#allocation33_spill]]  ;;  %vm969_vm0 = vcmask 1043456   ;;  %vm906_vm4 = vcmask 1040384  }
  0xcb   : > { %7339 = vsyncadd (%p9142_p4), [#allocation15], 4294965248  ;;  %v757_v1 = vld [vmem:[#allocation7] sm:$0xff]  ;;  %v758_v6 = vld [vmem:[#allocation7 + $0x8] sm:$0xff]  ;;  %vm970_vm1 = vsmask.f32 7938 }
  0xcc   : > { %v753_v2 = vld [vmem:[%s7707_s16 + $0x20] sm:$0xff]  ;;  %v7738_v3 = vadd.f32 %v757_v1, %v749_v0  ;;  %v759_v9 = vld [vmem:[#allocation7 + $0x10] sm:$0xff]  ;;  %v7745_v10 = vadd.f32 %v758_v6, %v750_v5  ;;  %v752_v12 = vld [vmem:[%s7707_s16 + $0x18] sm:$0xff]  ;;  %vm990_vm2 = vsmask.f32 3328  ;;  %vm907_vm5 = vcmask 1044484  }
  0xcd   : > { %v761_v4 = vld [vmem:[#allocation7 + $0x20] sm:$0xff]  ;;  %v7748_v11 = vadd.f32 %v759_v9, %v751_v8  ;;  %v760_v13 = vld [vmem:[#allocation7 + $0x18] sm:$0xff]  ;;  %v754_v14 = vld [vmem:[%s7707_s16 + $0x28] sm:$0xff]  ;;  %vm991_vm3 = vsmask.f32 7440  ;;  %vm1029_vm7 = vcmask 1042432  }
  0xce   : > { %v7741_v7 = vadd.f32 %v761_v4, %v753_v2  ;;  %775 = vadd.xlane.f32.xlu0 %v7738_v3  ;;  %v762_v15 = vld [vmem:[#allocation7 + $0x28] sm:$0xff]  ;;  %v755_v16 = vld [vmem:[%s7707_s16 + $0x30] sm:$0xff]  ;;  %v7754_v18 = vadd.f32 %v760_v13, %v752_v12  ;;  %v756_v19 = vld [vmem:[%s7707_s16 + $0x38] sm:$0xff]  ;;  %vm1030_vm8 = vcmask 1046532   ;;  %vm928_vm9 = vsmask.f32 256 }
  0xcf   : > { %v763_v17 = vld [vmem:[#allocation7 + $0x30] sm:$0xff]  ;;  %v764_v20 = vld [vmem:[#allocation7 + $0x38] sm:$0xff]  ;;  %v7758_v21 = vadd.f32 %v762_v15, %v754_v14  ;;  %v6688_v5 = vld [vmem:[#allocation10 + $0xe0] sm:$0xff]   ;;  %vm929_vm10 = vsmask.f32 4368  ;;  %vm1023_vm15 = vcmask 1043459  }
  0xd0   : > { %783 = vadd.xlane.f32.xlu1 %v7741_v7  ;;  %v7761_v22 = vadd.f32 %v763_v17, %v755_v16  ;;  %v7764_v23 = vadd.f32 %v764_v20, %v756_v19  ;;  %v6676_v56 = vld [vmem:[#allocation10 + $0xf8] sm:$0xff]   ;;  %v6680_v60 = vld [vmem:[#allocation10 + $0xf0] sm:$0xff]   ;;  %v6684_v0 = vld [vmem:[#allocation10 + $0xe8] sm:$0xff]   ;;  %v9098_v20 = vmov 0   ;;  %s7379_s0 = smov 64   ;;  %s7380_s28 = smov 32  }
  0xd1   : > { %v6677_v57 = vld [vmem:[#allocation10 + $0xb8] sm:$0xff]   ;;  %6005 = vmatprep.subr.bf16.mxu1 %v6676_v56  ;;  %v6681_v61 = vld [vmem:[#allocation10 + $0xb0] sm:$0xff]   ;;  %v6685_v1 = vld [vmem:[#allocation10 + $0xa8] sm:$0xff]   ;;  %927 = vst [vmem:[#allocation2] sm:$0x1] %v9098_v20  ;;  %s9167_s16 = sld [smem:[#allocation35_spill]] }
  0xd2   : > { %777 = vadd.xlane.f32.xlu0 %v7745_v10  ;;  %6006 = vmatpush3.bf16.msra.mxu1 %v6677_v57  ;;  %v6678_v58 = vld [vmem:[#allocation10 + $0x78] sm:$0xff]   ;;  %v6682_v62 = vld [vmem:[#allocation10 + $0x70] sm:$0xff]   ;;  %v6686_v2 = vld [vmem:[#allocation10 + $0x68] sm:$0xff]   ;;  %1051 = vst [vmem:[#allocation2 + $0x4c] sm:$0x8] %v9098_v20  ;;  %s9168_s22 = sld [smem:[#allocation36_spill]] }
  0xd3   : > { %v6679_v59 = vld [vmem:[#allocation10 + $0x38] sm:$0xff]   ;;  %5965 = vmatprep.subr.bf16.mxu0 %v6678_v58  ;;  %6007 = vmatprep.subr.bf16.mxu1 %v6680_v60  ;;  %v6683_v63 = vld [vmem:[#allocation10 + $0x30] sm:$0xff]   ;;  %v6687_v4 = vld [vmem:[#allocation10 + $0x28] sm:$0xff]   ;;  %1080 = vst [vmem:[#allocation2 + $0x50] sm:$0x1] %v9098_v20  ;;  %s9169_s9 = sld [smem:[#allocation38_spill]] }
  0xd4   : > { %779 = vadd.xlane.f32.xlu1 %v7748_v11  ;;  %5966 = vmatpush3.bf16.msra.mxu0 %v6679_v59  ;;  %v6689_v6 = vld [vmem:[#allocation10 + $0xa0] sm:$0xff]   ;;  %v6692_v12 = vld [vmem:[#allocation10 + $0xd8] sm:$0xff]   ;;  %v6696_v16 = vld [vmem:[#allocation10 + $0xd0] sm:$0xff]   ;;  %1187 = vst [vmem:[#allocation2 + $0x9c] sm:$0x8] %v9098_v20  ;;  %s744_s26 = scalar_lea.vmem [#allocation17], %s5683_s27 }
  0xd5   : > { %5967 = vmatprep.subr.bf16.mxu0 %v6682_v62  ;;  %v6690_v8 = vld [vmem:[#allocation10 + $0x60] sm:$0xff]   ;;  %v6693_v13 = vld [vmem:[#allocation10 + $0x98] sm:$0xff]   ;;  %v6697_v17 = vld [vmem:[#allocation10 + $0x90] sm:$0xff]   ;;  %2142 = vst [vmem:[#allocation2 + $0x50] sm:$0x1] %v9098_v20  ;;  %s5517_s27 = sshll.u32 %s744_s26, 4  ;;  %s9006_s27 = int_to_ptr.vmem [resolvable:$true] %s5517_s27 }
  0xd6   : > { %781 = vadd.xlane.f32.xlu0 %v7754_v18  ;;  %6008 = vmatpush3.bf16.msra.mxu1 %v6681_v61  ;;  %v6691_v9 = vld [vmem:[#allocation10 + $0x20] sm:$0xff]   ;;  %v6694_v14 = vld [vmem:[#allocation10 + $0x58] sm:$0xff]   ;;  %v6698_v19 = vld [vmem:[#allocation10 + $0x50] sm:$0xff]   ;;  %s5964_s3 = sshll.u32 %s7505_s2, 10  ;;  %s5504_s2 = scalar_lea.sflag [#allocation6], %s7702_s19 }
  0xd7   : > { %6009 = vmatprep.subr.bf16.mxu1 %v6684_v0  ;;  %v6695_v15 = vld [vmem:[#allocation10 + $0x18] sm:$0xff]   ;;  %vm7849_vm6 = vmand %vm969_vm0, %vm970_vm1  ;;  %vm1024_vm1 = vsmask.f32 7950  ;;  %s7274_s1 = scalar_lea.vmem %s9006_s27, 1024  ;;  %p9172_p1 = scmp.ne.s32.totalorder %s9122_s14, 0 }
  0xd8   : > { %785 = vadd.xlane.f32.xlu1 %v7758_v21  ;;  %5968 = vmatpush3.bf16.msra.mxu0 %v6683_v63  ;;  %vm7889_vm11 = vmor %vm990_vm2, %vm991_vm3  ;;  %p7275_p2 = scmp.ne.s32.totalorder %s9006_s27, %s7274_s1 }
  0xd9   : > { %5969 = vmatprep.subr.bf16.mxu0 %v6686_v2  ;;  %vm7900_vm12 = vmor %vm906_vm4, %vm907_vm5  ;;  %vm3374_vm5 = vcmask 261120  }
  0xda   : > { %787 = vadd.xlane.f32.xlu0 %v7761_v22  ;;  %6010 = vmatpush3.bf16.msra.mxu1 %v6685_v1  ;;  %v7818_v1 = vld [vmem:[%s9143_s25] ss:$0 sm:$0xff]  ;;  %vm7934_vm13 = vmor %vm1029_vm7, %vm1030_vm8  ;;  %vm4103_vm7 = vcmask 523264   ;;  %vm4108_vm8 = vcmask 785408   ;;  %p7276_p7 = pnand %p7275_p2, %p9172_p1 }
  0xdb   : > { %6011 = vmatprep.subr.bf16.mxu1 %v6688_v5  ;;  %vm7942_vm14 = vmor %vm928_vm9, %vm929_vm10 }
  0xdc   : > { %789 = vadd.xlane.f32.xlu1 %v7764_v23  ;;  %5970 = vmatpush3.bf16.msra.mxu0 %v6687_v4  ;;  %vm7955_vm3 = vmand %vm969_vm0, %vm990_vm2  ;;  %p7277_p3 = pneg %p7276_p7 }
  0xdd   : > { %5971 = vmatprep.subr.bf16.mxu0 %v6690_v8  ;;  %vm8005_vm0 = vmand %vm906_vm4, %vm928_vm9 }
  0xde   : > { %6012 = vmatpush3.bf16.msra.mxu1 %v6689_v6  ;;  %v7824_v6 = vld [vmem:[%s9060_s4] ss:$0 sm:$0xff]  ;;  %vm8015_vm2 = vmand %vm1023_vm15, %vm1024_vm1 }
  0xdf   : > { %6013 = vmatprep.subr.bf16.mxu1 %v6692_v12 }
  0xe0   : > { %5972 = vmatpush3.bf16.msra.mxu0 %v6691_v9 }
  0xe1   : > { %5973 = vmatprep.subr.bf16.mxu0 %v6694_v14 }
  0xe2   : > { %6014 = vmatpush3.bf16.msra.mxu1 %v6693_v13 }
  0xe3   : > { %6015 = vmatprep.subr.bf16.mxu1 %v6696_v16 }
  0xe4   : > { %5974 = vmatpush3.bf16.msra.mxu0 %v6695_v15 }
  0xe5   : > { %5975 = vmatprep.subr.bf16.mxu0 %v6698_v19 }
  0xe6   : > { %6016 = vmatpush3.bf16.msra.mxu1 %v6697_v17 }
 0x157   : > { %v776_v24 = vpop.xlane.xlu0 %775 }
 0x158   : > { %v792_v25 = vmul.f32 0.0078125, %v776_v24  ;;  %v6699_v24 = vld [vmem:[#allocation10 + $0x10] sm:$0xff]  }
 0x159   : > { %v784_v26 = vpop.xlane.xlu1 %783  ;;  %5976 = vmatpush3.bf16.msra.mxu0 %v6699_v24 }
 0x15a   : > { %v796_v27 = vmul.f32 0.0078125, %v784_v26  ;;  %v7769_v28 = vsub.f32 %v7738_v3, %v792_v25  ;;  %v6700_v25 = vld [vmem:[#allocation10 + $0xc8] sm:$0xff]  }
 0x15b   : > { %v778_v29 = vpop.xlane.xlu0 %777  ;;  %v6701_v26 = vld [vmem:[#allocation10 + $0x88] sm:$0xff]   ;;  %6017 = vmatprep.subr.bf16.mxu1 %v6700_v25 }
 0x15c   : > { %v7772_v30 = vsub.f32 %v7741_v7, %v796_v27  ;;  %v793_v31 = vmul.f32 0.0078125, %v778_v29  ;;  %v808_v32 = vmul.f32 %v7769_v28, %v7769_v28  ;;  %v6702_v27 = vld [vmem:[#allocation10 + $0x48] sm:$0xff]   ;;  %6018 = vmatpush3.bf16.msra.mxu1 %v6701_v26 }
 0x15d   : > { %v780_v33 = vpop.xlane.xlu1 %779  ;;  %v6703_v29 = vld [vmem:[#allocation10 + $0x8] sm:$0xff]   ;;  %5977 = vmatprep.subr.bf16.mxu0 %v6702_v27 }
 0x15e   : > { %v794_v34 = vmul.f32 0.0078125, %v780_v33  ;;  %816 = vadd.xlane.f32.xlu0 %v808_v32  ;;  %v812_v35 = vmul.f32 %v7772_v30, %v7772_v30  ;;  %v7779_v36 = vsub.f32 %v7745_v10, %v793_v31  ;;  %v6704_v31 = vld [vmem:[#allocation10 + $0xc0] sm:$0xff]   ;;  %5978 = vmatpush3.bf16.msra.mxu0 %v6703_v29 }
 0x15f   : > { %v782_v37 = vpop.xlane.xlu0 %781  ;;  %v6705_v32 = vld [vmem:[#allocation10 + $0x80] sm:$0xff]   ;;  %6019 = vmatprep.subr.bf16.mxu1 %v6704_v31 }
 0x160   : > { %v7782_v38 = vsub.f32 %v7748_v11, %v794_v34  ;;  %v795_v39 = vmul.f32 0.0078125, %v782_v37  ;;  %v809_v40 = vmul.f32 %v7779_v36, %v7779_v36  ;;  %v6706_v33 = vld [vmem:[#allocation10 + $0x40] sm:$0xff]   ;;  %6020 = vmatpush3.bf16.msra.mxu1 %v6705_v32 }
 0x161   : > { %v786_v41 = vpop.xlane.xlu1 %785  ;;  %v6709_v34 = vld [vmem:[#allocation10] sm:$0xff]   ;;  %5979 = vmatprep.subr.bf16.mxu0 %v6706_v33 }
 0x162   : > { %v797_v42 = vmul.f32 0.0078125, %v786_v41  ;;  %824 = vadd.xlane.f32.xlu0 %v812_v35  ;;  %818 = vadd.xlane.f32.xlu1 %v809_v40  ;;  %v810_v43 = vmul.f32 %v7782_v38, %v7782_v38  ;;  %v7789_v44 = vsub.f32 %v7754_v18, %v795_v39  ;;  %v7812_v35 = vld [vmem:[#allocation10 + $0x138] sm:$0xff]  }
 0x163   : > { %v788_v45 = vpop.xlane.xlu0 %787  ;;  %5980 = vmatpush3.bf16.msra.mxu0 %v6709_v34 }
 0x164   : > { %v7792_v46 = vsub.f32 %v7758_v21, %v797_v42  ;;  %v798_v47 = vmul.f32 0.0078125, %v788_v45  ;;  %v811_v48 = vmul.f32 %v7789_v44, %v7789_v44  ;;  %6261 = vmatprep.subr.bf16.mxu0 %v7812_v35 }
 0x165   : > { %v790_v49 = vpop.xlane.xlu1 %789 }
 0x166   : > { %v799_v50 = vmul.f32 0.0078125, %v790_v49  ;;  %820 = vadd.xlane.f32.xlu1 %v810_v43  ;;  %822 = vadd.xlane.f32.xlu0 %v811_v48  ;;  %v813_v51 = vmul.f32 %v7792_v46, %v7792_v46  ;;  %v7799_v52 = vsub.f32 %v7761_v22, %v798_v47 }
 0x168   : > { %v7802_v53 = vsub.f32 %v7764_v23, %v799_v50  ;;  %v814_v54 = vmul.f32 %v7799_v52, %v7799_v52 }
 0x16a   : > { %826 = vadd.xlane.f32.xlu1 %v813_v51  ;;  %828 = vadd.xlane.f32.xlu0 %v814_v54  ;;  %v815_v55 = vmul.f32 %v7802_v53, %v7802_v53 }
 0x16e   : > { %830 = vadd.xlane.f32.xlu1 %v815_v55 }
 0x1e7   : > { %v817_v37 = vpop.xlane.xlu0 %816 }
 0x1e8   : > { %v832_v39 = vmul.f32 0.0078125, %v817_v37 }
 0x1ea   : > { %v840_v40 = vadd.f32 1e-05, %v832_v39 }
 0x1eb   : > { %v819_v41 = vpop.xlane.xlu1 %818  ;;  %v825_v42 = vpop.xlane.xlu0 %824 }
 0x1ec   : > { %6870 = vrsqrt.f32 %v840_v40  ;;  %v833_v43 = vmul.f32 0.0078125, %v819_v41  ;;  %v836_v45 = vmul.f32 0.0078125, %v825_v42  ;;  %v972_v42 = vld [vmem:[#allocation2 + $0x4] sm:$0xf] }
 0x1ee   : > { %v841_v47 = vadd.f32 1e-05, %v833_v43  ;;  %v844_v48 = vadd.f32 1e-05, %v836_v45 }
 0x1ef   : > { %v821_v49 = vpop.xlane.xlu1 %820  ;;  %v823_v50 = vpop.xlane.xlu0 %822 }
 0x1f0   : > { %6872 = vrsqrt.f32 %v841_v47  ;;  %v834_v51 = vmul.f32 0.0078125, %v821_v49  ;;  %v835_v54 = vmul.f32 0.0078125, %v823_v50 }
 0x1f1   : > { %6874 = vrsqrt.f32 %v844_v48 }
 0x1f2   : > { %v842_v55 = vadd.f32 1e-05, %v834_v51  ;;  %v843_v56 = vadd.f32 1e-05, %v835_v54 }
 0x1f3   : > { %v827_v57 = vpop.xlane.xlu1 %826  ;;  %v829_v58 = vpop.xlane.xlu0 %828 }
 0x1f4   : > { %6876 = vrsqrt.f32 %v842_v55  ;;  %v837_v59 = vmul.f32 0.0078125, %v827_v57  ;;  %v838_v60 = vmul.f32 0.0078125, %v829_v58 }
 0x1f5   : > { %6878 = vrsqrt.f32 %v843_v56 }
 0x1f6   : > { %v845_v61 = vadd.f32 1e-05, %v837_v59  ;;  %v846_v2 = vadd.f32 1e-05, %v838_v60 }
 0x1f7   : > { %v831_v62 = vpop.xlane.xlu1 %830 }
 0x1f8   : > { %6880 = vrsqrt.f32 %v845_v61  ;;  %v839_v63 = vmul.f32 0.0078125, %v831_v62 }
 0x1f9   : > { %v6871_v0 = vpop.eup %6870  ;;  %6882 = vrsqrt.f32 %v846_v2 }
 0x1fa   : > { %v856_v4 = vmul.f32 %v6871_v0, %v7769_v28  ;;  %v847_v5 = vadd.f32 1e-05, %v839_v63 }
 0x1fc   : > { %v870_v8 = vmul.f32 %v7818_v1, %v856_v4  ;;  %6884 = vrsqrt.f32 %v847_v5 }
 0x1fd   : > { %v6873_v9 = vpop.eup %6872 }
 0x1fe   : > { %v6875_v12 = vpop.eup %6874  ;;  %v884_v13 = vadd.f32 %v7824_v6, %v870_v8  ;;  %v857_v14 = vmul.f32 %v6873_v9, %v7779_v36 }
 0x1ff   : > { %v860_v15 = vmul.f32 %v6875_v12, %v7772_v30 }
 0x200   : > { %v7830_v28 = vpack.c.bf16 %v884_v13, %v884_v13  ;;  %v871_v16 = vmul.f32 %v7818_v1, %v857_v14 }
 0x201   : > { %v6877_v17 = vpop.eup %6876  ;;  %v874_v19 = vmul.f32 %v7818_v1, %v860_v15  ;;  %v1119_v15 = vld [vmem:[#allocation2 + $0x54] sm:$0xf] }
 0x202   : > { %v6879_v24 = vpop.eup %6878  ;;  %v909_v25 = vrot.slane %v7830_v28, 7  ;;  %v932_v26 = vshrl.u32 %v7830_v28, 16  ;;  %v935_v36 = vshll.u32 %v7830_v28, 16  ;;  %986 = vst [vmem:[#allocation2 + $0x8] sm:$0xf] %v7830_v28  ;;  %v5698_v30 = vrot.slane %v7830_v28, 9 }
 0x203   : > { %v885_v27 = vadd.f32 %v7824_v6, %v871_v16  ;;  %v888_v29 = vadd.f32 %v7824_v6, %v874_v19  ;;  %v858_v31 = vmul.f32 %v6877_v17, %v7782_v38  ;;  %v859_v32 = vmul.f32 %v6879_v24, %v7789_v44 }
 0x204   : > { %v7843_v33 = vrot.slane %v909_v25, 4  ;;  %923 = vst [vmem:[#allocation2] sm:$0xe] %v909_v25  ;;  %v7845_v34 = vrot.slane %v932_v26, 7  ;;  %v993_v37 = vrot.slane %v932_v26, 4  ;;  %v994_v39 = vrot.slane %v935_v36, 5 }
 0x205   : > { %v6881_v40 = vpop.eup %6880  ;;  %v7853_v43 = vpack.c.bf16 %v885_v27, %v885_v27  ;;  %v7855_v38 = vpack.c.bf16 %v888_v29, %v888_v29  ;;  %v872_v44 = vmul.f32 %v7818_v1, %v858_v31  ;;  %v873_v45 = vmul.f32 %v7818_v1, %v859_v32 }
 0x206   : > { %v937_v47 = vor.u32 %v935_v36, %v7845_v34  ;;  %v938_v48 = vrot.slane %v7845_v34, 4  ;;  %v995_v49 = vor.u32 %v994_v39, %v993_v37  ;;  %v861_v50 = vmul.f32 %v6881_v40, %v7792_v46  ;;  %v6883_v0 = vpop.eup %6882 }
 0x207   : > { %v911_v51 = vrot.slane %v7853_v43, 7  ;;  %v940_v54 = vshrl.u32 %v7853_v43, 16  ;;  %v943_v55 = vshll.u32 %v7853_v43, 16  ;;  %987 = vst [vmem:[#allocation2 + $0x1c] sm:$0xf] %v7853_v43  ;;  %v1034_v56 = vrot.slane %v7853_v43, 5 }
 0x208   : > { %1132 = vst [vmem:[#allocation2 + $0x58] sm:$0xf] %v7855_v38  ;;  %v973_v57 = vsel %vm7849_vm6, %v937_v47, %v972_v42  ;;  %v996_v58 = vrot.slane %v995_v49, 4  ;;  %v1062_v59 = vrot.slane %v7855_v38, 7  ;;  %v1082_v46 = vshrl.u32 %v7855_v38, 16 }
 0x209   : > { %974 = vst [vmem:[#allocation2 + $0x4] sm:$0xf] %v973_v57  ;;  %v913_v60 = vrot.slane %v911_v51, 4  ;;  %v7872_v61 = vrot.slane %v940_v54, 7  ;;  %v997_v62 = vrot.slane %v943_v55, 5  ;;  %v999_v63 = vrot.slane %v940_v54, 4  ;;  %v6885_v9 = vpop.eup %6884 }
 0x20a   : > { %v7876_v2 = vrot.slane %v1034_v56, 4  ;;  %v7878_v4 = vrot.slane %v1062_v59, 4  ;;  %1076 = vst [vmem:[#allocation2 + $0x50] sm:$0xe] %v1062_v59  ;;  %v7880_v5 = vrot.slane %v1082_v46, 7  ;;  %v1085_v8 = vshll.u32 %v7855_v38, 16 }
 0x20b   : > { %v7884_v12 = vor.u32 %v943_v55, %v7872_v61  ;;  %v947_v13 = vrot.slane %v7872_v61, 4  ;;  %v1000_v14 = vor.u32 %v999_v63, %v997_v62  ;;  %v1136_v16 = vrot.slane %v1082_v46, 4 }
 0x20c   : > { %v1087_v19 = vor.u32 %v1085_v8, %v7880_v5  ;;  %v1088_v24 = vrot.slane %v7880_v5, 4  ;;  %v1137_v25 = vrot.slane %v1085_v8, 5  ;;  %v5703_v26 = vrot.slane %v7855_v38, 9 }
 0x20d   : > { %v7896_v36 = vrot.slane %v1000_v14, 4  ;;  %v886_v29 = vadd.f32 %v7824_v6, %v872_v44  ;;  %v887_v31 = vadd.f32 %v7824_v6, %v873_v45  ;;  %v875_v32 = vmul.f32 %v7818_v1, %v861_v50 }
 0x20e   : > { %v1120_v37 = vsel %vm7849_vm6, %v1087_v19, %v1119_v15  ;;  %v1138_v39 = vor.u32 %v1137_v25, %v1136_v16  ;;  %v862_v40 = vmul.f32 %v6883_v0, %v7799_v52  ;;  %v863_v42 = vmul.f32 %v6885_v9, %v7802_v53 }
 0x20f   : > { %1121 = vst [vmem:[#allocation2 + $0x54] sm:$0xf] %v1120_v37  ;;  %v7911_v47 = vpack.c.bf16 %v886_v29, %v886_v29  ;;  %v5951_v49 = vpack.c.bf16 %v887_v31, %v887_v31  ;;  %v889_v54 = vadd.f32 %v7824_v6, %v875_v32  ;;  %v998_v44 = vsel %vm7889_vm11, %v996_v58, %v997_v62  ;;  %v6798_v31 = vld [vmem:[#allocation10 + $0x250] sm:$0xff]  }
 0x210   : > { %v7916_v45 = vrot.slane %v1138_v39, 4  ;;  %v876_v50 = vmul.f32 %v7818_v1, %v862_v40  ;;  %v877_v55 = vmul.f32 %v7818_v1, %v863_v42  ;;  %1016 = vst [vmem:[#allocation2 + $0xc] sm:$0xf] %v998_v44  ;;  %v912_v52 = vsel %vm7900_vm12, %v7843_v33, %v911_v51 }
 0x211   : > { %v914_v53 = vrot.slane %v7911_v47, 7  ;;  %v949_v57 = vshrl.u32 %v7911_v47, 16  ;;  %v952_v59 = vshll.u32 %v7911_v47, 16  ;;  %988 = vst [vmem:[#allocation2 + $0x30] sm:$0xf] %v7911_v47  ;;  %v1037_v58 = vrot.slane %v7911_v47, 5 }
 0x212   : > { %989 = vst [vmem:[#allocation2 + $0x44] sm:$0xf] %v5951_v49  ;;  %924 = vst [vmem:[#allocation2 + $0x14] sm:$0xf] %v912_v52  ;;  %v917_v46 = vrot.slane %v5951_v49, 7  ;;  %v958_v61 = vshrl.u32 %v5951_v49, 16  ;;  %v7950_v44 = vpack.c.bf16 %v889_v54, %v889_v54  ;;  %v890_v52 = vadd.f32 %v7824_v6, %v876_v50 }
 0x213   : > { %v961_v1 = vshll.u32 %v5951_v49, 16  ;;  %v1040_v62 = vrot.slane %v5951_v49, 5  ;;  %v915_v63 = vsel %vm7900_vm12, %v913_v60, %v914_v53  ;;  %v916_v33 = vrot.slane %v914_v53, 4 }
 0x214   : > { %v951_v51 = vrot.slane %v949_v57, 7  ;;  %v1002_v0 = vrot.slane %v952_v59, 5  ;;  %925 = vst [vmem:[#allocation2 + $0x28] sm:$0xf] %v915_v63  ;;  %v1004_v8 = vrot.slane %v949_v57, 4  ;;  %v1039_v9 = vrot.slane %v1037_v58, 4 }
 0x215   : > { %v960_v14 = vrot.slane %v958_v61, 7  ;;  %v1007_v15 = vrot.slane %v961_v1, 5  ;;  %v918_v60 = vsel %vm7900_vm12, %v916_v33, %v917_v46  ;;  %v1009_v29 = vrot.slane %v958_v61, 4  ;;  %1133 = vst [vmem:[#allocation2 + $0x6c] sm:$0xf] %v7950_v44 }
 0x216   : > { %v954_v16 = vor.u32 %v952_v59, %v951_v51  ;;  %v956_v19 = vrot.slane %v951_v51, 4  ;;  %v1005_v32 = vor.u32 %v1004_v8, %v1002_v0  ;;  %926 = vst [vmem:[#allocation2 + $0x3c] sm:$0xf] %v918_v60  ;;  %v1041_v39 = vsel %vm7934_vm13, %v1039_v9, %v1040_v62  ;;  %v1020_v59 = vld [vmem:[#allocation2 + $0x48] sm:$0xf] }
 0x217   : > { %v963_v37 = vor.u32 %v961_v1, %v960_v14  ;;  %v1042_v40 = vrot.slane %v1040_v62, 4  ;;  %v1010_v49 = vor.u32 %v1009_v29, %v1007_v15  ;;  %1049 = vst [vmem:[#allocation2 + $0x38] sm:$0xf] %v1041_v39  ;;  %v891_v54 = vadd.f32 %v7824_v6, %v877_v55 }
 0x218   : > { %v955_v42 = vsel %vm7942_vm14, %v947_v13, %v954_v16  ;;  %v1006_v57 = vrot.slane %v1005_v32, 4  ;;  %v1003_v50 = vsel %vm7889_vm11, %v7896_v36, %v1002_v0  ;;  %v1064_v61 = vrot.slane %v7950_v44, 7 }
 0x219   : > { %976 = vst [vmem:[#allocation2 + $0x2c] sm:$0xf] %v955_v42  ;;  %v964_v13 = vsel %vm7942_vm14, %v956_v19, %v963_v37  ;;  %1050 = vst [vmem:[#allocation2 + $0x4c] sm:$0x7] %v1042_v40  ;;  %v1011_v46 = vrot.slane %v1010_v49, 4  ;;  %v1090_v1 = vshrl.u32 %v7950_v44, 16  ;;  %v7972_v55 = vpack.c.bf16 %v890_v52, %v890_v52 }
 0x21a   : > { %977 = vst [vmem:[#allocation2 + $0x40] sm:$0xf] %v964_v13  ;;  %v1093_v62 = vshll.u32 %v7950_v44, 16  ;;  %1017 = vst [vmem:[#allocation2 + $0x20] sm:$0xf] %v1003_v50  ;;  %v1008_v63 = vsel %vm7889_vm11, %v1006_v57, %v1007_v15  ;;  %v1170_v6 = vrot.slane %v7950_v44, 5  ;;  %v7974_v33 = vpack.c.bf16 %v891_v54, %v891_v54 }
 0x21b   : > { %v1021_v36 = vsel %vm7955_vm3, %v1011_v46, %v1020_v59  ;;  %1018 = vst [vmem:[#allocation2 + $0x34] sm:$0xf] %v1008_v63  ;;  %v1065_v51 = vsel %vm7900_vm12, %v7878_v4, %v1064_v61  ;;  %v1066_v0 = vrot.slane %v1064_v61, 4  ;;  %v1092_v8 = vrot.slane %v1090_v1, 7  ;;  %1134 = vst [vmem:[#allocation2 + $0x80] sm:$0xf] %v7972_v55 }
 0x21c   : > { %1022 = vst [vmem:[#allocation2 + $0x48] sm:$0xf] %v1021_v36  ;;  %1077 = vst [vmem:[#allocation2 + $0x64] sm:$0xf] %v1065_v51  ;;  %v1140_v9 = vrot.slane %v1093_v62, 5  ;;  %v1142_v14 = vrot.slane %v1090_v1, 4  ;;  %v1171_v28 = vsel %vm7934_vm13, %v5703_v26, %v1170_v6 }
 0x21d   : > { %v7983_v15 = vrot.slane %v1170_v6, 4  ;;  %v1067_v16 = vrot.slane %v7972_v55, 7  ;;  %1135 = vst [vmem:[#allocation2 + $0x94] sm:$0xf] %v7974_v33  ;;  %v1095_v19 = vor.u32 %v1093_v62, %v1092_v8  ;;  %v1097_v60 = vrot.slane %v1092_v8, 4 }
 0x21e   : > { %v1099_v4 = vshrl.u32 %v7972_v55, 16  ;;  %v1102_v29 = vshll.u32 %v7972_v55, 16  ;;  %v1141_v32 = vsel %vm7889_vm11, %v7916_v45, %v1140_v9  ;;  %v1143_v37 = vor.u32 %v1142_v14, %v1140_v9  ;;  %v979_v59 = vld [vmem:[#allocation2 + $0x4] sm:$0x1]  ;;  %v6710_v62 = vld [vmem:[#allocation2 + $0x8] ss:$20 sps:$4 sm:$0xff]  }
 0x21f   : > { %v1068_v39 = vsel %vm7900_vm12, %v1066_v0, %v1067_v16  ;;  %v1069_v40 = vrot.slane %v1067_v16, 4  ;;  %v1096_v42 = vsel %vm7942_vm14, %v1088_v24, %v1095_v19  ;;  %1159 = vst [vmem:[#allocation2 + $0x5c] sm:$0xf] %v1141_v32  ;;  %v1173_v45 = vrot.slane %v7972_v55, 5  ;;  %v1125_v8 = vld [vmem:[#allocation2 + $0x54] sm:$0x1] }
 0x220   : > { %1078 = vst [vmem:[#allocation2 + $0x78] sm:$0xf] %v1068_v39  ;;  %v1101_v49 = vrot.slane %v1099_v4, 7  ;;  %v1145_v52 = vrot.slane %v1102_v29, 5  ;;  %v1147_v57 = vrot.slane %v1099_v4, 4  ;;  %v1144_v13 = vrot.slane %v1143_v37, 4 }
 0x221   : > { %1122 = vst [vmem:[#allocation2 + $0x68] sm:$0xf] %v1096_v42  ;;  %v1070_v54 = vrot.slane %v7974_v33, 7  ;;  %v1108_v50 = vshrl.u32 %v7974_v33, 16  ;;  %v1111_v1 = vshll.u32 %v7974_v33, 16  ;;  %v1175_v36 = vrot.slane %v1173_v45, 4 }
 0x222   : > { %v1104_v46 = vor.u32 %v1102_v29, %v1101_v49  ;;  %v1106_v61 = vrot.slane %v1101_v49, 4  ;;  %v1148_v5 = vor.u32 %v1147_v57, %v1145_v52  ;;  %v6707_v24 = vld [vmem:[#allocation2 + $0xc] ss:$20 sps:$4 sm:$0xff]   ;;  %v1146_v55 = vsel %vm7889_vm11, %v1144_v13, %v1145_v52  ;;  %1183 = vst [vmem:[#allocation2 + $0x60] sm:$0xf] %v1171_v28 }
 0x223   : > { %v1071_v51 = vsel %vm7900_vm12, %v1069_v40, %v1070_v54  ;;  %v1110_v0 = vrot.slane %v1108_v50, 7  ;;  %1160 = vst [vmem:[#allocation2 + $0x70] sm:$0xf] %v1146_v55  ;;  %v1150_v19 = vrot.slane %v1111_v1, 5  ;;  %v1152_v4 = vrot.slane %v1108_v50, 4  ;;  %1740 = vmatprep.mubr.bf16.mxu1 %v6707_v24  ;;  %v6718_v54 = vld [vmem:[#allocation10 + $0x128] sm:$0xff]  }
 0x224   : > { %v1105_v14 = vsel %vm7942_vm14, %v1097_v60, %v1104_v46  ;;  %v1149_v16 = vrot.slane %v1148_v5, 4  ;;  %1079 = vst [vmem:[#allocation2 + $0x8c] sm:$0xf] %v1071_v51  ;;  %v1026_v29 = vld [vmem:[#allocation2 + $0x48] sm:$0x8]  ;;  %v1176_v37 = vrot.slane %v7974_v33, 5  ;;  %1741 = vmatmul.mubr.bf16.vlgmr.msra.gmra.mxu1 %v6710_v62  ;;  %v946_v39 = vsel %vm7942_vm14, %v938_v48, %v7884_v12 }
 0x225   : > { %1123 = vst [vmem:[#allocation2 + $0x7c] sm:$0xf] %v1105_v14  ;;  %v1113_v32 = vor.u32 %v1111_v1, %v1110_v0  ;;  %v980_v60 = vsel %vm8005_vm0, 0, %v979_v59  ;;  %v8029_v40 = vld [vmem:[#allocation2 + $0x38] ss:$20 sps:$4 sm:$0xff]   ;;  %v1153_v49 = vor.u32 %v1152_v4, %v1150_v19  ;;  %v1126_v33 = vsel %vm8005_vm0, 0, %v1125_v8 }
 0x226   : > { %v1151_v42 = vsel %vm7889_vm11, %v1149_v16, %v1150_v19  ;;  %975 = vst [vmem:[#allocation2 + $0x18] sm:$0xf] %v946_v39  ;;  %981 = vst [vmem:[#allocation2 + $0x4] sm:$0x1] %v980_v60  ;;  %v1027_v34 = vsel %vm8015_vm2, 0, %v1026_v29  ;;  %v1178_v52 = vrot.slane %v1176_v37, 4  ;;  %v1035_v57 = vsel %vm7934_vm13, %v5698_v30, %v1034_v56 }
 0x227   : > { %2113 = vst [vmem:[#allocation2 + $0x4c] sm:$0x8] %v9098_v20  ;;  %v1162_v48 = vld [vmem:[#allocation2 + $0x98] sm:$0xf]  ;;  %v1114_v12 = vsel %vm7942_vm14, %v1106_v61, %v1113_v32  ;;  %1161 = vst [vmem:[#allocation2 + $0x84] sm:$0xf] %v1151_v42  ;;  %v1038_v59 = vsel %vm7934_vm13, %v7876_v2, %v1037_v58  ;;  %v1174_v30 = vsel %vm7934_vm13, %v7983_v15, %v1173_v45 }
 0x228   : > { %1127 = vst [vmem:[#allocation2 + $0x54] sm:$0x1] %v1126_v33  ;;  %1028 = vst [vmem:[#allocation2 + $0x48] sm:$0x8] %v1027_v34  ;;  %v1154_v13 = vrot.slane %v1153_v49, 4  ;;  %v1177_v43 = vsel %vm7934_vm13, %v1175_v36, %v1176_v37  ;;  %v6716_v2 = vld [vmem:[#allocation10 + $0x130] sm:$0xff]  }
 0x229   : > { %1124 = vst [vmem:[#allocation2 + $0x90] sm:$0xf] %v1114_v12  ;;  %1047 = vst [vmem:[#allocation2 + $0x10] sm:$0xf] %v1035_v57  ;;  %v6714_v44 = vld [vmem:[#allocation2 + $0x2c] ss:$20 sps:$4 sm:$0xff]  }
 0x22a   : > { %1048 = vst [vmem:[#allocation2 + $0x24] sm:$0xf] %v1038_v59  ;;  %1186 = vst [vmem:[#allocation2 + $0x9c] sm:$0x7] %v1178_v52  ;;  %v1163_v56 = vsel %vm7955_vm3, %v1154_v13, %v1162_v48  ;;  %v6723_v45 = vld [vmem:[#allocation2 + $0x30] ss:$20 sps:$4 sm:$0xff]  }
 0x22b   : > { %1184 = vst [vmem:[#allocation2 + $0x74] sm:$0xf] %v1174_v30  ;;  %1185 = vst [vmem:[#allocation2 + $0x88] sm:$0xf] %v1177_v43  ;;  %v6724_v50 = vld [vmem:[#allocation2 + $0x5c] ss:$20 sps:$4 sm:$0xff]  }
 0x22c   : > { %1164 = vst [vmem:[#allocation2 + $0x98] sm:$0xf] %v1163_v56  ;;  %v6717_v1 = vld [vmem:[#allocation2 + $0x28] ss:$20 sps:$4 sm:$0xff]   ;;  %v6733_v8 = vld [vmem:[#allocation10 + $0x110] sm:$0xff]   ;;  %v6735_v19 = vld [vmem:[#allocation10 + $0x108] sm:$0xff]  }
 0x22d   : > { %v1188_v38 = vld [vmem:[#allocation2] sm:$0xff]  ;;  %v1191_v47 = vld [vmem:[#allocation2 + $0x14] sm:$0xff] }
 0x22e   : > { %v6711_v58 = vld [vmem:[#allocation2 + $0x4] ss:$20 sps:$4 sm:$0xff]   ;;  %2006 = vst [vmem:[#allocation2] sm:$0x1] %v9098_v20  ;;  %v5705_v26 = vcombine.low %v1188_v38, %v1191_v47  ;;  %v6727_v55 = vld [vmem:[#allocation10 + $0x118] sm:$0xff]  }
 0x22f   : > { %v6719_v6 = vld [vmem:[#allocation2 + $0x54] ss:$20 sps:$4 sm:$0xff]   ;;  %1675 = vmatprep.mubr.bf16.mxu0 %v6711_v58  ;;  %v6734_v4 = vld [vmem:[#allocation2 + $0x78] ss:$20 sps:$4 sm:$0xff]  }
 0x230   : > { %v6721_v15 = vld [vmem:[#allocation2 + $0x34] ss:$20 sps:$4 sm:$0xff]   ;;  %1676 = vmatmul.mubr.bf16.vlgmr.msra.gmra.mxu0 %v5705_v26  ;;  %v6728_v14 = vld [vmem:[#allocation2 + $0x7c] ss:$20 sps:$4 sm:$0xff]  }
 0x231   : > { %1683 = vmatprep.mubr.bf16.mxu0 %v6714_v44  ;;  %6262 = vmatpush3.bf16.msra.mxu0 %v7812_v35  ;;  %v6726_v24 = vld [vmem:[#allocation10 + $0x120] sm:$0xff]   ;;  %v6730_v35 = vld [vmem:[#allocation2 + $0x58] ss:$20 sps:$4 sm:$0xff]   ;;  %v1200_v36 = vld [vmem:[#allocation2 + $0x50] sm:$0xff] }
 0x232   : > { %6263 = vmatprep.subr.bf16.mxu0 %v6716_v2  ;;  %1748 = vmatprep.mubr.bf16.mxu1 %v6721_v15  ;;  %v6741_v5 = vld [vmem:[#allocation2 + $0x88] ss:$20 sps:$4 sm:$0xff]   ;;  %v6737_v16 = vld [vmem:[#allocation2 + $0x80] ss:$20 sps:$4 sm:$0xff]   ;;  %v6736_v32 = vld [vmem:[#allocation2 + $0x10] ss:$20 sps:$4 sm:$0xff]  }
 0x233   : > { %v1165_v46 = vld [vmem:[#allocation2 + $0x98] sm:$0x8]  ;;  %1749 = vmatmul.mubr.bf16.gmra.mxu1 %v6723_v45  ;;  %2249 = vst [vmem:[#allocation2 + $0x9c] sm:$0x8] %v9098_v20  ;;  %v1203_v62 = vld [vmem:[#allocation2 + $0x64] sm:$0xff] }
 0x234   : > { %v1166_v61 = vsel %vm8015_vm2, 0, %v1165_v46  ;;  %1756 = vmatprep.mubr.bf16.mxu1 %v6724_v50  ;;  %v5715_v0 = vcombine.low %v1200_v36, %v1203_v62  ;;  %v6738_v29 = vld [vmem:[#allocation10 + $0x100] sm:$0xff]   ;;  %v6740_v37 = vld [vmem:[#allocation2 + $0x60] ss:$20 sps:$4 sm:$0xff]  }
 0x235   : > { %1167 = vst [vmem:[#allocation2 + $0x98] sm:$0x8] %v1166_v61  ;;  %6264 = vmatpush3.bf16.msra.mxu0 %v6716_v2 }
 0x236   : > { %6265 = vmatprep.subr.bf16.mxu0 %v6718_v54 }
 0x238   : > { %1684 = vmatmul.mubr.bf16.gmra.mxu0 %v6717_v1 }
 0x239   : > { %1691 = vmatprep.mubr.bf16.mxu0 %v6719_v6  ;;  %6266 = vmatpush3.bf16.msra.mxu0 %v6718_v54  ;;  %v5704_v54 = vld [vmem:[%s9062_s6] ss:$0 sm:$0xff] }
 0x23a   : > { %6267 = vmatprep.subr.bf16.mxu0 %v6726_v24 }
 0x23b   : > { %1757 = vmatmul.mubr.bf16.gmra.mxu1 %v6730_v35 }
 0x23c   : > { %v6731_v51 = vld [vmem:[#allocation2 + $0x84] ss:$20 sps:$4 sm:$0xff]  }
 0x23d   : > { %6268 = vmatpush3.bf16.msra.mxu0 %v6726_v24  ;;  %1764 = vmatprep.mubr.bf16.mxu1 %v6731_v51 }
 0x23e   : > { %6269 = vmatprep.subr.bf16.mxu0 %v6727_v55 }
 0x240   : > { %1692 = vmatmul.mubr.bf16.gmra.mxu0 %v5715_v0 }
 0x241   : > { %1699 = vmatprep.mubr.bf16.mxu0 %v6728_v14  ;;  %6270 = vmatpush3.bf16.msra.mxu0 %v6727_v55 }
 0x242   : > { %6271 = vmatprep.subr.bf16.mxu0 %v6733_v8 }
 0x243   : > { %1765 = vmatmul.mubr.bf16.gmra.mxu1 %v6737_v16 }
 0x245   : > { %6272 = vmatpush3.bf16.msra.mxu0 %v6733_v8 }
 0x246   : > { %6273 = vmatprep.subr.bf16.mxu0 %v6735_v19 }
 0x248   : > { %1700 = vmatmul.mubr.bf16.gmra.mxu0 %v6734_v4 }
 0x249   : > { %6274 = vmatpush3.bf16.msra.mxu0 %v6735_v19  ;;  %6277 = vmatprep.mubr.bf16.mxu0 %v6736_v32 }
 0x24a   : > { %6275 = vmatprep.subr.bf16.mxu0 %v6738_v29 }
 0x24d   : > { %6276 = vmatpush3.bf16.msra.mxu0 %v6738_v29 }
 0x250   : > { %6278 = vmatmul.mubr.bf16.vlgmr.msra.gmra.mxu0 %v8029_v40 }
 0x251   : > { %6281 = vmatprep.mubr.bf16.mxu0 %v6740_v37 }
 0x258   : > { %6282 = vmatmul.mubr.bf16.gmra.mxu0 %v6741_v5 }
 0x2e4   : > { %v6021_v39 = vpop.f32.mrf.mxu1 }
 0x2e6   : > { %v6022_v60 = vpop.f32.mrf.mxu1 }
 0x2e7   : > { %v6023_v55 = vadd.f32 %v6022_v60, %v6021_v39 }
 0x2e8   : > { %v6024_v42 = vpop.f32.mrf.mxu1 }
 0x2ea   : > { %v6025_v33 = vpop.f32.mrf.mxu1 }
 0x2eb   : > { %v6026_v32 = vadd.f32 %v6025_v33, %v6024_v42 }
 0x2f0   : > { %v5981_v49 = vpop.f32.mrf.mxu0 }
 0x2f2   : > { %v5982_v34 = vpop.f32.mrf.mxu0 }
 0x2f3   : > { %v6027_v48 = vpop.f32.mrf.mxu1  ;;  %v5983_v45 = vadd.f32 %v5982_v34, %v5981_v49 }
 0x2f4   : > { %v5984_v12 = vpop.f32.mrf.mxu0 }
 0x2f5   : > { %v6028_v52 = vpop.f32.mrf.mxu1  ;;  %v1678_v1 = vadd.f32 %v5983_v45, %v5704_v54 }
 0x2f6   : > { %v5985_v57 = vpop.f32.mrf.mxu0  ;;  %v6029_v51 = vadd.f32 %v6028_v52, %v6027_v48 }
 0x2f7   : > { %v6030_v59 = vpop.f32.mrf.mxu1  ;;  %v5986_v24 = vadd.f32 %v5985_v57, %v5984_v12  ;;  %v1743_v19 = vadd.f32 %v6023_v55, %v1678_v1 }
 0x2f8   : > { %v5987_v13 = vpop.f32.mrf.mxu0 }
 0x2f9   : > { %v6031_v28 = vpop.f32.mrf.mxu1  ;;  %v1681_v16 = vadd.f32 %v5986_v24, %v5704_v54 }
 0x2fa   : > { %v5988_v30 = vpop.f32.mrf.mxu0  ;;  %v6032_v37 = vadd.f32 %v6031_v28, %v6030_v59 }
 0x2fb   : > { %v6033_v43 = vpop.f32.mrf.mxu1  ;;  %v5989_v61 = vadd.f32 %v5988_v30, %v5987_v13  ;;  %v1746_v48 = vadd.f32 %v6026_v32, %v1681_v16 }
 0x2fc   : > { %v5990_v56 = vpop.f32.mrf.mxu0 }
 0x2fd   : > { %v6034_v40 = vpop.f32.mrf.mxu1  ;;  %v1686_v36 = vadd.f32 %v5989_v61, %v5704_v54 }
 0x2fe   : > { %v5991_v2 = vpop.f32.mrf.mxu0  ;;  %v6035_v49 = vadd.f32 %v6034_v40, %v6033_v43 }
 0x2ff   : > { %v6036_v58 = vpop.f32.mrf.mxu1  ;;  %v5992_v0 = vadd.f32 %v5991_v2, %v5990_v56  ;;  %v1751_v12 = vadd.f32 %v6029_v51, %v1686_v36 }
 0x300   : > { %v5993_v38 = vpop.f32.mrf.mxu0 }
 0x301   : > { %v6037_v6 = vpop.f32.mrf.mxu1  ;;  %v1689_v13 = vadd.f32 %v5992_v0, %v5704_v54 }
 0x302   : > { %v5994_v47 = vpop.f32.mrf.mxu0 }
 0x303   : > { %v6039_v46 = vpop.f32.mrf.mxu1  ;;  %v5995_v8 = vadd.f32 %v5994_v47, %v5993_v38  ;;  %v6038_v38 = vadd.f32 %v6037_v6, %v6036_v58  ;;  %v1754_v28 = vadd.f32 %v6032_v37, %v1689_v13 }
 0x304   : > { %v5996_v26 = vpop.f32.mrf.mxu0 }
 0x305   : > { %v6040_v35 = vpop.f32.mrf.mxu1  ;;  %v1694_v30 = vadd.f32 %v5995_v8, %v5704_v54 }
 0x306   : > { %v5997_v44 = vpop.f32.mrf.mxu0  ;;  %v6041_v59 = vadd.f32 %v6040_v35, %v6039_v46 }
 0x307   : > { %v6042_v4 = vpop.f32.mrf.mxu1  ;;  %v5998_v45 = vadd.f32 %v5997_v44, %v5996_v26  ;;  %v1759_v40 = vadd.f32 %v6035_v49, %v1694_v30 }
 0x308   : > { %v5999_v15 = vpop.f32.mrf.mxu0 }
 0x309   : > { %v6043_v52 = vpop.f32.mrf.mxu1  ;;  %v1697_v33 = vadd.f32 %v5998_v45, %v5704_v54 }
 0x30a   : > { %v6000_v50 = vpop.f32.mrf.mxu0  ;;  %v6044_v61 = vadd.f32 %v6043_v52, %v6042_v4 }
 0x30b   : > { %v6001_v20 = vadd.f32 %v6000_v50, %v5999_v15  ;;  %v1762_v35 = vadd.f32 %v6038_v38, %v1697_v33 }
 0x30c   : > { %v6002_v5 = vpop.f32.mrf.mxu0 }
 0x30d   : > { %v1702_v26 = vadd.f32 %v6001_v20, %v5704_v54 }
 0x30e   : > { %v6003_v62 = vpop.f32.mrf.mxu0 }
 0x30f   : > { %v6004_v39 = vadd.f32 %v6003_v62, %v6002_v5  ;;  %v1767_v24 = vadd.f32 %v6041_v59, %v1702_v26 }
 0x310   : > { %v6279_v14 = vpop.f32.mrf.mxu0 }
 0x311   : > { %v1816_v56 = vadd.f32 %v6279_v14, %v1751_v12  ;;  %v1705_v44 = vadd.f32 %v6004_v39, %v5704_v54 }
 0x312   : > { %v1807_v29 = vpop.f32.mrf.mxu0 }
 0x313   : > { %v1808_v34 = vadd.f32 %v1807_v29, %v1743_v19  ;;  %v1840_v50 = vmax.f32 %v1816_v56, 0.0  ;;  %v1770_v46 = vadd.f32 %v6044_v61, %v1705_v44 }
 0x314   : > { %v6280_v57 = vpop.f32.mrf.mxu0 }
 0x315   : > { %v1838_v60 = vmax.f32 %v1808_v34, 0.0  ;;  %v1819_v5 = vadd.f32 %v6280_v57, %v1754_v28  ;;  %v8083_v20 = vadd.f32 %v1840_v50, %v7748_v11 }
 0x316   : > { %v1810_v2 = vpop.f32.mrf.mxu0 }
 0x317   : > { %v8075_v47 = vadd.f32 %v1838_v60, %v7738_v3  ;;  %v1811_v42 = vadd.f32 %v1810_v2, %v1746_v48  ;;  %v1841_v54 = vmax.f32 %v1819_v5, 0.0  ;;  %v6742_v5 = vld [vmem:[#allocation10 + $0x238] sm:$0xff]  }
 0x318   : > { %v6283_v43 = vpop.f32.mrf.mxu0  ;;  %6097 = vmatprep.subr.bf16.mxu0 %v6742_v5 }
 0x319   : > { %v1839_v15 = vmax.f32 %v1811_v42, 0.0  ;;  %1858 = vadd.xlane.f32.xlu0 %v8075_v47  ;;  %v1832_v36 = vadd.f32 %v6283_v43, %v1767_v24  ;;  %v8091_v14 = vadd.f32 %v1841_v54, %v7754_v18  ;;  %v6746_v24 = vld [vmem:[#allocation10 + $0x230] sm:$0xff]   ;;  %v6750_v54 = vld [vmem:[#allocation10 + $0x228] sm:$0xff]  }
 0x31a   : > { %v1823_v1 = vpop.f32.mrf.mxu0 }
 0x31b   : > { %v8079_v58 = vadd.f32 %v1839_v15, %v7745_v10  ;;  %v1824_v3 = vadd.f32 %v1823_v1, %v1759_v40  ;;  %v1844_v16 = vmax.f32 %v1832_v36, 0.0  ;;  %v6743_v1 = vld [vmem:[#allocation10 + $0x1f8] sm:$0xff]   ;;  %v6752_v36 = vld [vmem:[#allocation10 + $0x1a8] sm:$0xff]  }
 0x31c   : > { %v6284_v6 = vpop.f32.mrf.mxu0  ;;  %6098 = vmatpush3.bf16.msra.mxu0 %v6743_v1 }
 0x31d   : > { %v1842_v62 = vmax.f32 %v1824_v3, 0.0  ;;  %1860 = vadd.xlane.f32.xlu1 %v8079_v58  ;;  %v1835_v0 = vadd.f32 %v6284_v6, %v1770_v46  ;;  %v6744_v3 = vld [vmem:[#allocation10 + $0x1b8] sm:$0xff]   ;;  %6099 = vmatprep.subr.bf16.mxu0 %v6746_v24  ;;  %v6748_v46 = vld [vmem:[#allocation10 + $0x1b0] sm:$0xff]  }
 0x31e   : > { %v1826_v55 = vpop.f32.mrf.mxu0  ;;  %v6745_v6 = vld [vmem:[#allocation10 + $0x178] sm:$0xff]   ;;  %6057 = vmatprep.subr.bf16.mxu1 %v6744_v3 }
 0x31f   : > { %v8086_v51 = vadd.f32 %v1842_v62, %v7741_v7  ;;  %v1827_v10 = vadd.f32 %v1826_v55, %v1762_v35  ;;  %v1845_v19 = vmax.f32 %v1835_v0, 0.0  ;;  %v8099_v7 = vadd.f32 %v1844_v16, %v7761_v22  ;;  %v6747_v62 = vld [vmem:[#allocation10 + $0x1f0] sm:$0xff]   ;;  %6058 = vmatpush3.bf16.msra.mxu1 %v6745_v6  ;;  %v6751_v55 = vld [vmem:[#allocation10 + $0x1e8] sm:$0xff]   ;;  %v6756_v16 = vld [vmem:[#allocation10 + $0x1a0] sm:$0xff]  }
 0x320   : > { %6100 = vmatpush3.bf16.msra.mxu0 %v6747_v62  ;;  %v6749_v35 = vld [vmem:[#allocation10 + $0x170] sm:$0xff]   ;;  %6059 = vmatprep.subr.bf16.mxu1 %v6748_v46  ;;  %v6753_v0 = vld [vmem:[#allocation10 + $0x168] sm:$0xff]  }
 0x321   : > { %v1843_v8 = vmax.f32 %v1827_v10, 0.0  ;;  %1862 = vadd.xlane.f32.xlu1 %v8083_v20  ;;  %1866 = vadd.xlane.f32.xlu0 %v8086_v51  ;;  %v8102_v4 = vadd.f32 %v1845_v19, %v7764_v23  ;;  %v6754_v10 = vld [vmem:[#allocation10 + $0x220] sm:$0xff]  }
 0x322   : > { %6101 = vmatprep.subr.bf16.mxu0 %v6750_v54  ;;  %v6757_v19 = vld [vmem:[#allocation10 + $0x160] sm:$0xff]  }
 0x323   : > { %v8094_v11 = vadd.f32 %v1843_v8, %v7758_v21  ;;  %6060 = vmatpush3.bf16.msra.mxu1 %v6749_v35  ;;  %v6755_v8 = vld [vmem:[#allocation10 + $0x1e0] sm:$0xff]  }
 0x324   : > { %6102 = vmatpush3.bf16.msra.mxu0 %v6751_v55  ;;  %6061 = vmatprep.subr.bf16.mxu1 %v6752_v36  ;;  %v8152_v36 = vld [vmem:[%s9143_s25 + $0x1] ss:$0 sm:$0xff] }
 0x325   : > { %1868 = vadd.xlane.f32.xlu1 %v8094_v11  ;;  %1864 = vadd.xlane.f32.xlu0 %v8091_v14 }
 0x326   : > { %6103 = vmatprep.subr.bf16.mxu0 %v6754_v10 }
 0x327   : > { %6062 = vmatpush3.bf16.msra.mxu1 %v6753_v0 }
 0x328   : > { %6104 = vmatpush3.bf16.msra.mxu0 %v6755_v8  ;;  %6063 = vmatprep.subr.bf16.mxu1 %v6756_v16 }
 0x329   : > { %1872 = vadd.xlane.f32.xlu1 %v8102_v4  ;;  %1870 = vadd.xlane.f32.xlu0 %v8099_v7 }
 0x32b   : > { %6064 = vmatpush3.bf16.msra.mxu1 %v6757_v19  ;;  %v8158_v19 = vld [vmem:[%s9060_s4 + $0x1] ss:$0 sm:$0xff] }
 0x3a2   : > { %v1859_v18 = vpop.xlane.xlu0 %1858 }
 0x3a3   : > { %v1874_v29 = vmul.f32 0.0078125, %v1859_v18  ;;  %v6758_v18 = vld [vmem:[#allocation10 + $0x218] sm:$0xff]  }
 0x3a4   : > { %6105 = vmatprep.subr.bf16.mxu0 %v6758_v18 }
 0x3a5   : > { %v8107_v32 = vsub.f32 %v8075_v47, %v1874_v29  ;;  %v6759_v29 = vld [vmem:[#allocation10 + $0x1d8] sm:$0xff]  }
 0x3a6   : > { %v1861_v21 = vpop.xlane.xlu1 %1860  ;;  %6106 = vmatpush3.bf16.msra.mxu0 %v6759_v29 }
 0x3a7   : > { %v1875_v37 = vmul.f32 0.0078125, %v1861_v21  ;;  %v1890_v49 = vmul.f32 %v8107_v32, %v8107_v32  ;;  %v6760_v21 = vld [vmem:[#allocation10 + $0x198] sm:$0xff]  }
 0x3a8   : > { %6065 = vmatprep.subr.bf16.mxu1 %v6760_v21 }
 0x3a9   : > { %1898 = vadd.xlane.f32.xlu0 %v1890_v49  ;;  %v8112_v22 = vsub.f32 %v8079_v58, %v1875_v37  ;;  %v6761_v37 = vld [vmem:[#allocation10 + $0x158] sm:$0xff]   ;;  %v6762_v49 = vld [vmem:[#allocation10 + $0x210] sm:$0xff]  }
 0x3aa   : > { %v1863_v23 = vpop.xlane.xlu1 %1862  ;;  %v1867_v34 = vpop.xlane.xlu0 %1866  ;;  %6066 = vmatpush3.bf16.msra.mxu1 %v6761_v37  ;;  %6107 = vmatprep.subr.bf16.mxu0 %v6762_v49 }
 0x3ab   : > { %v1876_v13 = vmul.f32 0.0078125, %v1863_v23  ;;  %v1878_v30 = vmul.f32 0.0078125, %v1867_v34  ;;  %v1891_v45 = vmul.f32 %v8112_v22, %v8112_v22  ;;  %v6763_v23 = vld [vmem:[#allocation10 + $0x1d0] sm:$0xff]  }
 0x3ac   : > { %6108 = vmatpush3.bf16.msra.mxu0 %v6763_v23  ;;  %v6764_v34 = vld [vmem:[#allocation10 + $0x190] sm:$0xff]  }
 0x3ad   : > { %1900 = vadd.xlane.f32.xlu1 %v1891_v45  ;;  %v8117_v12 = vsub.f32 %v8083_v20, %v1876_v13  ;;  %v8120_v57 = vsub.f32 %v8086_v51, %v1878_v30  ;;  %v6765_v13 = vld [vmem:[#allocation10 + $0x150] sm:$0xff]   ;;  %v6766_v30 = vld [vmem:[#allocation10 + $0x208] sm:$0xff]   ;;  %6067 = vmatprep.subr.bf16.mxu1 %v6764_v34 }
 0x3ae   : > { %v1869_v39 = vpop.xlane.xlu1 %1868  ;;  %v1865_v60 = vpop.xlane.xlu0 %1864  ;;  %v6767_v45 = vld [vmem:[#allocation10 + $0x1c8] sm:$0xff]   ;;  %6068 = vmatpush3.bf16.msra.mxu1 %v6765_v13  ;;  %6109 = vmatprep.subr.bf16.mxu0 %v6766_v30 }
 0x3af   : > { %v1879_v48 = vmul.f32 0.0078125, %v1869_v39  ;;  %v1877_v52 = vmul.f32 0.0078125, %v1865_v60  ;;  %v1892_v56 = vmul.f32 %v8117_v12, %v8117_v12  ;;  %v1894_v2 = vmul.f32 %v8120_v57, %v8120_v57  ;;  %v6768_v39 = vld [vmem:[#allocation10 + $0x188] sm:$0xff]  }
 0x3b0   : > { %6110 = vmatpush3.bf16.msra.mxu0 %v6767_v45  ;;  %v6769_v60 = vld [vmem:[#allocation10 + $0x148] sm:$0xff]   ;;  %6069 = vmatprep.subr.bf16.mxu1 %v6768_v39 }
 0x3b1   : > { %1902 = vadd.xlane.f32.xlu1 %v1892_v56  ;;  %1906 = vadd.xlane.f32.xlu0 %v1894_v2  ;;  %v8127_v38 = vsub.f32 %v8094_v11, %v1879_v48  ;;  %v8130_v42 = vsub.f32 %v8091_v14, %v1877_v52  ;;  %v6770_v48 = vld [vmem:[#allocation10 + $0x200] sm:$0xff]  }
 0x3b2   : > { %v1873_v33 = vpop.xlane.xlu1 %1872  ;;  %v1871_v59 = vpop.xlane.xlu0 %1870  ;;  %v6771_v52 = vld [vmem:[#allocation10 + $0x1c0] sm:$0xff]   ;;  %6070 = vmatpush3.bf16.msra.mxu1 %v6769_v60  ;;  %6111 = vmatprep.subr.bf16.mxu0 %v6770_v48 }
 0x3b3   : > { %v1881_v28 = vmul.f32 0.0078125, %v1873_v33  ;;  %v1880_v43 = vmul.f32 0.0078125, %v1871_v59  ;;  %v1895_v40 = vmul.f32 %v8127_v38, %v8127_v38  ;;  %v1893_v26 = vmul.f32 %v8130_v42, %v8130_v42  ;;  %v6772_v56 = vld [vmem:[#allocation10 + $0x180] sm:$0xff]   ;;  %v8146_v33 = vld [vmem:[#allocation10 + $0x278] sm:$0xff]  }
 0x3b4   : > { %6112 = vmatpush3.bf16.msra.mxu0 %v6771_v52  ;;  %v6776_v2 = vld [vmem:[#allocation10 + $0x140] sm:$0xff]   ;;  %6071 = vmatprep.subr.bf16.mxu1 %v6772_v56 }
 0x3b5   : > { %1908 = vadd.xlane.f32.xlu1 %v1895_v40  ;;  %1904 = vadd.xlane.f32.xlu0 %v1893_v26  ;;  %v8137_v44 = vsub.f32 %v8102_v4, %v1881_v28  ;;  %v8140_v61 = vsub.f32 %v8099_v7, %v1880_v43 }
 0x3b6   : > { %6072 = vmatpush3.bf16.msra.mxu1 %v6776_v2 }
 0x3b7   : > { %v1897_v15 = vmul.f32 %v8137_v44, %v8137_v44  ;;  %v1896_v50 = vmul.f32 %v8140_v61, %v8140_v61  ;;  %6285 = vmatprep.subr.bf16.mxu1 %v8146_v33 }
 0x3b9   : > { %1912 = vadd.xlane.f32.xlu1 %v1897_v15  ;;  %1910 = vadd.xlane.f32.xlu0 %v1896_v50 }
 0x432   : > { %v1899_v59 = vpop.xlane.xlu0 %1898 }
 0x433   : > { %v1914_v28 = vmul.f32 0.0078125, %v1899_v59 }
 0x435   : > { %v1922_v43 = vadd.f32 1e-05, %v1914_v28 }
 0x436   : > { %v1901_v40 = vpop.xlane.xlu1 %1900 }
 0x437   : > { %6886 = vrsqrt.f32 %v1922_v43  ;;  %v1915_v26 = vmul.f32 0.0078125, %v1901_v40 }
 0x439   : > { %v1923_v15 = vadd.f32 1e-05, %v1915_v26 }
 0x43a   : > { %v1903_v50 = vpop.xlane.xlu1 %1902  ;;  %v1907_v5 = vpop.xlane.xlu0 %1906 }
 0x43b   : > { %6888 = vrsqrt.f32 %v1923_v15  ;;  %v1916_v1 = vmul.f32 0.0078125, %v1903_v50  ;;  %v1918_v3 = vmul.f32 0.0078125, %v1907_v5 }
 0x43d   : > { %v1924_v6 = vadd.f32 1e-05, %v1916_v1  ;;  %v1926_v24 = vadd.f32 1e-05, %v1918_v3 }
 0x43e   : > { %v1909_v62 = vpop.xlane.xlu1 %1908  ;;  %v1905_v46 = vpop.xlane.xlu0 %1904 }
 0x43f   : > { %6890 = vrsqrt.f32 %v1924_v6  ;;  %v1919_v35 = vmul.f32 0.0078125, %v1909_v62  ;;  %v1917_v16 = vmul.f32 0.0078125, %v1905_v46 }
 0x440   : > { %6892 = vrsqrt.f32 %v1926_v24  ;;  %v2045_v24 = vld [vmem:[#allocation2 + $0x4] sm:$0xf] }
 0x441   : > { %v1927_v8 = vadd.f32 1e-05, %v1919_v35  ;;  %v1925_v34 = vadd.f32 1e-05, %v1917_v16 }
 0x442   : > { %v1913_v54 = vpop.xlane.xlu1 %1912  ;;  %v1911_v0 = vpop.xlane.xlu0 %1910 }
 0x443   : > { %v1921_v18 = vmul.f32 0.0078125, %v1913_v54  ;;  %v1920_v21 = vmul.f32 0.0078125, %v1911_v0  ;;  %6894 = vrsqrt.f32 %v1927_v8 }
 0x444   : > { %v6887_v55 = vpop.eup %6886  ;;  %6896 = vrsqrt.f32 %v1925_v34 }
 0x445   : > { %v1938_v10 = vmul.f32 %v6887_v55, %v8107_v32  ;;  %v1929_v13 = vadd.f32 1e-05, %v1921_v18  ;;  %v1928_v45 = vadd.f32 1e-05, %v1920_v21 }
 0x447   : > { %v1952_v29 = vmul.f32 %v8152_v36, %v1938_v10  ;;  %6898 = vrsqrt.f32 %v1929_v13 }
 0x448   : > { %v6889_v37 = vpop.eup %6888  ;;  %6900 = vrsqrt.f32 %v1928_v45 }
 0x449   : > { %v1966_v49 = vadd.f32 %v8158_v19, %v1952_v29  ;;  %v1939_v23 = vmul.f32 %v6889_v37, %v8112_v22 }
 0x44b   : > { %v5956_v32 = vpack.c.bf16 %v1966_v49, %v1966_v49  ;;  %v1953_v30 = vmul.f32 %v8152_v36, %v1939_v23 }
 0x44c   : > { %v6891_v39 = vpop.eup %6890 }
 0x44d   : > { %v6893_v60 = vpop.eup %6892  ;;  %v1988_v48 = vrot.slane %v5956_v32, 7  ;;  %v2008_v52 = vshrl.u32 %v5956_v32, 16  ;;  %v2011_v56 = vshll.u32 %v5956_v32, 16  ;;  %2058 = vst [vmem:[#allocation2 + $0x8] sm:$0xf] %v5956_v32  ;;  %v1967_v2 = vadd.f32 %v8158_v19, %v1953_v30 }
 0x44e   : > { %v1940_v59 = vmul.f32 %v6891_v39, %v8117_v12  ;;  %v1942_v22 = vmul.f32 %v6893_v60, %v8120_v57  ;;  %v5773_v6 = vrot.slane %v5956_v32, 9 }
 0x44f   : > { %v2010_v28 = vrot.slane %v2008_v52, 7  ;;  %v2062_v43 = vrot.slane %v2008_v52, 4  ;;  %v2063_v40 = vrot.slane %v2011_v56, 5  ;;  %2002 = vst [vmem:[#allocation2] sm:$0xe] %v1988_v48  ;;  %v5957_v26 = vpack.c.bf16 %v1967_v2, %v1967_v2 }
 0x450   : > { %v1954_v15 = vmul.f32 %v8152_v36, %v1940_v59  ;;  %v1956_v50 = vmul.f32 %v8152_v36, %v1942_v22  ;;  %v1989_v5 = vrot.slane %v1988_v48, 4  ;;  %v6895_v23 = vpop.eup %6894 }
 0x451   : > { %v2013_v1 = vor.u32 %v2011_v56, %v2010_v28  ;;  %v2064_v3 = vor.u32 %v2063_v40, %v2062_v43  ;;  %v1990_v62 = vrot.slane %v5957_v26, 7  ;;  %v2016_v12 = vshrl.u32 %v5957_v26, 16  ;;  %2059 = vst [vmem:[#allocation2 + $0x1c] sm:$0xf] %v5957_v26 }
 0x452   : > { %v2019_v46 = vshll.u32 %v5957_v26, 16  ;;  %v2096_v57 = vrot.slane %v5957_v26, 5  ;;  %v1968_v55 = vadd.f32 %v8158_v19, %v1954_v15  ;;  %v1970_v0 = vadd.f32 %v8158_v19, %v1956_v50  ;;  %v6897_v26 = vpop.eup %6896 }
 0x453   : > { %v2046_v35 = vsel %vm7849_vm6, %v2013_v1, %v2045_v24  ;;  %v2065_v54 = vrot.slane %v2064_v3, 4  ;;  %v2014_v10 = vrot.slane %v2010_v28, 4  ;;  %v1991_v8 = vsel %vm7900_vm12, %v1989_v5, %v1990_v62 }
 0x454   : > { %2047 = vst [vmem:[#allocation2 + $0x4] sm:$0xf] %v2046_v35  ;;  %v2018_v16 = vrot.slane %v2016_v12, 7  ;;  %v2066_v18 = vrot.slane %v2019_v46, 5  ;;  %v1992_v29 = vrot.slane %v1990_v62, 4  ;;  %v2068_v21 = vrot.slane %v2016_v12, 4  ;;  %v6899_v5 = vpop.eup %6898 }
 0x455   : > { %v2097_v37 = vsel %vm7934_vm13, %v5773_v6, %v2096_v57  ;;  %2003 = vst [vmem:[#allocation2 + $0x14] sm:$0xf] %v1991_v8  ;;  %v5958_v49 = vpack.c.bf16 %v1968_v55, %v1968_v55  ;;  %v2098_v32 = vrot.slane %v2096_v57, 4  ;;  %v8179_v30 = vpack.c.bf16 %v1970_v0, %v1970_v0  ;;  %v6901_v24 = vpop.eup %6900 }
 0x456   : > { %v2021_v34 = vor.u32 %v2019_v46, %v2018_v16  ;;  %v2067_v13 = vsel %vm7889_vm11, %v2065_v54, %v2066_v18  ;;  %2109 = vst [vmem:[#allocation2 + $0x10] sm:$0xf] %v2097_v37  ;;  %v2069_v45 = vor.u32 %v2068_v21, %v2066_v18  ;;  %v1943_v40 = vmul.f32 %v6895_v23, %v8127_v38 }
 0x457   : > { %2085 = vst [vmem:[#allocation2 + $0xc] sm:$0xf] %v2067_v13  ;;  %v1993_v39 = vrot.slane %v5958_v49, 7  ;;  %v2025_v60 = vshrl.u32 %v5958_v49, 16  ;;  %v2028_v48 = vshll.u32 %v5958_v49, 16  ;;  %v2099_v56 = vrot.slane %v5958_v49, 5 }
 0x458   : > { %2060 = vst [vmem:[#allocation2 + $0x30] sm:$0xf] %v5958_v49  ;;  %v2022_v52 = vsel %vm7942_vm14, %v2014_v10, %v2021_v34  ;;  %v2124_v2 = vrot.slane %v8179_v30, 7  ;;  %v2144_v59 = vshrl.u32 %v8179_v30, 16  ;;  %2194 = vst [vmem:[#allocation2 + $0x58] sm:$0xf] %v8179_v30  ;;  %v1957_v0 = vmul.f32 %v8152_v36, %v1943_v40 }
 0x459   : > { %v2070_v22 = vrot.slane %v2069_v45, 4  ;;  %2048 = vst [vmem:[#allocation2 + $0x18] sm:$0xf] %v2022_v52  ;;  %v1994_v28 = vsel %vm7900_vm12, %v1992_v29, %v1993_v39  ;;  %v8188_v43 = vrot.slane %v2025_v60, 7  ;;  %v2071_v15 = vrot.slane %v2028_v48, 5 }
 0x45a   : > { %v2100_v50 = vsel %vm7934_vm13, %v2098_v32, %v2099_v56  ;;  %2004 = vst [vmem:[#allocation2 + $0x28] sm:$0xf] %v1994_v28  ;;  %2138 = vst [vmem:[#allocation2 + $0x50] sm:$0xe] %v2124_v2  ;;  %v2023_v1 = vrot.slane %v2018_v16, 4  ;;  %v8194_v6 = vrot.slane %v2144_v59, 7  ;;  %v1941_v18 = vmul.f32 %v6897_v26, %v8130_v42 }
 0x45b   : > { %v2030_v3 = vor.u32 %v2028_v48, %v8188_v43  ;;  %2110 = vst [vmem:[#allocation2 + $0x24] sm:$0xf] %v2100_v50  ;;  %v2072_v62 = vsel %vm7889_vm11, %v2070_v22, %v2071_v15  ;;  %v2073_v12 = vrot.slane %v2025_v60, 4  ;;  %v2147_v38 = vshll.u32 %v8179_v30, 16  ;;  %v2051_v57 = vld [vmem:[#allocation2 + $0x4] sm:$0x1] }
 0x45c   : > { %v2198_v46 = vrot.slane %v2144_v59, 4  ;;  %v1995_v35 = vrot.slane %v1993_v39, 4  ;;  %v8201_v55 = vrot.slane %v2099_v56, 4  ;;  %2086 = vst [vmem:[#allocation2 + $0x20] sm:$0xf] %v2072_v62  ;;  %v2032_v10 = vrot.slane %v8188_v43, 4 }
 0x45d   : > { %v2031_v54 = vsel %vm7942_vm14, %v2023_v1, %v2030_v3  ;;  %v2149_v8 = vor.u32 %v2147_v38, %v8194_v6  ;;  %v2199_v16 = vrot.slane %v2147_v38, 5  ;;  %v2181_v29 = vld [vmem:[#allocation2 + $0x54] sm:$0xf]  ;;  %v1971_v21 = vadd.f32 %v8158_v19, %v1957_v0  ;;  %v6773_v50 = vld [vmem:[#allocation2 + $0x8] ss:$20 sps:$4 sm:$0xff]  }
 0x45e   : > { %2049 = vst [vmem:[#allocation2 + $0x2c] sm:$0xf] %v2031_v54  ;;  %v1945_v37 = vmul.f32 %v6899_v5, %v8137_v44  ;;  %v1944_v49 = vmul.f32 %v6901_v24, %v8140_v61  ;;  %v2052_v23 = vsel %vm8005_vm0, 0, %v2051_v57  ;;  %v2074_v34 = vor.u32 %v2073_v12, %v2071_v15  ;;  %v6777_v54 = vld [vmem:[#allocation2] ss:$20 sps:$4 sm:$0xff]  }
 0x45f   : > { %v2182_v13 = vsel %vm7849_vm6, %v2149_v8, %v2181_v29  ;;  %v2200_v32 = vor.u32 %v2199_v16, %v2198_v46  ;;  %v1955_v45 = vmul.f32 %v8152_v36, %v1941_v18  ;;  %2053 = vst [vmem:[#allocation2 + $0x4] sm:$0x1] %v2052_v23  ;;  %v2125_v39 = vrot.slane %v2124_v2, 4 }
 0x460   : > { %2183 = vst [vmem:[#allocation2 + $0x54] sm:$0xf] %v2182_v13  ;;  %v5961_v42 = vpack.c.bf16 %v1971_v21, %v1971_v21  ;;  %v1959_v60 = vmul.f32 %v8152_v36, %v1945_v37  ;;  %v1958_v44 = vmul.f32 %v8152_v36, %v1944_v49  ;;  %v2150_v61 = vrot.slane %v8194_v6, 4 }
 0x461   : > { %v2201_v48 = vrot.slane %v2200_v32, 4  ;;  %v5778_v52 = vrot.slane %v8179_v30, 9  ;;  %v1969_v56 = vadd.f32 %v8158_v19, %v1955_v45  ;;  %v2075_v40 = vrot.slane %v2074_v34, 4  ;;  %v6783_v34 = vld [vmem:[#allocation10 + $0x270] sm:$0xff]  }
 0x462   : > { %v2126_v41 = vrot.slane %v5961_v42, 7  ;;  %v2152_v59 = vshrl.u32 %v5961_v42, 16  ;;  %v2155_v22 = vshll.u32 %v5961_v42, 16  ;;  %2195 = vst [vmem:[#allocation2 + $0x6c] sm:$0xf] %v5961_v42  ;;  %v2232_v28 = vrot.slane %v5961_v42, 5 }
 0x463   : > { %v5959_v2 = vpack.c.bf16 %v1969_v56, %v1969_v56  ;;  %v1973_v26 = vadd.f32 %v8158_v19, %v1959_v60  ;;  %v1972_v15 = vadd.f32 %v8158_v19, %v1958_v44  ;;  %v6775_v36 = vld [vmem:[#allocation2 + $0xc] ss:$20 sps:$4 sm:$0xff]  }
 0x464   : > { %v2127_v5 = vsel %vm7900_vm12, %v2125_v39, %v2126_v41  ;;  %v8224_v1 = vrot.slane %v2126_v41, 4  ;;  %v8226_v30 = vrot.slane %v2152_v59, 7  ;;  %v2202_v3 = vrot.slane %v2155_v22, 5  ;;  %2804 = vmatprep.mubr.bf16.mxu0 %v6775_v36 }
 0x465   : > { %v2204_v6 = vrot.slane %v2152_v59, 4  ;;  %v2233_v24 = vsel %vm7934_vm13, %v5778_v52, %v2232_v28  ;;  %v8230_v62 = vrot.slane %v2232_v28, 4  ;;  %2139 = vst [vmem:[#allocation2 + $0x64] sm:$0xf] %v2127_v5  ;;  %v1996_v12 = vrot.slane %v5959_v2, 7  ;;  %2805 = vmatmul.mubr.bf16.vlgmr.msra.gmra.mxu0 %v6773_v50  ;;  %v6785_v28 = vld [vmem:[#allocation10 + $0x268] sm:$0xff]  }
 0x466   : > { %2061 = vst [vmem:[#allocation2 + $0x44] sm:$0xf] %v5959_v2  ;;  %v2157_v19 = vor.u32 %v2155_v22, %v8226_v30  ;;  %v2159_v38 = vrot.slane %v8226_v30, 4  ;;  %v2203_v46 = vsel %vm7889_vm11, %v2201_v48, %v2202_v3  ;;  %2245 = vst [vmem:[#allocation2 + $0x60] sm:$0xf] %v2233_v24  ;;  %v2034_v57 = vshrl.u32 %v5959_v2, 16 }
 0x467   : > { %v2205_v0 = vor.u32 %v2204_v6, %v2202_v3  ;;  %2221 = vst [vmem:[#allocation2 + $0x5c] sm:$0xf] %v2203_v46  ;;  %v1997_v8 = vsel %vm7900_vm12, %v1995_v35, %v1996_v12  ;;  %v2037_v16 = vshll.u32 %v5959_v2, 16  ;;  %v2102_v18 = vrot.slane %v5959_v2, 5  ;;  %v6779_v29 = vld [vmem:[#allocation2 + $0x4] ss:$20 sps:$4 sm:$0xff]  }
 0x468   : > { %v2158_v21 = vsel %vm7942_vm14, %v2150_v61, %v2157_v19  ;;  %v2036_v37 = vrot.slane %v2034_v57, 7  ;;  %v2078_v49 = vrot.slane %v2034_v57, 4  ;;  %2005 = vst [vmem:[#allocation2 + $0x3c] sm:$0xf] %v1997_v8  ;;  %v8240_v23 = vpack.c.bf16 %v1973_v26, %v1973_v26  ;;  %2739 = vmatprep.mubr.bf16.mxu1 %v6779_v29  ;;  %v2187_v12 = vld [vmem:[#allocation2 + $0x54] sm:$0x1] }
 0x469   : > { %v8242_v13 = vrot.slane %v2205_v0, 4  ;;  %2184 = vst [vmem:[#allocation2 + $0x68] sm:$0xf] %v2158_v21  ;;  %v2076_v32 = vrot.slane %v2037_v16, 5  ;;  %v2103_v35 = vsel %vm7934_vm13, %v8201_v55, %v2102_v18  ;;  %v2104_v45 = vrot.slane %v2102_v18, 4  ;;  %2740 = vmatmul.mubr.bf16.vlgmr.msra.gmra.mxu1 %v6777_v54  ;;  %v6788_v0 = vld [vmem:[#allocation10 + $0x260] sm:$0xff]  }
 0x46a   : > { %v2039_v39 = vor.u32 %v2037_v16, %v2036_v37  ;;  %2111 = vst [vmem:[#allocation2 + $0x38] sm:$0xf] %v2103_v35  ;;  %v2132_v42 = vrot.slane %v8240_v23, 7  ;;  %v2170_v60 = vshrl.u32 %v8240_v23, 16  ;;  %v2173_v44 = vshll.u32 %v8240_v23, 16  ;;  %6286 = vmatpush3.bf16.msra.mxu1 %v8146_v33  ;;  %v6795_v30 = vld [vmem:[#allocation10 + $0x258] sm:$0xff]  }
 0x46b   : > { %2197 = vst [vmem:[#allocation2 + $0x94] sm:$0xf] %v8240_v23  ;;  %v2077_v61 = vsel %vm7889_vm11, %v2075_v40, %v2076_v32  ;;  %v2079_v48 = vor.u32 %v2078_v49, %v2076_v32  ;;  %2112 = vst [vmem:[#allocation2 + $0x4c] sm:$0x7] %v2104_v45  ;;  %v2238_v55 = vrot.slane %v8240_v23, 5  ;;  %v5962_v52 = vpack.c.bf16 %v1972_v15, %v1972_v15  ;;  %v6803_v45 = vld [vmem:[#allocation10 + $0x248] sm:$0xff]  }
 0x46c   : > { %v2040_v56 = vsel %vm7942_vm14, %v2032_v10, %v2039_v39  ;;  %2087 = vst [vmem:[#allocation2 + $0x34] sm:$0xf] %v2077_v61  ;;  %v2172_v41 = vrot.slane %v2170_v60, 7  ;;  %v2212_v59 = vrot.slane %v2173_v44, 5  ;;  %v2214_v22 = vrot.slane %v2170_v60, 4  ;;  %6287 = vmatprep.subr.bf16.mxu1 %v6783_v34 }
 0x46d   : > { %v2080_v2 = vrot.slane %v2079_v48, 4  ;;  %2050 = vst [vmem:[#allocation2 + $0x40] sm:$0xf] %v2040_v56  ;;  %v2240_v40 = vrot.slane %v2238_v55, 4  ;;  %v2129_v26 = vrot.slane %v5962_v52, 7  ;;  %v2161_v50 = vshrl.u32 %v5962_v52, 16 }
 0x46e   : > { %2196 = vst [vmem:[#allocation2 + $0x80] sm:$0xf] %v5962_v52  ;;  %v2088_v15 = vld [vmem:[#allocation2 + $0x48] sm:$0xf]  ;;  %v2175_v36 = vor.u32 %v2173_v44, %v2172_v41  ;;  %v2215_v33 = vor.u32 %v2214_v22, %v2212_v59  ;;  %v2164_v5 = vshll.u32 %v5962_v52, 16  ;;  %v2235_v43 = vrot.slane %v5962_v52, 5  ;;  %6288 = vmatpush3.bf16.msra.mxu1 %v6783_v34 }
 0x46f   : > { %v2089_v10 = vsel %vm7955_vm3, %v2080_v2, %v2088_v15  ;;  %2248 = vst [vmem:[#allocation2 + $0x9c] sm:$0x7] %v2240_v40  ;;  %v2130_v3 = vsel %vm7900_vm12, %v8224_v1, %v2129_v26  ;;  %v2131_v6 = vrot.slane %v2129_v26, 4  ;;  %v2163_v24 = vrot.slane %v2161_v50, 7  ;;  %6289 = vmatprep.subr.bf16.mxu1 %v6785_v28  ;;  %v2224_v8 = vld [vmem:[#allocation2 + $0x98] sm:$0xf] }
 0x470   : > { %2090 = vst [vmem:[#allocation2 + $0x48] sm:$0xf] %v2089_v10  ;;  %v2216_v19 = vrot.slane %v2215_v33, 4  ;;  %v2207_v46 = vrot.slane %v2164_v5, 5  ;;  %v2209_v57 = vrot.slane %v2161_v50, 4  ;;  %v2236_v54 = vsel %vm7934_vm13, %v8230_v62, %v2235_v43  ;;  %v6805_v48 = vld [vmem:[#allocation10 + $0x240] sm:$0xff]  }
 0x471   : > { %2140 = vst [vmem:[#allocation2 + $0x78] sm:$0xf] %v2130_v3  ;;  %v2133_v16 = vsel %vm7900_vm12, %v2131_v6, %v2132_v42  ;;  %v2166_v1 = vor.u32 %v2164_v5, %v2163_v24  ;;  %v2168_v18 = vrot.slane %v2163_v24, 4  ;;  %v2237_v29 = vrot.slane %v2235_v43, 4  ;;  %2246 = vst [vmem:[#allocation2 + $0x74] sm:$0xf] %v2236_v54 }
 0x472   : > { %v2225_v21 = vsel %vm7955_vm3, %v2216_v19, %v2224_v8  ;;  %v2208_v37 = vsel %vm7889_vm11, %v8242_v13, %v2207_v46  ;;  %v2210_v49 = vor.u32 %v2209_v57, %v2207_v46  ;;  %2141 = vst [vmem:[#allocation2 + $0x8c] sm:$0xf] %v2133_v16  ;;  %v2188_v62 = vsel %vm8005_vm0, 0, %v2187_v12  ;;  %6290 = vmatpush3.bf16.msra.mxu1 %v6785_v28  ;;  %v6784_v13 = vld [vmem:[#allocation2 + $0x28] ss:$20 sps:$4 sm:$0xff]  }
 0x473   : > { %2226 = vst [vmem:[#allocation2 + $0x98] sm:$0xf] %v2225_v21  ;;  %v2167_v27 = vsel %vm7942_vm14, %v2159_v38, %v2166_v1  ;;  %v2239_v23 = vsel %vm7934_vm13, %v2237_v29, %v2238_v55  ;;  %2222 = vst [vmem:[#allocation2 + $0x70] sm:$0xf] %v2208_v37  ;;  %v2176_v53 = vsel %vm7942_vm14, %v2168_v18, %v2175_v36  ;;  %6291 = vmatprep.subr.bf16.mxu1 %v6788_v0  ;;  %v6794_v39 = vld [vmem:[#allocation2 + $0x50] ss:$20 sps:$4 sm:$0xff]  }
 0x474   : > { %2189 = vst [vmem:[#allocation2 + $0x54] sm:$0x1] %v2188_v62  ;;  %v2211_v34 = vrot.slane %v2210_v49, 4  ;;  %2185 = vst [vmem:[#allocation2 + $0x7c] sm:$0xf] %v2167_v27  ;;  %v9160_v2 = vmov 0  }
 0x475   : > { %2247 = vst [vmem:[#allocation2 + $0x88] sm:$0xf] %v2239_v23  ;;  %v6781_v63 = vld [vmem:[#allocation2 + $0x2c] ss:$20 sps:$4 sm:$0xff]   ;;  %2186 = vst [vmem:[#allocation2 + $0x90] sm:$0xf] %v2176_v53 }
 0x476   : > { %2747 = vmatprep.mubr.bf16.mxu1 %v6781_v63  ;;  %v2213_v38 = vsel %vm7889_vm11, %v2211_v34, %v2212_v59  ;;  %6292 = vmatpush3.bf16.msra.mxu1 %v6788_v0  ;;  %v6791_v61 = vld [vmem:[#allocation2 + $0x30] ss:$20 sps:$4 sm:$0xff]   ;;  %v6799_v9 = vld [vmem:[#allocation2 + $0x58] ss:$20 sps:$4 sm:$0xff]   ;;  %v6806_v28 = vld [vmem:[#allocation2 + $0x80] ss:$20 sps:$4 sm:$0xff]  }
 0x477   : > { %2748 = vmatmul.mubr.bf16.gmra.mxu1 %v6784_v13  ;;  %v2091_v25 = vld [vmem:[#allocation2 + $0x48] sm:$0x8]  ;;  %2223 = vst [vmem:[#allocation2 + $0x84] sm:$0xf] %v2213_v38  ;;  %6293 = vmatprep.subr.bf16.mxu1 %v6795_v30  ;;  %v6804_v56 = vld [vmem:[#allocation2 + $0x10] ss:$20 sps:$4 sm:$0xff]  }
 0x478   : > { %v2092_v32 = vsel %vm8015_vm2, 0, %v2091_v25  ;;  %v6807_v59 = vld [vmem:[#allocation2 + $0x38] ss:$20 sps:$4 sm:$0xff]   ;;  %v6808_v22 = vld [vmem:[#allocation2 + $0x60] ss:$20 sps:$4 sm:$0xff]  }
 0x479   : > { %2093 = vst [vmem:[#allocation2 + $0x48] sm:$0x8] %v2092_v32  ;;  %v6802_v52 = vld [vmem:[#allocation2 + $0x78] ss:$20 sps:$4 sm:$0xff]   ;;  %v5780_v54 = vld [vmem:[%s9062_s6 + $0x1] ss:$0 sm:$0xff] }
 0x47a   : > { %6294 = vmatpush3.bf16.msra.mxu1 %v6795_v30  ;;  %v2227_v42 = vld [vmem:[#allocation2 + $0x98] sm:$0x8]  ;;  %v6792_v55 = vld [vmem:[#allocation2 + $0x5c] ss:$20 sps:$4 sm:$0xff]  }
 0x47b   : > { %v6786_v35 = vld [vmem:[#allocation2 + $0x54] ss:$20 sps:$4 sm:$0xff]   ;;  %6295 = vmatprep.subr.bf16.mxu1 %v6798_v31  ;;  %v2228_v17 = vsel %vm8015_vm2, 0, %v2227_v42 }
 0x47c   : > { %2755 = vmatprep.mubr.bf16.mxu1 %v6786_v35  ;;  %v6796_v60 = vld [vmem:[#allocation2 + $0x7c] ss:$20 sps:$4 sm:$0xff]   ;;  %2229 = vst [vmem:[#allocation2 + $0x98] sm:$0x8] %v2228_v17 }
 0x47d   : > { %v6809_v40 = vld [vmem:[#allocation2 + $0x88] ss:$20 sps:$4 sm:$0xff]  }
 0x47e   : > { %6296 = vmatpush3.bf16.msra.mxu1 %v6798_v31 }
 0x47f   : > { %2756 = vmatmul.mubr.bf16.gmra.mxu1 %v6794_v39  ;;  %6297 = vmatprep.subr.bf16.mxu1 %v6803_v45 }
 0x480   : > { %v6789_v44 = vld [vmem:[#allocation2 + $0x34] ss:$20 sps:$4 sm:$0xff]   ;;  %2763 = vmatprep.mubr.bf16.mxu1 %v6796_v60 }
 0x481   : > { %2812 = vmatprep.mubr.bf16.mxu0 %v6789_v44 }
 0x482   : > { %2813 = vmatmul.mubr.bf16.gmra.mxu0 %v6791_v61  ;;  %6298 = vmatpush3.bf16.msra.mxu1 %v6803_v45 }
 0x483   : > { %2820 = vmatprep.mubr.bf16.mxu0 %v6792_v55  ;;  %6299 = vmatprep.subr.bf16.mxu1 %v6805_v48  ;;  %v6800_v41 = vld [vmem:[#allocation2 + $0x84] ss:$20 sps:$4 sm:$0xff]  }
 0x486   : > { %6300 = vmatpush3.bf16.msra.mxu1 %v6805_v48 }
 0x487   : > { %2764 = vmatmul.mubr.bf16.gmra.mxu1 %v6802_v52 }
 0x488   : > { %6301 = vmatprep.mubr.bf16.mxu1 %v6804_v56 }
 0x48a   : > { %2821 = vmatmul.mubr.bf16.gmra.mxu0 %v6799_v9 }
 0x48b   : > { %2828 = vmatprep.mubr.bf16.mxu0 %v6800_v41 }
 0x48f   : > { %6302 = vmatmul.mubr.bf16.vlgmr.msra.gmra.mxu1 %v6807_v59 }
 0x490   : > { %6305 = vmatprep.mubr.bf16.mxu1 %v6808_v22 }
 0x492   : > { %2829 = vmatmul.mubr.bf16.gmra.mxu0 %v6806_v28 }
 0x493   : > { %3249 = vmatprep.mubr.bf16.mxu0 %v9160_v2 }
 0x497   : > { %6306 = vmatmul.mubr.bf16.gmra.mxu1 %v6809_v40 }
 0x525   : > { %v6113_v33 = vpop.f32.mrf.mxu0 }
 0x527   : > { %v6114_v43 = vpop.f32.mrf.mxu0 }
 0x528   : > { %v6115_v25 = vadd.f32 %v6114_v43, %v6113_v33 }
 0x529   : > { %v6073_v26 = vpop.f32.mrf.mxu1  ;;  %v6116_v6 = vpop.f32.mrf.mxu0 }
 0x52b   : > { %v6074_v50 = vpop.f32.mrf.mxu1  ;;  %v6117_v19 = vpop.f32.mrf.mxu0 }
 0x52c   : > { %v6075_v21 = vadd.f32 %v6074_v50, %v6073_v26  ;;  %v6118_v52 = vadd.f32 %v6117_v19, %v6116_v6 }
 0x52d   : > { %v6076_v15 = vpop.f32.mrf.mxu1 }
 0x52e   : > { %v2742_v34 = vadd.f32 %v6075_v21, %v5780_v54 }
 0x52f   : > { %v6077_v36 = vpop.f32.mrf.mxu1 }
 0x530   : > { %v6078_v13 = vadd.f32 %v6077_v36, %v6076_v15  ;;  %v2807_v60 = vadd.f32 %v6115_v25, %v2742_v34 }
 0x532   : > { %v2745_v17 = vadd.f32 %v6078_v13, %v5780_v54 }
 0x534   : > { %v2810_v40 = vadd.f32 %v6118_v52, %v2745_v17 }
 0x537   : > { %v6079_v5 = vpop.f32.mrf.mxu1 }
 0x539   : > { %v6080_v10 = vpop.f32.mrf.mxu1 }
 0x53a   : > { %v6081_v23 = vadd.f32 %v6080_v10, %v6079_v5 }
 0x53b   : > { %v6082_v3 = vpop.f32.mrf.mxu1 }
 0x53c   : > { %v2750_v35 = vadd.f32 %v6081_v23, %v5780_v54 }
 0x53d   : > { %v6083_v24 = vpop.f32.mrf.mxu1 }
 0x53e   : > { %v6084_v45 = vadd.f32 %v6083_v24, %v6082_v3  ;;  %v6812_v24 = vld [vmem:[#allocation11 + $0xac] ss:$12 sps:$4 sm:$0xff]  }
 0x53f   : > { %v6085_v12 = vpop.f32.mrf.mxu1  ;;  %3217 = vmatprep.subr.bf16.mxu0 %v6812_v24  ;;  %v6828_v24 = vld [vmem:[#allocation11 + $0x68] ss:$12 sps:$4 sm:$0xff]  }
 0x540   : > { %v2753_v56 = vadd.f32 %v6084_v45, %v5780_v54 }
 0x541   : > { %v6086_v46 = vpop.f32.mrf.mxu1 }
 0x542   : > { %v6087_v57 = vadd.f32 %v6086_v46, %v6085_v12  ;;  %v6119_v0 = vpop.f32.mrf.mxu0 }
 0x543   : > { %v6088_v8 = vpop.f32.mrf.mxu1 }
 0x544   : > { %v8294_v16 = vadd.f32 %v6087_v57, %v5780_v54  ;;  %v6120_v1 = vpop.f32.mrf.mxu0 }
 0x545   : > { %v6089_v18 = vpop.f32.mrf.mxu1  ;;  %v6121_v30 = vadd.f32 %v6120_v1, %v6119_v0 }
 0x546   : > { %v6090_v29 = vadd.f32 %v6089_v18, %v6088_v8  ;;  %v6122_v62 = vpop.f32.mrf.mxu0 }
 0x547   : > { %v6091_v37 = vpop.f32.mrf.mxu1  ;;  %v2815_v48 = vadd.f32 %v6121_v30, %v2750_v35 }
 0x548   : > { %v8296_v49 = vadd.f32 %v6090_v29, %v5780_v54  ;;  %v6123_v32 = vpop.f32.mrf.mxu0 }
 0x549   : > { %v6092_v27 = vpop.f32.mrf.mxu1  ;;  %v6124_v44 = vadd.f32 %v6123_v32, %v6122_v62 }
 0x54a   : > { %v6093_v53 = vadd.f32 %v6092_v27, %v6091_v37  ;;  %v6125_v12 = vpop.f32.mrf.mxu0 }
 0x54b   : > { %v6094_v63 = vpop.f32.mrf.mxu1  ;;  %v2818_v28 = vadd.f32 %v6124_v44, %v2753_v56 }
 0x54c   : > { %v8298_v38 = vadd.f32 %v6093_v53, %v5780_v54 }
 0x54d   : > { %v6095_v31 = vpop.f32.mrf.mxu1 }
 0x54e   : > { %v6096_v39 = vadd.f32 %v6095_v31, %v6094_v63 }
 0x54f   : > { %v6303_v42 = vpop.f32.mrf.mxu1 }
 0x550   : > { %v8300_v61 = vadd.f32 %v6096_v39, %v5780_v54  ;;  %v2880_v9 = vadd.f32 %v6303_v42, %v2815_v48 }
 0x551   : > { %v2871_v55 = vpop.f32.mrf.mxu1 }
 0x552   : > { %v2872_v41 = vadd.f32 %v2871_v55, %v2807_v60  ;;  %v2904_v50 = vmax.f32 %v2880_v9, 0.0 }
 0x553   : > { %v6304_v59 = vpop.f32.mrf.mxu1 }
 0x554   : > { %v2902_v22 = vmax.f32 %v2872_v41, 0.0  ;;  %v2883_v36 = vadd.f32 %v6304_v59, %v2818_v28  ;;  %v8307_v43 = vadd.f32 %v2904_v50, %v8083_v20  ;;  %v6126_v20 = vpop.f32.mrf.mxu0  ;;  %v6816_v50 = vld [vmem:[#allocation11 + $0xb0] ss:$12 sps:$4 sm:$0xff]  }
 0x555   : > { %v2874_v26 = vpop.f32.mrf.mxu1  ;;  %v6127_v0 = vadd.f32 %v6126_v20, %v6125_v12  ;;  %6309 = vmatprep.subr.bf16.mxu1 %v6816_v50  ;;  %v6825_v12 = vld [vmem:[#allocation11 + $0x48] ss:$12 sps:$4 sm:$0xff]  }
 0x556   : > { %v8303_v15 = vadd.f32 %v2902_v22, %v8075_v47  ;;  %v2875_v33 = vadd.f32 %v2874_v26, %v2810_v40  ;;  %v2905_v10 = vmax.f32 %v2883_v36, 0.0  ;;  %v6810_v47 = vld [vmem:[#allocation11 + $0xa8] ss:$12 sps:$4 sm:$0xff]   ;;  %v6128_v19 = vpop.f32.mrf.mxu0  ;;  %v6813_v36 = vld [vmem:[#allocation11 + $0x90] ss:$12 sps:$4 sm:$0xff]   ;;  %6310 = vmatpush3.bf16.msra.mxu1 %v6816_v50 }
 0x557   : > { %3218 = vmatpush1.bf16.msra.mxu0 %v6810_v47  ;;  %v2823_v21 = vadd.f32 %v6127_v0, %v8294_v16  ;;  %v6815_v26 = vld [vmem:[#allocation11 + $0x94] ss:$12 sps:$4 sm:$0xff]   ;;  %v6827_v47 = vld [vmem:[#allocation11 + $0x4c] ss:$12 sps:$4 sm:$0xff]   ;;  %v6839_v0 = vld [vmem:[#allocation11 + $0x4] ss:$12 sps:$4 sm:$0xff]  }
 0x558   : > { %v2903_v5 = vmax.f32 %v2875_v33, 0.0  ;;  %2920 = vadd.xlane.f32.xlu0 %v8303_v15  ;;  %v8315_v6 = vadd.f32 %v2905_v10, %v8091_v14  ;;  %v6129_v46 = vpop.f32.mrf.mxu0  ;;  %3219 = vmatprep.subr.bf16.mxu0 %v6815_v26  ;;  %v6820_v33 = vld [vmem:[#allocation11 + $0x98] ss:$12 sps:$4 sm:$0xff]   ;;  %v6824_v10 = vld [vmem:[#allocation11 + $0x80] ss:$12 sps:$4 sm:$0xff]  }
 0x559   : > { %v6130_v62 = vadd.f32 %v6129_v46, %v6128_v19  ;;  %6311 = vmatprep.subr.bf16.mxu1 %v6820_v33  ;;  %v6831_v20 = vld [vmem:[#allocation11 + $0x34] ss:$12 sps:$4 sm:$0xff]   ;;  %v6832_v19 = vld [vmem:[#allocation11 + $0x50] ss:$12 sps:$4 sm:$0xff]  }
 0x55a   : > { %v8310_v3 = vadd.f32 %v2903_v5, %v8079_v58  ;;  %v6131_v57 = vpop.f32.mrf.mxu0  ;;  %v6307_v58 = vpop.f32.mrf.mxu1  ;;  %6312 = vmatpush3.bf16.msra.mxu1 %v6820_v33  ;;  %v6823_v5 = vld [vmem:[#allocation11 + $0x64] ss:$12 sps:$4 sm:$0xff]   ;;  %v8378_v26 = vld [vmem:[%s9063_s7] ss:$0 sm:$0xff] }
 0x55b   : > { %v2826_v16 = vadd.f32 %v6130_v62, %v8296_v49  ;;  %3220 = vmatpush1.bf16.msra.mxu0 %v6813_v36  ;;  %6313 = vmatprep.subr.bf16.mxu1 %v6824_v10  ;;  %v6829_v46 = vld [vmem:[#allocation11 + $0x30] ss:$12 sps:$4 sm:$0xff]  }
 0x55c   : > { %2922 = vadd.xlane.f32.xlu1 %v8310_v3  ;;  %2924 = vadd.xlane.f32.xlu0 %v8307_v43  ;;  %v6132_v54 = vpop.f32.mrf.mxu0  ;;  %v2887_v8 = vpop.f32.mrf.mxu1 }
 0x55d   : > { %v6133_v14 = vadd.f32 %v6132_v54, %v6131_v57  ;;  %v2888_v53 = vadd.f32 %v2887_v8, %v2823_v21  ;;  %v6835_v57 = vld [vmem:[#allocation11 + $0x1c] ss:$12 sps:$4 sm:$0xff]   ;;  %v6833_v54 = vld [vmem:[#allocation11 + $0x18] ss:$12 sps:$4 sm:$0xff]   ;;  %v6840_v8 = vld [vmem:[#allocation11 + $0x20] ss:$12 sps:$4 sm:$0xff]  }
 0x55e   : > { %v6134_v1 = vpop.f32.mrf.mxu0  ;;  %v6308_v37 = vpop.f32.mrf.mxu1  ;;  %6314 = vmatpush3.bf16.msra.mxu1 %v6824_v10 }
 0x55f   : > { %v2831_v32 = vadd.f32 %v6133_v14, %v8298_v38  ;;  %v2906_v60 = vmax.f32 %v2888_v53, 0.0  ;;  %6315 = vmatprep.subr.bf16.mxu1 %v6828_v24 }
 0x560   : > { %2926 = vadd.xlane.f32.xlu1 %v8315_v6  ;;  %v6135_v27 = vpop.f32.mrf.mxu0  ;;  %v2890_v31 = vpop.f32.mrf.mxu1 }
 0x561   : > { %v6136_v35 = vadd.f32 %v6135_v27, %v6134_v1  ;;  %v2896_v42 = vadd.f32 %v6307_v58, %v2831_v32  ;;  %v2891_v44 = vadd.f32 %v2890_v31, %v2826_v16  ;;  %v8341_v9 = vadd.f32 %v2906_v60, %v8086_v51  ;;  %v6836_v58 = vld [vmem:[#allocation11 + $0x38] ss:$12 sps:$4 sm:$0xff]   ;;  %v6837_v1 = vld [vmem:[#allocation11] ss:$12 sps:$4 sm:$0xff]  }
 0x562   : > { %6316 = vmatpush3.bf16.msra.mxu1 %v6828_v24 }
 0x563   : > { %v2834_v49 = vadd.f32 %v6136_v35, %v8300_v61  ;;  %v2908_v56 = vmax.f32 %v2896_v42, 0.0  ;;  %v2907_v59 = vmax.f32 %v2891_v44, 0.0  ;;  %6317 = vmatprep.subr.bf16.mxu1 %v6832_v19 }
 0x565   : > { %v2899_v41 = vadd.f32 %v6308_v37, %v2834_v49  ;;  %v8347_v28 = vadd.f32 %v2908_v56, %v8099_v7  ;;  %v8350_v40 = vadd.f32 %v2907_v59, %v8094_v11  ;;  %v6819_v7 = vld [vmem:[#allocation11 + $0x7c] ss:$12 sps:$4 sm:$0xff]   ;;  %v6817_v11 = vld [vmem:[#allocation11 + $0x78] ss:$12 sps:$4 sm:$0xff]  }
 0x566   : > { %3221 = vmatprep.subr.bf16.mxu0 %v6819_v7  ;;  %6318 = vmatpush3.bf16.msra.mxu1 %v6832_v19 }
 0x567   : > { %v2909_v61 = vmax.f32 %v2899_v41, 0.0  ;;  %3222 = vmatpush1.bf16.msra.mxu0 %v6817_v11  ;;  %6319 = vmatprep.subr.bf16.mxu1 %v6836_v58 }
 0x568   : > { %3223 = vmatprep.subr.bf16.mxu0 %v6823_v5 }
 0x569   : > { %v8355_v51 = vadd.f32 %v2909_v61, %v8102_v4  ;;  %v6821_v4 = vld [vmem:[#allocation11 + $0x60] ss:$12 sps:$4 sm:$0xff]  }
 0x56a   : > { %6320 = vmatpush3.bf16.msra.mxu1 %v6836_v58 }
 0x56b   : > { %3224 = vmatpush1.bf16.msra.mxu0 %v6821_v4  ;;  %6321 = vmatprep.subr.bf16.mxu1 %v6840_v8 }
 0x56c   : > { %3225 = vmatprep.subr.bf16.mxu0 %v6827_v47 }
 0x56e   : > { %6322 = vmatpush3.bf16.msra.mxu1 %v6840_v8  ;;  %v7377_v8 = vmov 0.0  }
 0x56f   : > { %3226 = vmatpush1.bf16.msra.mxu0 %v6825_v12 }
 0x570   : > { %3227 = vmatprep.subr.bf16.mxu0 %v6831_v20 }
 0x573   : > { %3228 = vmatpush1.bf16.msra.mxu0 %v6829_v46 }
 0x574   : > { %3229 = vmatprep.subr.bf16.mxu0 %v6835_v57 }
 0x577   : > { %3230 = vmatpush1.bf16.msra.mxu0 %v6833_v54  ;;  %v5887_v54 = vld [vmem:[%s7718_s23 + $0x1] sm:$0x1] }
 0x578   : > { %3231 = vmatprep.subr.bf16.mxu0 %v6839_v0  ;;  %vm4137_vm4 = vcmp.eq.f32.partialorder %v5887_v54, 0.0 }
 0x57b   : > { %3232 = vmatpush1.bf16.msra.mxu0 %v6837_v1  ;;  %v4138_v1 = vsel %vm4137_vm4, -1e+30, %v7377_v8 }
 0x5e1   : > { %v2921_v18 = vpop.xlane.xlu0 %2920 }
 0x5e2   : > { %v2936_v29 = vmul.f32 0.0078125, %v2921_v18  ;;  %v6841_v18 = vld [vmem:[#allocation11 + $0x8] ss:$12 sps:$4 sm:$0xff]  }
 0x5e3   : > { %6323 = vmatprep.subr.bf16.mxu1 %v6841_v18 }
 0x5e4   : > { %v8320_v23 = vsub.f32 %v8303_v15, %v2936_v29  ;;  %6324 = vmatpush3.bf16.msra.mxu1 %v6841_v18 }
 0x5e5   : > { %v2923_v34 = vpop.xlane.xlu1 %2922  ;;  %v2925_v63 = vpop.xlane.xlu0 %2924 }
 0x5e6   : > { %v2937_v13 = vmul.f32 0.0078125, %v2923_v34  ;;  %v2938_v30 = vmul.f32 0.0078125, %v2925_v63  ;;  %v2952_v25 = vmul.f32 %v8320_v23, %v8320_v23 }
 0x5e8   : > { %2960 = vadd.xlane.f32.xlu0 %v2952_v25  ;;  %v8327_v45 = vsub.f32 %v8310_v3, %v2937_v13  ;;  %v8330_v39 = vsub.f32 %v8307_v43, %v2938_v30 }
 0x5e9   : > { %v2927_v17 = vpop.xlane.xlu1 %2926 }
 0x5ea   : > { %v2939_v48 = vmul.f32 0.0078125, %v2927_v17  ;;  %v2953_v55 = vmul.f32 %v8327_v45, %v8327_v45  ;;  %v2954_v38 = vmul.f32 %v8330_v39, %v8330_v39 }
 0x5ec   : > { %2962 = vadd.xlane.f32.xlu1 %v2953_v55  ;;  %2964 = vadd.xlane.f32.xlu0 %v2954_v38  ;;  %v8338_v52 = vsub.f32 %v8315_v6, %v2939_v48 }
 0x5ee   : > { %v2955_v22 = vmul.f32 %v8338_v52, %v8338_v52 }
 0x5f0   : > { %2966 = vadd.xlane.f32.xlu1 %v2955_v22  ;;  %2928 = vadd.xlane.f32.xlu0 %v8341_v9 }
 0x5f4   : > { %2930 = vadd.xlane.f32.xlu1 %v8350_v40  ;;  %2932 = vadd.xlane.f32.xlu0 %v8347_v28 }
 0x5f8   : > { %2934 = vadd.xlane.f32.xlu1 %v8355_v51 }
 0x671   : > { %v2961_v29 = vpop.xlane.xlu0 %2960 }
 0x672   : > { %v2976_v14 = vmul.f32 0.0078125, %v2961_v29 }
 0x674   : > { %v2984_v21 = vadd.f32 1e-05, %v2976_v14 }
 0x675   : > { %v2963_v37 = vpop.xlane.xlu1 %2962  ;;  %v2965_v62 = vpop.xlane.xlu0 %2964 }
 0x676   : > { %6902 = vrsqrt.f32 %v2984_v21  ;;  %v2977_v27 = vmul.f32 0.0078125, %v2963_v37  ;;  %v2978_v53 = vmul.f32 0.0078125, %v2965_v62 }
 0x678   : > { %v2985_v34 = vadd.f32 1e-05, %v2977_v27  ;;  %v2986_v63 = vadd.f32 1e-05, %v2978_v53 }
 0x679   : > { %v2967_v13 = vpop.xlane.xlu1 %2966  ;;  %v2929_v30 = vpop.xlane.xlu0 %2928 }
 0x67a   : > { %6904 = vrsqrt.f32 %v2985_v34  ;;  %v2979_v25 = vmul.f32 0.0078125, %v2967_v13  ;;  %v2940_v32 = vmul.f32 0.0078125, %v2929_v30 }
 0x67b   : > { %6906 = vrsqrt.f32 %v2986_v63 }
 0x67c   : > { %v2987_v31 = vadd.f32 1e-05, %v2979_v25  ;;  %v8359_v35 = vsub.f32 %v8341_v9, %v2940_v32 }
 0x67d   : > { %v2931_v16 = vpop.xlane.xlu1 %2930  ;;  %v2933_v42 = vpop.xlane.xlu0 %2932 }
 0x67e   : > { %6908 = vrsqrt.f32 %v2987_v31  ;;  %v2941_v60 = vmul.f32 0.0078125, %v2931_v16  ;;  %v2942_v17 = vmul.f32 0.0078125, %v2933_v42  ;;  %v2956_v44 = vmul.f32 %v8359_v35, %v8359_v35 }
 0x680   : > { %2968 = vadd.xlane.f32.xlu0 %v2956_v44  ;;  %v8364_v48 = vsub.f32 %v8350_v40, %v2941_v60  ;;  %v8367_v55 = vsub.f32 %v8347_v28, %v2942_v17 }
 0x681   : > { %v2935_v38 = vpop.xlane.xlu1 %2934 }
 0x682   : > { %v2943_v49 = vmul.f32 0.0078125, %v2935_v38  ;;  %v2957_v56 = vmul.f32 %v8364_v48, %v8364_v48  ;;  %v2958_v41 = vmul.f32 %v8367_v55, %v8367_v55 }
 0x683   : > { %v6903_v59 = vpop.eup %6902 }
 0x684   : > { %v3000_v22 = vmul.f32 %v6903_v59, %v8320_v23  ;;  %2970 = vadd.xlane.f32.xlu1 %v2957_v56  ;;  %2972 = vadd.xlane.f32.xlu0 %v2958_v41  ;;  %v2951_v61 = vsub.f32 %v8355_v51, %v2943_v49  ;;  %v5842_v23 = vld [vmem:[%s9064_s8] ss:$0 sm:$0xff] }
 0x686   : > { %v2959_v50 = vmul.f32 %v2951_v61, %v2951_v61  ;;  %v3014_v11 = vmul.f32 %v8378_v26, %v3000_v22 }
 0x687   : > { %v6905_v36 = vpop.eup %6904 }
 0x688   : > { %v6907_v7 = vpop.eup %6906  ;;  %v3001_v33 = vmul.f32 %v6905_v36, %v8327_v45  ;;  %2974 = vadd.xlane.f32.xlu1 %v2959_v50  ;;  %v3028_v24 = vadd.f32 %v5842_v23, %v3014_v11 }
 0x689   : > { %v3002_v5 = vmul.f32 %v6907_v7, %v8330_v39 }
 0x68a   : > { %v3015_v10 = vmul.f32 %v8378_v26, %v3001_v33 }
 0x68b   : > { %v6909_v4 = vpop.eup %6908  ;;  %v3016_v20 = vmul.f32 %v8378_v26, %v3002_v5 }
 0x68c   : > { %v3003_v47 = vmul.f32 %v6909_v4, %v8338_v52  ;;  %v3029_v12 = vadd.f32 %v5842_v23, %v3015_v10  ;;  %v3074_v52 = vlaneseq }
 0x68d   : > { %v3030_v39 = vadd.f32 %v5842_v23, %v3016_v20 }
 0x68e   : > { %v3036_v45 = vpack.c.bf16 %v3029_v12, %v3028_v24  ;;  %v3017_v19 = vmul.f32 %v8378_v26, %v3003_v47  ;;  %v8392_v58 = vshrl.u32 %v3074_v52, 7 }
 0x690   : > { %3250 = vmatmul.mubr.bf16.vlgmr.msra.gmra.mxu0 %v3036_v45  ;;  %6325 = vmatprep.mubr.bf16.mxu1 %v3036_v45  ;;  %v3031_v46 = vadd.f32 %v5842_v23, %v3017_v19  ;;  %v8396_v0 = vsub.s32 0, %v8392_v58  ;;  %v3080_v24 = vsub.s32 1, %v8392_v58 }
 0x691   : > { %3259 = vmatprep.mubr.bf16.mxu0 %v9160_v2 }
 0x692   : > { %v3037_v57 = vpack.c.bf16 %v3031_v46, %v3030_v39  ;;  %v8400_v18 = vrot.slane %v4138_v1, %v8396_v0 }
 0x694   : > { %6326 = vmatmul.mubr.bf16.vlgmr.msra.gmra.mxu1 %v3037_v57 }
 0x698   : > { %3260 = vmatmul.mubr.bf16.gmra.mxu0 %v3037_v57 }
 0x699   : > { %3269 = vmatprep.mubr.bf16.mxu0 %v9160_v2 }
 0x709   : > { %v2969_v29 = vpop.xlane.xlu0 %2968 }
 0x70a   : > { %v2980_v14 = vmul.f32 0.0078125, %v2969_v29 }
 0x70c   : > { %v2988_v21 = vadd.f32 1e-05, %v2980_v14  ;;  %v3084_v14 = vsub.s32 2, %v8392_v58 }
 0x70d   : > { %v2971_v37 = vpop.xlane.xlu1 %2970  ;;  %v2973_v62 = vpop.xlane.xlu0 %2972 }
 0x70e   : > { %6910 = vrsqrt.f32 %v2988_v21  ;;  %v2981_v27 = vmul.f32 0.0078125, %v2971_v37  ;;  %v2982_v53 = vmul.f32 0.0078125, %v2973_v62 }
 0x710   : > { %v2989_v34 = vadd.f32 1e-05, %v2981_v27  ;;  %v2990_v63 = vadd.f32 1e-05, %v2982_v53 }
 0x711   : > { %v2975_v13 = vpop.xlane.xlu1 %2974 }
 0x712   : > { %6912 = vrsqrt.f32 %v2989_v34  ;;  %v2983_v30 = vmul.f32 0.0078125, %v2975_v13 }
 0x713   : > { %6914 = vrsqrt.f32 %v2990_v63 }
 0x714   : > { %v2991_v25 = vadd.f32 1e-05, %v2983_v30 }
 0x716   : > { %6916 = vrsqrt.f32 %v2991_v25 }
 0x71b   : > { %v6911_v32 = vpop.eup %6910 }
 0x71c   : > { %v3004_v31 = vmul.f32 %v6911_v32, %v8359_v35 }
 0x71e   : > { %v3018_v17 = vmul.f32 %v8378_v26, %v3004_v31 }
 0x71f   : > { %v6913_v16 = vpop.eup %6912 }
 0x720   : > { %v6915_v42 = vpop.eup %6914  ;;  %v3005_v60 = vmul.f32 %v6913_v16, %v8364_v48  ;;  %v3032_v56 = vadd.f32 %v5842_v23, %v3018_v17 }
 0x721   : > { %v3006_v44 = vmul.f32 %v6915_v42, %v8367_v55  ;;  %v3072_v55 = vld [vmem:[%s9066_s10] sm:$0x7] }
 0x722   : > { %v3019_v38 = vmul.f32 %v8378_v26, %v3005_v60  ;;  %v8423_v39 = vrot.slane %v3072_v55, %v3080_v24  ;;  %v3085_v53 = vrot.slane %v3072_v55, %v3084_v14 }
 0x723   : > { %v6917_v49 = vpop.eup %6916  ;;  %v3020_v22 = vmul.f32 %v8378_v26, %v3006_v44 }
 0x724   : > { %v3033_v41 = vadd.f32 %v5842_v23, %v3019_v38  ;;  %v3007_v59 = vmul.f32 %v6917_v49, %v2951_v61  ;;  %v8414_v61 = vrot.slane %v3072_v55, %v8396_v0 }
 0x725   : > { %v3034_v35 = vadd.f32 %v5842_v23, %v3020_v22 }
 0x726   : > { %v3038_v50 = vpack.c.bf16 %v3033_v41, %v3032_v56  ;;  %v3021_v36 = vmul.f32 %v8378_v26, %v3007_v59 }
 0x728   : > { %3270 = vmatmul.mubr.bf16.gmra.mxu0 %v3038_v50  ;;  %6329 = vmatprep.mubr.bf16.mxu1 %v3038_v50  ;;  %v3035_v7 = vadd.f32 %v5842_v23, %v3021_v36 }
 0x729   : > { %3279 = vmatprep.mubr.bf16.mxu0 %v9160_v2 }
 0x72a   : > { %v3039_v48 = vpack.c.bf16 %v3035_v7, %v3034_v35 }
 0x72c   : > { %6330 = vmatmul.mubr.bf16.gmra.mxu1 %v3039_v48 }
 0x730   : > { %3280 = vmatmul.mubr.bf16.gmra.mxu0 %v3039_v48 }
 0x750   : > { %v3251_v33 = vpop.f32.mrf.mxu0 }
 0x751   : > { %v3252_v26 = vadd.f32 %v3251_v33, %v8414_v61 }
 0x752   : > { %v3253_v11 = vpop.f32.mrf.mxu0 }
 0x753   : > { %v3355_v4 = vmul.f32 0.17677669, %v3252_v26  ;;  %v3254_v29 = vadd.f32 %v3253_v11, %v8423_v39 }
 0x754   : > { %v3255_v5 = vpop.f32.mrf.mxu0  ;;  %v6327_v45 = vpop.f32.mrf.mxu1 }
 0x755   : > { %v3256_v10 = vadd.f32 %v3255_v5, %v8414_v61  ;;  %v3333_v63 = vadd.f32 %v6327_v45, %v3085_v53 }
 0x756   : > { %v3257_v23 = vpop.f32.mrf.mxu0  ;;  %v3324_v1 = vpop.f32.mrf.mxu1 }
 0x757   : > { %v3356_v2 = vmul.f32 0.17677669, %v3256_v10  ;;  %v3258_v57 = vadd.f32 %v3257_v23, %v8423_v39  ;;  %v3325_v60 = vadd.f32 %v3324_v1, %v3085_v53 }
 0x758   : > { %v3261_v47 = vpop.f32.mrf.mxu0  ;;  %v6328_v27 = vpop.f32.mrf.mxu1 }
 0x759   : > { %v8419_v12 = vpack.c.bf16 %v3356_v2, %v3355_v4  ;;  %v8432_v37 = vpack.c.bf16 %v3258_v57, %v3254_v29  ;;  %v3336_v34 = vadd.f32 %v6328_v27, %v3085_v53  ;;  %v3262_v13 = vadd.f32 %v3261_v47, %v8414_v61  ;;  %v3359_v29 = vld [vmem:[%s7718_s23] sm:$0x1]  ;;  %s7378_s23 = smov 96  }
 0x75a   : > { %v3263_v20 = vpop.f32.mrf.mxu0  ;;  %v3327_v32 = vpop.f32.mrf.mxu1  ;;  %vm3360_vm6 = vcmp.eq.f32.partialorder %v3359_v29, 0.0 }
 0x75b   : > { %6337 = vmatprep.mubr.msk.bf16.mxu1 %vm3374_vm5, %v8419_v12  ;;  %v3264_v52 = vadd.f32 %v3263_v20, %v8423_v39  ;;  %v8442_v30 = vpack.c.bf16 %v3336_v34, %v3333_v63  ;;  %v3382_v25 = vsel %vm3374_vm5, %v8432_v37, 0  ;;  %v3357_v16 = vmul.f32 0.17677669, %v3262_v13 }
 0x75c   : > { %v3265_v19 = vpop.f32.mrf.mxu0  ;;  %v3328_v42 = vadd.f32 %v3327_v32, %v3085_v53  ;;  %v3361_v14 = vsel %vm3360_vm6, -1e+30, %v7377_v8 }
 0x75d   : > { %v3266_v58 = vadd.f32 %v3265_v19, %v8414_v61  ;;  %v8477_v27 = vrot.slane %v3361_v14, %v8396_v0 }
 0x75e   : > { %v3267_v46 = vpop.f32.mrf.mxu0  ;;  %v8449_v44 = vpack.c.bf16 %v3328_v42, %v3325_v60 }
 0x75f   : > { %v3268_v54 = vadd.f32 %v3267_v46, %v8423_v39  ;;  %v3358_v31 = vmul.f32 0.17677669, %v3266_v58 }
 0x761   : > { %v8430_v21 = vpack.c.bf16 %v3268_v54, %v3264_v52  ;;  %v8447_v17 = vpack.c.bf16 %v3358_v31, %v3357_v16 }
 0x763   : > { %6533 = vmatprep.subr.msk.bf16.mxu1 %vm3374_vm5, %v8430_v21  ;;  %v3385_v62 = vsel %vm3374_vm5, %v8430_v21, 0 }
 0x764   : > { %6334 = vmatpush3.bf16.xpose.msra.mxu1 %v3385_v62 }
 0x765   : > { %6534 = vmatprep.subr.msk.bf16.mxu1 %vm3374_vm5, %v8432_v37 }
 0x76c   : > { %6336 = vmatpush3.bf16.xpose.msra.mxu1 %v3382_v25 }
 0x76d   : > { %6341 = vmatprep.subr.bf16.mxu1 %v8442_v30 }
 0x773   : > { %6338 = vmatmul.mubr.msk.bf16.vlgmr.msra.gmra.mxu1 %vm3374_vm5, %v8447_v17 }
 0x774   : > { %6342 = vmatpush3.bf16.msra.mxu1 %v8442_v30 }
 0x775   : > { %6343 = vmatprep.subr.bf16.mxu1 %v8449_v44 }
 0x778   : > { %6344 = vmatpush3.bf16.msra.mxu1 %v8449_v44 }
 0x7e8   : > { %v3271_v38 = vpop.f32.mrf.mxu0 }
 0x7e9   : > { %v3272_v56 = vadd.f32 %v3271_v38, %v8414_v61 }
 0x7ea   : > { %v3273_v49 = vpop.f32.mrf.mxu0 }
 0x7eb   : > { %v4131_v35 = vmul.f32 0.17677669, %v3272_v56  ;;  %v3274_v7 = vadd.f32 %v3273_v49, %v8423_v39 }
 0x7ec   : > { %v3275_v41 = vpop.f32.mrf.mxu0  ;;  %v6331_v59 = vpop.f32.mrf.mxu1 }
 0x7ed   : > { %v3276_v22 = vadd.f32 %v3275_v41, %v8414_v61  ;;  %v3349_v5 = vadd.f32 %v6331_v59, %v3085_v53 }
 0x7ee   : > { %v3277_v50 = vpop.f32.mrf.mxu0  ;;  %v3340_v36 = vpop.f32.mrf.mxu1 }
 0x7ef   : > { %v4132_v48 = vmul.f32 0.17677669, %v3276_v22  ;;  %v3278_v55 = vadd.f32 %v3277_v50, %v8423_v39  ;;  %v3341_v47 = vadd.f32 %v3340_v36, %v3085_v53 }
 0x7f0   : > { %v3281_v33 = vpop.f32.mrf.mxu0  ;;  %v6332_v11 = vpop.f32.mrf.mxu1 }
 0x7f1   : > { %v8460_v26 = vpack.c.bf16 %v4132_v48, %v4131_v35  ;;  %v8462_v10 = vpack.c.bf16 %v3278_v55, %v3274_v7  ;;  %v3352_v23 = vadd.f32 %v6332_v11, %v3085_v53  ;;  %v3282_v24 = vadd.f32 %v3281_v33, %v8414_v61 }
 0x7f2   : > { %v8464_v4 = vpop.f32.mrf.mxu0  ;;  %v3343_v2 = vpop.f32.mrf.mxu1 }
 0x7f3   : > { %v8467_v20 = vpack.c.bf16 %v3352_v23, %v3349_v5  ;;  %v3344_v45 = vadd.f32 %v3343_v2, %v3085_v53  ;;  %v4133_v52 = vmul.f32 0.17677669, %v3282_v24 }
 0x7f4   : > { %v3285_v19 = vpop.f32.mrf.mxu0 }
 0x7f5   : > { %v8469_v46 = vpack.c.bf16 %v3344_v45, %v3341_v47  ;;  %v3286_v57 = vadd.f32 %v3285_v19, %v8414_v61 }
 0x7f7   : > { %v4134_v54 = vmul.f32 0.17677669, %v3286_v57 }
 0x7f9   : > { %v8472_v1 = vpack.c.bf16 %v4134_v54, %v4133_v52 }
 0x833   : > { %v6339_v62 = vpop.f32.mrf.mxu1 }
 0x834   : > { %v3430_v58 = vadd.f32 %v6339_v62, %v8477_v27 }
 0x835   : > { %v3421_v34 = vpop.f32.mrf.mxu1 }
 0x836   : > { %v3422_v53 = vadd.f32 %v3421_v34, %v8477_v27  ;;  %v3442_v31 = vsel %vm3374_vm5, %v3430_v58, -inf }
 0x837   : > { %v6340_v63 = vpop.f32.mrf.mxu1 }
 0x838   : > { %v3436_v61 = vsel %vm3374_vm5, %v3422_v53, -inf  ;;  %v3433_v32 = vadd.f32 %v6340_v63, %v8477_v27 }
 0x839   : > { %v3424_v13 = vpop.f32.mrf.mxu1  ;;  %3437 = vmax.xlane.f32.xlu0 %v3436_v61 }
 0x83a   : > { %v3425_v25 = vadd.f32 %v3424_v13, %v8477_v27  ;;  %v3445_v0 = vsel %vm3374_vm5, %v3433_v32, -inf }
 0x83c   : > { %v3439_v8 = vsel %vm3374_vm5, %v3425_v25, -inf }
 0x83d   : > { %3440 = vmax.xlane.f32.xlu1 %v3439_v8  ;;  %3443 = vmax.xlane.f32.xlu0 %v3442_v31 }
 0x841   : > { %3446 = vmax.xlane.f32.xlu1 %v3445_v0 }
 0x8c2   : > { %v3438_v16 = vpop.xlane.xlu0 %3437 }
 0x8c3   : > { %v3448_v42 = vsub.f32 %v3422_v53, %v3438_v16 }
 0x8c5   : > { %v3452_v59 = vmul.f32 1.442695, %v3448_v42 }
 0x8c6   : > { %v3441_v60 = vpop.xlane.xlu1 %3440  ;;  %v3444_v38 = vpop.xlane.xlu0 %3443 }
 0x8c7   : > { %v3450_v49 = vsub.f32 %v3430_v58, %v3444_v38  ;;  %v3449_v56 = vsub.f32 %v3425_v25, %v3441_v60 }
 0x8c9   : > { %v3456_v41 = vmul.f32 1.442695, %v3450_v49  ;;  %v3454_v36 = vmul.f32 1.442695, %v3449_v56 }
 0x8ca   : > { %v3447_v22 = vpop.xlane.xlu1 %3446 }
 0x8cb   : > { %v3451_v50 = vsub.f32 %v3433_v32, %v3447_v22  ;;  %6918 = vpow2.f32 %v3456_v41 }
 0x8cc   : > { %6920 = vpow2.f32 %v3452_v59 }
 0x8cd   : > { %v3458_v35 = vmul.f32 1.442695, %v3451_v50 }
 0x8cf   : > { %6922 = vpow2.f32 %v3458_v35  ;;  %v8533_v35 = vpop.f32.mrf.mxu0 }
 0x8d0   : > { %6924 = vpow2.f32 %v3454_v36 }
 0x8d8   : > { %v6919_v7 = vpop.eup %6918 }
 0x8d9   : > { %v3466_v48 = vsel %vm3374_vm5, %v6919_v7, 0.0  ;;  %v6921_v55 = vpop.eup %6920 }
 0x8da   : > { %3467 = vadd.xlane.f32.xlu0 %v3466_v48  ;;  %v3460_v23 = vsel %vm3374_vm5, %v6921_v55, 0.0 }
 0x8dc   : > { %v6923_v33 = vpop.eup %6922 }
 0x8dd   : > { %v3469_v11 = vsel %vm3374_vm5, %v6923_v33, 0.0  ;;  %v6925_v5 = vpop.eup %6924 }
 0x8de   : > { %3470 = vadd.xlane.f32.xlu1 %v3469_v11  ;;  %3461 = vadd.xlane.f32.xlu0 %v3460_v23  ;;  %v3463_v2 = vsel %vm3374_vm5, %v6925_v5, 0.0 }
 0x8e2   : > { %3464 = vadd.xlane.f32.xlu1 %v3463_v2 }
 0x8f3   : > { %3547 = vrot.lane.b32.xlu1 %v8432_v37, %s7378_s23 }
 0x8f4   : > { %3549 = vrot.lane.b32.xlu0 %v8430_v21, %s7378_s23 }
 0x8f7   : > { %3729 = vrot.lane.b32.xlu1 %v8430_v21, %s7379_s0 }
 0x8f8   : > { %3543 = vrot.lane.b32.xlu0 %v8447_v17, %s7378_s23 }
 0x8fb   : > { %3541 = vrot.lane.b32.xlu1 %v8419_v12, %s7378_s23 }
 0x8fc   : > { %3723 = vrot.lane.b32.xlu0 %v8419_v12, %s7379_s0 }
 0x8ff   : > { %3727 = vrot.lane.b32.xlu1 %v8432_v37, %s7379_s0 }
 0x903   : > { %3725 = vrot.lane.b32.xlu1 %v8447_v17, %s7379_s0 }
 0x963   : > { %v3468_v47 = vpop.xlane.xlu0 %3467 }
 0x967   : > { %v3471_v24 = vpop.xlane.xlu1 %3470  ;;  %v3462_v45 = vpop.xlane.xlu0 %3461 }
 0x968   : > { %6926 = vrcp.f32 %v3471_v24 }
 0x969   : > { %6928 = vrcp.f32 %v3462_v45 }
 0x96a   : > { %6930 = vrcp.f32 %v3468_v47 }
 0x96b   : > { %v3465_v19 = vpop.xlane.xlu1 %3464  ;;  %v3550_v57 = vpop.permute.xlu0 %3549 }
 0x96c   : > { %6932 = vrcp.f32 %v3465_v19  ;;  %6535 = vmatprep.subr.msk.bf16.mxu1 %vm3374_vm5, %v3550_v57  ;;  %v3561_v60 = vsel %vm3374_vm5, %v3550_v57, 0 }
 0x96f   : > { %v3548_v52 = vpop.permute.xlu1 %3547  ;;  %v3544_v54 = vpop.permute.xlu0 %3543 }
 0x970   : > { %v3558_v49 = vsel %vm3374_vm5, %v3548_v52, 0 }
 0x973   : > { %v3730_v29 = vpop.permute.xlu1 %3729  ;;  %v3724_v14 = vpop.permute.xlu0 %3723 }
 0x974   : > { %6537 = vmatprep.subr.msk.bf16.mxu0 %vm3374_vm5, %v3730_v29  ;;  %v3741_v62 = vsel %vm3374_vm5, %v3730_v29, 0  ;;  %6369 = vmatprep.mubr.msk.bf16.mxu0 %vm3374_vm5, %v3724_v14 }
 0x975   : > { %6366 = vmatpush3.bf16.xpose.msra.mxu0 %v3741_v62  ;;  %v6927_v34 = vpop.eup %6926 }
 0x976   : > { %v6929_v53 = vpop.eup %6928  ;;  %v3479_v13 = vmul.f32 %v6927_v34, %v6923_v33 }
 0x977   : > { %v3542_v63 = vpop.permute.xlu1 %3541  ;;  %v6931_v58 = vpop.eup %6930  ;;  %v3476_v25 = vmul.f32 %v6929_v53, %v6921_v55 }
 0x978   : > { %v3478_v31 = vmul.f32 %v6931_v58, %v6919_v7 }
 0x979   : > { %v6933_v61 = vpop.eup %6932 }
 0x97a   : > { %v3477_v32 = vmul.f32 %v6933_v61, %v6925_v5  ;;  %v3481_v42 = vpack.c.bf16 %v3479_v13, %v3478_v31 }
 0x97b   : > { %v3728_v8 = vpop.permute.xlu1 %3727 }
 0x97c   : > { %6538 = vmatprep.subr.msk.bf16.mxu0 %vm3374_vm5, %v3728_v8  ;;  %v3738_v0 = vsel %vm3374_vm5, %v3728_v8, 0  ;;  %v3480_v16 = vpack.c.bf16 %v3477_v32, %v3476_v25 }
 0x97d   : > { %6368 = vmatpush3.bf16.xpose.msra.mxu0 %v3738_v0 }
 0x97e   : > { %6345 = vmatprep.mubr.msk.bf16.mxu1 %vm3374_vm5, %v3480_v16 }
 0x97f   : > { %6346 = vmatmul.mubr.msk.bf16.vlgmr.msra.gmra.mxu1 %vm3374_vm5, %v3481_v42  ;;  %v3726_v38 = vpop.permute.xlu1 %3725 }
 0x980   : > { %6350 = vmatpush3.bf16.xpose.msra.mxu1 %v3561_v60  ;;  %6353 = vmatprep.mubr.msk.bf16.mxu1 %vm3374_vm5, %v3542_v63 }
 0x981   : > { %6536 = vmatprep.subr.msk.bf16.mxu1 %vm3374_vm5, %v3548_v52 }
 0x984   : > { %6370 = vmatmul.mubr.msk.bf16.vlgmr.msra.gmra.mxu0 %vm3374_vm5, %v3726_v38 }
 0x988   : > { %6352 = vmatpush3.bf16.xpose.msra.mxu1 %v3558_v49 }
 0x98f   : > { %6354 = vmatmul.mubr.msk.bf16.vlgmr.msra.gmra.mxu1 %vm3374_vm5, %v3544_v54 }
 0xa3f   : > { %v8521_v56 = vpop.f32.mrf.mxu1 }
 0xa41   : > { %v8523_v41 = vpop.f32.mrf.mxu1 }
 0xa43   : > { %v8525_v59 = vpop.f32.mrf.mxu1 }
 0xa44   : > { %v6371_v7 = vpop.f32.mrf.mxu0 }
 0xa45   : > { %v8529_v50 = vpop.f32.mrf.mxu1  ;;  %v3786_v63 = vadd.f32 %v6371_v7, %v8477_v27 }
 0xa46   : > { %v3777_v48 = vpop.f32.mrf.mxu0 }
 0xa47   : > { %v3778_v14 = vadd.f32 %v3777_v48, %v8477_v27  ;;  %v3798_v13 = vsel %vm3374_vm5, %v3786_v63, -inf }
 0xa48   : > { %v6372_v33 = vpop.f32.mrf.mxu0 }
 0xa49   : > { %v3789_v62 = vadd.f32 %v6372_v33, %v8477_v27  ;;  %v3792_v61 = vsel %vm3374_vm5, %v3778_v14, -inf }
 0xa4a   : > { %v3780_v24 = vpop.f32.mrf.mxu0 }
 0xa4b   : > { %v3781_v57 = vadd.f32 %v3780_v24, %v8477_v27  ;;  %v3801_v58 = vsel %vm3374_vm5, %v3789_v62, -inf }
 0xa4d   : > { %v3795_v53 = vsel %vm3374_vm5, %v3781_v57, -inf }
 0xa4f   : > { %v6355_v55 = vpop.f32.mrf.mxu1 }
 0xa50   : > { %v3606_v2 = vadd.f32 %v6355_v55, %v8477_v27 }
 0xa51   : > { %v3597_v11 = vpop.f32.mrf.mxu1 }
 0xa52   : > { %v3598_v5 = vadd.f32 %v3597_v11, %v8477_v27  ;;  %v3618_v29 = vsel %vm3374_vm5, %v3606_v2, -inf }
 0xa53   : > { %v6356_v23 = vpop.f32.mrf.mxu1 }
 0xa54   : > { %v3612_v47 = vsel %vm3374_vm5, %v3598_v5, -inf  ;;  %v8543_v52 = vadd.f32 %v6356_v23, %v8477_v27 }
 0xa55   : > { %v3600_v45 = vpop.f32.mrf.mxu1  ;;  %3613 = vmax.xlane.f32.xlu0 %v3612_v47 }
 0xa56   : > { %v8539_v19 = vadd.f32 %v3600_v45, %v8477_v27  ;;  %v3621_v34 = vsel %vm3374_vm5, %v8543_v52, -inf }
 0xa58   : > { %v3615_v54 = vsel %vm3374_vm5, %v8539_v19, -inf }
 0xa59   : > { %3616 = vmax.xlane.f32.xlu1 %v3615_v54  ;;  %3619 = vmax.xlane.f32.xlu0 %v3618_v29 }
 0xa5d   : > { %3622 = vmax.xlane.f32.xlu0 %v3621_v34  ;;  %3796 = vmax.xlane.f32.xlu1 %v3795_v53 }
 0xa61   : > { %3802 = vmax.xlane.f32.xlu1 %v3801_v58  ;;  %3793 = vmax.xlane.f32.xlu0 %v3792_v61 }
 0xa65   : > { %3799 = vmax.xlane.f32.xlu0 %v3798_v13 }
 0xade   : > { %v3614_v25 = vpop.xlane.xlu0 %3613 }
 0xadf   : > { %v3624_v24 = vsub.f32 %v3598_v5, %v3614_v25 }
 0xae1   : > { %v3628_v54 = vmul.f32 1.442695, %v3624_v24 }
 0xae2   : > { %v3617_v32 = vpop.xlane.xlu1 %3616  ;;  %v3620_v8 = vpop.xlane.xlu0 %3619 }
 0xae3   : > { %v3626_v33 = vsub.f32 %v3606_v2, %v3620_v8  ;;  %v3625_v8 = vsub.f32 %v8539_v19, %v3617_v32 }
 0xae5   : > { %v3632_v45 = vmul.f32 1.442695, %v3626_v33 }
 0xae6   : > { %v3623_v31 = vpop.xlane.xlu0 %3622  ;;  %v3797_v0 = vpop.xlane.xlu1 %3796 }
 0xae7   : > { %v3805_v16 = vsub.f32 %v3781_v57, %v3797_v0  ;;  %v3627_v25 = vsub.f32 %v8543_v52, %v3623_v31 }
 0xae9   : > { %v3810_v42 = vmul.f32 1.442695, %v3805_v16  ;;  %v3634_v0 = vmul.f32 1.442695, %v3627_v25  ;;  %v3630_v16 = vmul.f32 1.442695, %v3625_v8 }
 0xaea   : > { %v3803_v60 = vpop.xlane.xlu1 %3802  ;;  %v3794_v38 = vpop.xlane.xlu0 %3793 }
 0xaeb   : > { %v3807_v49 = vsub.f32 %v3789_v62, %v3803_v60  ;;  %v3804_v7 = vsub.f32 %v3778_v14, %v3794_v38  ;;  %6934 = vpow2.f32 %v3810_v42 }
 0xaed   : > { %v3814_v48 = vmul.f32 1.442695, %v3807_v49  ;;  %v3808_v55 = vmul.f32 1.442695, %v3804_v7 }
 0xaee   : > { %v3800_v11 = vpop.xlane.xlu0 %3799 }
 0xaef   : > { %6936 = vpow2.f32 %v3814_v48  ;;  %v3806_v23 = vsub.f32 %v3786_v63, %v3800_v11 }
 0xaf0   : > { %6938 = vpow2.f32 %v3808_v55 }
 0xaf1   : > { %v3812_v47 = vmul.f32 1.442695, %v3806_v23 }
 0xaf3   : > { %6940 = vpow2.f32 %v3812_v47 }
 0xaf4   : > { %6942 = vpow2.f32 %v3632_v45 }
 0xaf5   : > { %6944 = vpow2.f32 %v3628_v54 }
 0xaf6   : > { %6946 = vpow2.f32 %v3634_v0 }
 0xaf7   : > { %6948 = vpow2.f32 %v3630_v16 }
 0xaf8   : > { %v8557_v57 = vpop.eup %6934 }
 0xaf9   : > { %v3819_v29 = vsel %vm3374_vm5, %v8557_v57, 0.0 }
 0xafa   : > { %3820 = vadd.xlane.f32.xlu1 %v3819_v29 }
 0xafc   : > { %v8561_v14 = vpop.eup %6936 }
 0xafd   : > { %v8563_v2 = vpop.eup %6938  ;;  %v3825_v62 = vsel %vm3374_vm5, %v8561_v14, 0.0 }
 0xafe   : > { %v3816_v5 = vsel %vm3374_vm5, %v8563_v2, 0.0  ;;  %3826 = vadd.xlane.f32.xlu1 %v3825_v62 }
 0xaff   : > { %3817 = vadd.xlane.f32.xlu0 %v3816_v5 }
 0xb00   : > { %v8569_v34 = vpop.eup %6940 }
 0xb01   : > { %v3822_v53 = vsel %vm3374_vm5, %v8569_v34, 0.0  ;;  %v6943_v63 = vpop.eup %6942 }
 0xb02   : > { %v3642_v58 = vsel %vm3374_vm5, %v6943_v63, 0.0  ;;  %v6945_v61 = vpop.eup %6944 }
 0xb03   : > { %3823 = vadd.xlane.f32.xlu0 %v3822_v53  ;;  %v3636_v13 = vsel %vm3374_vm5, %v6945_v61, 0.0  ;;  %v6947_v42 = vpop.eup %6946 }
 0xb04   : > { %v3645_v60 = vsel %vm3374_vm5, %v6947_v42, 0.0  ;;  %v6949_v52 = vpop.eup %6948 }
 0xb05   : > { %v3639_v31 = vsel %vm3374_vm5, %v6949_v52, 0.0 }
 0xb07   : > { %3643 = vadd.xlane.f32.xlu0 %v3642_v58 }
 0xb0b   : > { %3637 = vadd.xlane.f32.xlu0 %v3636_v13 }
 0xb0f   : > { %3660 = vrot.lane.b32.xlu1 %v8449_v44, %s7378_s23 }
 0xb13   : > { %3840 = vrot.lane.b32.xlu1 %v8442_v30, %s7379_s0 }
 0xb21   : > { %3662 = vrot.lane.b32.xlu0 %v8442_v30, %s7378_s23 }
 0xb25   : > { %3907 = vrot.lane.b32.xlu0 %v8430_v21, %s7380_s28 }
 0xb29   : > { %3901 = vrot.lane.b32.xlu0 %v8419_v12, %s7380_s28 }
 0xb37   : > { %3646 = vadd.xlane.f32.xlu1 %v3645_v60 }
 0xb3b   : > { %3640 = vadd.xlane.f32.xlu1 %v3639_v31 }
 0xb4c   : > { %3838 = vrot.lane.b32.xlu1 %v8449_v44, %s7379_s0 }
 0xb50   : > { %3905 = vrot.lane.b32.xlu1 %v8432_v37, %s7380_s28 }
 0xb54   : > { %3903 = vrot.lane.b32.xlu1 %v8447_v17, %s7380_s28 }
 0xb83   : > { %v3821_v12 = vpop.xlane.xlu1 %3820 }
 0xb84   : > { %6950 = vrcp.f32 %v3821_v12 }
 0xb87   : > { %v3827_v38 = vpop.xlane.xlu1 %3826 }
 0xb88   : > { %v3818_v21 = vpop.xlane.xlu0 %3817 }
 0xb89   : > { %6952 = vrcp.f32 %v3818_v21 }
 0xb8b   : > { %v3661_v7 = vpop.permute.xlu1 %3660 }
 0xb8c   : > { %v3824_v19 = vpop.xlane.xlu0 %3823 }
 0xb8f   : > { %v3841_v55 = vpop.permute.xlu1 %3840 }
 0xb90   : > { %v3644_v32 = vpop.xlane.xlu0 %3643 }
 0xb91   : > { %v6951_v17 = vpop.eup %6950 }
 0xb92   : > { %v3833_v13 = vmul.f32 %v6951_v17, %v8557_v57 }
 0xb94   : > { %v3638_v49 = vpop.xlane.xlu0 %3637 }
 0xb96   : > { %v6953_v11 = vpop.eup %6952 }
 0xb97   : > { %v3832_v5 = vmul.f32 %v6953_v11, %v8563_v2 }
 0xb98   : > { %v3663_v48 = vpop.permute.xlu0 %3662 }
 0xb99   : > { %6357 = vmatprep.subr.bf16.mxu1 %v3663_v48  ;;  %v3836_v0 = vpack.c.bf16 %v3833_v13, %v3832_v5 }
 0xb9a   : > { %6358 = vmatpush3.bf16.msra.mxu1 %v3663_v48 }
 0xb9b   : > { %6359 = vmatprep.subr.bf16.mxu1 %v3661_v7 }
 0xb9e   : > { %6360 = vmatpush3.bf16.msra.mxu1 %v3661_v7 }
 0xb9f   : > { %6373 = vmatprep.subr.bf16.mxu1 %v3841_v55 }
 0xbc0   : > { %v3647_v33 = vpop.xlane.xlu1 %3646 }
 0xbc1   : > { %6954 = vrcp.f32 %v3647_v33 }
 0xbc2   : > { %6956 = vrcp.f32 %v3638_v49 }
 0xbc3   : > { %6958 = vrcp.f32 %v3644_v32 }
 0xbc4   : > { %v3641_v37 = vpop.xlane.xlu1 %3640 }
 0xbc5   : > { %6960 = vrcp.f32 %v3641_v37 }
 0xbc6   : > { %6962 = vrcp.f32 %v3824_v19 }
 0xbc7   : > { %6964 = vrcp.f32 %v3827_v38 }
 0xbc8   : > { %v3839_v60 = vpop.permute.xlu1 %3838 }
 0xbcc   : > { %v3906_v31 = vpop.permute.xlu1 %3905 }
 0xbcd   : > { %v3916_v21 = vsel %vm3374_vm5, %v3906_v31, 0 }
 0xbce   : > { %v6955_v23 = vpop.eup %6954 }
 0xbcf   : > { %v6957_v47 = vpop.eup %6956  ;;  %v3655_v54 = vmul.f32 %v6955_v23, %v6947_v42 }
 0xbd0   : > { %v6959_v24 = vpop.eup %6958  ;;  %v3652_v29 = vmul.f32 %v6957_v47, %v6945_v61  ;;  %v3908_v61 = vpop.permute.xlu0 %3907 }
 0xbd1   : > { %v3654_v53 = vmul.f32 %v6959_v24, %v6943_v63  ;;  %v3919_v42 = vsel %vm3374_vm5, %v3908_v61, 0 }
 0xbd2   : > { %v6961_v45 = vpop.eup %6960 }
 0xbd3   : > { %v3653_v62 = vmul.f32 %v6961_v45, %v6949_v52  ;;  %v3657_v25 = vpack.c.bf16 %v3655_v54, %v3654_v53  ;;  %v6963_v8 = vpop.eup %6962 }
 0xbd4   : > { %v6965_v16 = vpop.eup %6964  ;;  %v3834_v2 = vmul.f32 %v6963_v8, %v8569_v34  ;;  %v3902_v52 = vpop.permute.xlu0 %3901 }
 0xbd5   : > { %v3656_v58 = vpack.c.bf16 %v3653_v62, %v3652_v29  ;;  %v3835_v63 = vmul.f32 %v6965_v16, %v8561_v14  ;;  %v3904_v14 = vpop.permute.xlu1 %3903 }
 0xbd7   : > { %6361 = vmatprep.mubr.msk.bf16.mxu1 %vm3374_vm5, %v3656_v58  ;;  %v3837_v57 = vpack.c.bf16 %v3835_v63, %v3834_v2 }
 0xbd8   : > { %6362 = vmatmul.mubr.msk.bf16.vlgmr.msra.gmra.mxu1 %vm3374_vm5, %v3657_v25 }
 0xbd9   : > { %6374 = vmatpush3.bf16.msra.mxu1 %v3841_v55  ;;  %6377 = vmatprep.mubr.msk.bf16.mxu1 %vm3374_vm5, %v3836_v0 }
 0xbda   : > { %6375 = vmatprep.subr.bf16.mxu1 %v3839_v60 }
 0xbdd   : > { %6376 = vmatpush3.bf16.msra.mxu1 %v3839_v60 }
 0xbde   : > { %6539 = vmatprep.subr.msk.bf16.mxu1 %vm3374_vm5, %v3908_v61 }
 0xbe0   : > { %6378 = vmatmul.mubr.msk.bf16.vlgmr.msra.gmra.mxu1 %vm3374_vm5, %v3837_v57 }
 0xbe1   : > { %6382 = vmatpush3.bf16.xpose.msra.mxu1 %v3919_v42  ;;  %6385 = vmatprep.mubr.msk.bf16.mxu1 %vm3374_vm5, %v3902_v52 }
 0xbe2   : > { %6540 = vmatprep.subr.msk.bf16.mxu1 %vm3374_vm5, %v3906_v31 }
 0xbe9   : > { %6384 = vmatpush3.bf16.xpose.msra.mxu1 %v3916_v21 }
 0xbea   : > { %6405 = vmatprep.subr.bf16.mxu1 %v8467_v20 }
 0xbf0   : > { %6386 = vmatmul.mubr.msk.bf16.vlgmr.msra.gmra.mxu1 %vm3374_vm5, %v3904_v14 }
 0xbf1   : > { %6406 = vmatpush3.bf16.msra.mxu1 %v8467_v20 }
 0xbf2   : > { %6407 = vmatprep.subr.bf16.mxu1 %v8469_v46 }
 0xbf5   : > { %6408 = vmatpush3.bf16.msra.mxu1 %v8469_v46 }
 0xc98   : > { %v8613_v34 = vpop.f32.mrf.mxu1 }
 0xc9a   : > { %v8615_v12 = vpop.f32.mrf.mxu1 }
 0xc9c   : > { %v8617_v19 = vpop.f32.mrf.mxu1 }
 0xc9d   : > { %v3722_v32 = vpack.c.bf16 %v8617_v19, %v8613_v34 }
 0xc9e   : > { %v8621_v38 = vpop.f32.mrf.mxu1 }
 0xc9f   : > { %v3721_v49 = vpack.c.bf16 %v8621_v38, %v8615_v12 }
 0xca0   : > { %v8625_v7 = vpop.f32.mrf.mxu1 }
 0xca2   : > { %v8627_v48 = vpop.f32.mrf.mxu1 }
 0xca4   : > { %v8629_v55 = vpop.f32.mrf.mxu1 }
 0xca5   : > { %v3900_v33 = vpack.c.bf16 %v8629_v55, %v8625_v7  ;;  %v6842_v7 = vld [vmem:[#allocation13 + $0x38] sm:$0xff]  }
 0xca6   : > { %v8633_v37 = vpop.f32.mrf.mxu1 }
 0xca7   : > { %v3899_v17 = vpack.c.bf16 %v8633_v37, %v8627_v48 }
 0xcb0   : > { %v6387_v11 = vpop.f32.mrf.mxu1 }
 0xcb1   : > { %v3964_v45 = vadd.f32 %v6387_v11, %v8477_v27 }
 0xcb2   : > { %v3955_v23 = vpop.f32.mrf.mxu1 }
 0xcb3   : > { %v3956_v47 = vadd.f32 %v3955_v23, %v8477_v27  ;;  %v3976_v58 = vsel %vm3374_vm5, %v3964_v45, -inf }
 0xcb4   : > { %v6388_v24 = vpop.f32.mrf.mxu1 }
 0xcb5   : > { %v3970_v54 = vsel %vm3374_vm5, %v3956_v47, -inf  ;;  %v3967_v5 = vadd.f32 %v6388_v24, %v8477_v27 }
 0xcb6   : > { %v3958_v29 = vpop.f32.mrf.mxu1  ;;  %3971 = vmax.xlane.f32.xlu0 %v3970_v54 }
 0xcb7   : > { %v3959_v62 = vadd.f32 %v3958_v29, %v8477_v27  ;;  %v3979_v13 = vsel %vm3374_vm5, %v3967_v5, -inf }
 0xcb9   : > { %v3973_v53 = vsel %vm3374_vm5, %v3959_v62, -inf }
 0xcba   : > { %3974 = vmax.xlane.f32.xlu1 %v3973_v53  ;;  %3977 = vmax.xlane.f32.xlu0 %v3976_v58  ;;  %v3288_v58 = vadd.f32 %v8533_v35, %v8423_v39 }
 0xcbe   : > { %3980 = vmax.xlane.f32.xlu0 %v3979_v13 }
 0xd3f   : > { %v3972_v25 = vpop.xlane.xlu0 %3971 }
 0xd40   : > { %v3982_v8 = vsub.f32 %v3956_v47, %v3972_v25 }
 0xd42   : > { %v3986_v63 = vmul.f32 1.442695, %v3982_v8 }
 0xd43   : > { %v3975_v0 = vpop.xlane.xlu1 %3974  ;;  %v3978_v16 = vpop.xlane.xlu0 %3977 }
 0xd44   : > { %v3984_v60 = vsub.f32 %v3964_v45, %v3978_v16  ;;  %v3983_v61 = vsub.f32 %v3959_v62, %v3975_v0 }
 0xd46   : > { %v3990_v2 = vmul.f32 1.442695, %v3984_v60  ;;  %v3988_v27 = vmul.f32 1.442695, %v3983_v61 }
 0xd47   : > { %v3981_v57 = vpop.xlane.xlu0 %3980 }
 0xd48   : > { %v3985_v42 = vsub.f32 %v3967_v5, %v3981_v57  ;;  %6966 = vpow2.f32 %v3990_v2 }
 0xd49   : > { %6968 = vpow2.f32 %v3986_v63 }
 0xd4a   : > { %v3992_v52 = vmul.f32 1.442695, %v3985_v42 }
 0xd4c   : > { %6970 = vpow2.f32 %v3992_v52 }
 0xd4d   : > { %6972 = vpow2.f32 %v3988_v27 }
 0xd55   : > { %v6967_v31 = vpop.eup %6966 }
 0xd56   : > { %v4000_v21 = vsel %vm3374_vm5, %v6967_v31, 0.0  ;;  %v6969_v14 = vpop.eup %6968 }
 0xd57   : > { %4001 = vadd.xlane.f32.xlu0 %v4000_v21  ;;  %v3994_v24 = vsel %vm3374_vm5, %v6969_v14, 0.0 }
 0xd59   : > { %v6971_v11 = vpop.eup %6970 }
 0xd5a   : > { %v4003_v23 = vsel %vm3374_vm5, %v6971_v11, 0.0  ;;  %v6973_v47 = vpop.eup %6972 }
 0xd5b   : > { %4004 = vadd.xlane.f32.xlu1 %v4003_v23  ;;  %3995 = vadd.xlane.f32.xlu0 %v3994_v24  ;;  %v3997_v45 = vsel %vm3374_vm5, %v6973_v47, 0.0 }
 0xd5f   : > { %3998 = vadd.xlane.f32.xlu1 %v3997_v45 }
 0xd70   : > { %4016 = vrot.lane.b32.xlu1 %v8449_v44, %s7380_s28  ;;  %v3284_v44 = vadd.f32 %v8464_v4, %v8423_v39  ;;  %v4158_v4 = vsel %vm3374_vm5, %v8462_v10, 0 }
 0xd71   : > { %4018 = vrot.lane.b32.xlu0 %v8442_v30, %s7380_s28 }
 0xd72   : > { %v8657_v30 = vpack.c.bf16 %v3288_v58, %v3284_v44 }
 0xd74   : > { %v4161_v39 = vsel %vm3374_vm5, %v8657_v30, 0 }
 0xde0   : > { %v4002_v54 = vpop.xlane.xlu0 %4001 }
 0xde4   : > { %v4005_v29 = vpop.xlane.xlu1 %4004  ;;  %v3996_v62 = vpop.xlane.xlu0 %3995 }
 0xde5   : > { %6974 = vrcp.f32 %v4005_v29 }
 0xde6   : > { %6976 = vrcp.f32 %v3996_v62 }
 0xde7   : > { %6978 = vrcp.f32 %v4002_v54 }
 0xde8   : > { %v3999_v5 = vpop.xlane.xlu1 %3998  ;;  %v4019_v53 = vpop.permute.xlu0 %4018 }
 0xde9   : > { %6980 = vrcp.f32 %v3999_v5  ;;  %6389 = vmatprep.subr.bf16.mxu0 %v4019_v53 }
 0xdea   : > { %6390 = vmatpush3.bf16.msra.mxu0 %v4019_v53 }
 0xdec   : > { %v4017_v13 = vpop.permute.xlu1 %4016 }
 0xded   : > { %6391 = vmatprep.subr.bf16.mxu0 %v4017_v13 }
 0xdee   : > { %6392 = vmatpush3.bf16.msra.mxu0 %v4017_v13 }
 0xdef   : > { %6541 = vmatprep.subr.msk.bf16.mxu0 %vm3374_vm5, %v8657_v30 }
 0xdf2   : > { %v6975_v25 = vpop.eup %6974 }
 0xdf3   : > { %v6977_v8 = vpop.eup %6976  ;;  %v4013_v60 = vmul.f32 %v6975_v25, %v6971_v11 }
 0xdf4   : > { %v6979_v0 = vpop.eup %6978  ;;  %v4010_v61 = vmul.f32 %v6977_v8, %v6969_v14 }
 0xdf5   : > { %v4012_v2 = vmul.f32 %v6979_v0, %v6967_v31 }
 0xdf6   : > { %v6981_v16 = vpop.eup %6980 }
 0xdf7   : > { %v4011_v35 = vmul.f32 %v6981_v16, %v6973_v47  ;;  %v4015_v57 = vpack.c.bf16 %v4013_v60, %v4012_v2 }
 0xdf9   : > { %v4014_v63 = vpack.c.bf16 %v4011_v35, %v4010_v61 }
 0xdfb   : > { %6393 = vmatprep.mubr.msk.bf16.mxu0 %vm3374_vm5, %v4014_v63 }
 0xdfc   : > { %6394 = vmatmul.mubr.msk.bf16.vlgmr.msra.gmra.mxu0 %vm3374_vm5, %v4015_v57 }
 0xdfd   : > { %6398 = vmatpush3.bf16.xpose.msra.mxu0 %v4161_v39  ;;  %6401 = vmatprep.mubr.msk.bf16.mxu0 %vm3374_vm5, %v8460_v26 }
 0xdfe   : > { %6542 = vmatprep.subr.msk.bf16.mxu0 %vm3374_vm5, %v8462_v10 }
 0xe05   : > { %6400 = vmatpush3.bf16.xpose.msra.mxu0 %v4158_v4 }
 0xe0c   : > { %6402 = vmatmul.mubr.msk.bf16.vlgmr.msra.gmra.mxu0 %vm3374_vm5, %v8472_v1 }
 0xebc   : > { %v8673_v42 = vpop.f32.mrf.mxu0 }
 0xebe   : > { %v8675_v27 = vpop.f32.mrf.mxu0 }
 0xec0   : > { %v8677_v52 = vpop.f32.mrf.mxu0 }
 0xec2   : > { %v8681_v21 = vpop.f32.mrf.mxu0 }
 0xec3   : > { %v4077_v14 = vpack.c.bf16 %v8681_v21, %v8675_v27 }
 0xecc   : > { %v6403_v11 = vpop.f32.mrf.mxu0 }
 0xecd   : > { %v4206_v5 = vadd.f32 %v6403_v11, %v8400_v18 }
 0xece   : > { %v4197_v23 = vpop.f32.mrf.mxu0 }
 0xecf   : > { %v4198_v47 = vadd.f32 %v4197_v23, %v8400_v18  ;;  %v4218_v44 = vsel %vm3374_vm5, %v4206_v5, -inf }
 0xed0   : > { %v6404_v24 = vpop.f32.mrf.mxu0 }
 0xed1   : > { %v4209_v45 = vadd.f32 %v6404_v24, %v8400_v18  ;;  %v4212_v54 = vsel %vm3374_vm5, %v4198_v47, -inf }
 0xed2   : > { %v4200_v29 = vpop.f32.mrf.mxu0  ;;  %4213 = vmax.xlane.f32.xlu1 %v4212_v54 }
 0xed3   : > { %v4201_v62 = vadd.f32 %v4200_v29, %v8400_v18  ;;  %v4221_v58 = vsel %vm3374_vm5, %v4209_v45, -inf }
 0xed5   : > { %v4215_v53 = vsel %vm3374_vm5, %v4201_v62, -inf }
 0xed6   : > { %4216 = vmax.xlane.f32.xlu0 %v4215_v53  ;;  %4222 = vmax.xlane.f32.xlu1 %v4221_v58 }
 0xeda   : > { %4219 = vmax.xlane.f32.xlu0 %v4218_v44 }
 0xf5b   : > { %v4214_v13 = vpop.xlane.xlu1 %4213 }
 0xf5c   : > { %v4224_v60 = vsub.f32 %v4198_v47, %v4214_v13 }
 0xf5e   : > { %v4228_v57 = vmul.f32 1.442695, %v4224_v60 }
 0xf5f   : > { %v4217_v25 = vpop.xlane.xlu0 %4216  ;;  %v4223_v8 = vpop.xlane.xlu1 %4222 }
 0xf60   : > { %v4225_v0 = vsub.f32 %v4201_v62, %v4217_v25  ;;  %v4227_v16 = vsub.f32 %v4209_v45, %v4223_v8 }
 0xf62   : > { %v4230_v61 = vmul.f32 1.442695, %v4225_v0  ;;  %v4234_v35 = vmul.f32 1.442695, %v4227_v16 }
 0xf63   : > { %v4220_v2 = vpop.xlane.xlu0 %4219 }
 0xf64   : > { %6982 = vpow2.f32 %v4230_v61  ;;  %v4226_v63 = vsub.f32 %v4206_v5, %v4220_v2 }
 0xf65   : > { %6984 = vpow2.f32 %v4234_v35 }
 0xf66   : > { %v4232_v39 = vmul.f32 1.442695, %v4226_v63 }
 0xf68   : > { %6986 = vpow2.f32 %v4232_v39 }
 0xf69   : > { %6988 = vpow2.f32 %v4228_v57 }
 0xf71   : > { %v6983_v4 = vpop.eup %6982 }
 0xf72   : > { %v4239_v11 = vsel %vm3374_vm5, %v6983_v4, 0.0  ;;  %v6985_v23 = vpop.eup %6984 }
 0xf73   : > { %4240 = vadd.xlane.f32.xlu1 %v4239_v11  ;;  %v4245_v47 = vsel %vm3374_vm5, %v6985_v23, 0.0 }
 0xf75   : > { %v6987_v24 = vpop.eup %6986 }
 0xf76   : > { %v4242_v54 = vsel %vm3374_vm5, %v6987_v24, 0.0  ;;  %v6989_v45 = vpop.eup %6988 }
 0xf77   : > { %4243 = vadd.xlane.f32.xlu0 %v4242_v54  ;;  %4246 = vadd.xlane.f32.xlu1 %v4245_v47  ;;  %v4236_v29 = vsel %vm3374_vm5, %v6989_v45, 0.0 }
 0xf7b   : > { %4237 = vadd.xlane.f32.xlu0 %v4236_v29 }
 0xf88   : > { %4323 = vrot.lane.b32.xlu1 %v8462_v10, %s7378_s23 }
 0xf8c   : > { %4317 = vrot.lane.b32.xlu1 %v8460_v26, %s7378_s23 }
 0xf90   : > { %4319 = vrot.lane.b32.xlu1 %v8472_v1, %s7378_s23 }
 0xf91   : > { %4325 = vrot.lane.b32.xlu0 %v8657_v30, %s7378_s23 }
 0xffc   : > { %v4241_v62 = vpop.xlane.xlu1 %4240 }
0x1000   : > { %v4244_v5 = vpop.xlane.xlu0 %4243  ;;  %v4247_v53 = vpop.xlane.xlu1 %4246 }
0x1001   : > { %6990 = vrcp.f32 %v4244_v5 }
0x1002   : > { %6992 = vrcp.f32 %v4247_v53 }
0x1003   : > { %6994 = vrcp.f32 %v4241_v62 }
0x1004   : > { %v4238_v58 = vpop.xlane.xlu0 %4237  ;;  %v4324_v16 = vpop.permute.xlu1 %4323 }
0x1005   : > { %6996 = vrcp.f32 %v4238_v58  ;;  %v4334_v54 = vsel %vm3374_vm5, %v4324_v16, 0 }
0x1008   : > { %v4326_v44 = vpop.permute.xlu0 %4325  ;;  %v4318_v11 = vpop.permute.xlu1 %4317 }
0x1009   : > { %6543 = vmatprep.subr.msk.bf16.mxu1 %vm3374_vm5, %v4326_v44  ;;  %v4337_v39 = vsel %vm3374_vm5, %v4326_v44, 0 }
0x100e   : > { %v6991_v13 = vpop.eup %6990 }
0x100f   : > { %v6993_v25 = vpop.eup %6992  ;;  %v4254_v60 = vmul.f32 %v6991_v13, %v6987_v24 }
0x1010   : > { %v6995_v8 = vpop.eup %6994  ;;  %v4255_v61 = vmul.f32 %v6993_v25, %v6985_v23  ;;  %v4320_v23 = vpop.permute.xlu1 %4319 }
0x1011   : > { %v4253_v2 = vmul.f32 %v6995_v8, %v6983_v4 }
0x1012   : > { %v6997_v0 = vpop.eup %6996  ;;  %v4257_v57 = vpack.c.bf16 %v4255_v61, %v4254_v60 }
0x1013   : > { %v4252_v35 = vmul.f32 %v6997_v0, %v6989_v45 }
0x1015   : > { %v4256_v63 = vpack.c.bf16 %v4253_v2, %v4252_v35 }
0x1017   : > { %6409 = vmatprep.mubr.msk.bf16.mxu1 %vm3374_vm5, %v4256_v63 }
0x1018   : > { %6410 = vmatmul.mubr.msk.bf16.vlgmr.msra.gmra.mxu1 %vm3374_vm5, %v4257_v57 }
0x1019   : > { %6414 = vmatpush3.bf16.xpose.msra.mxu1 %v4337_v39  ;;  %6417 = vmatprep.mubr.msk.bf16.mxu1 %vm3374_vm5, %v4318_v11 }
0x101a   : > { %6544 = vmatprep.subr.msk.bf16.mxu1 %vm3374_vm5, %v4324_v16 }
0x1021   : > { %6416 = vmatpush3.bf16.xpose.msra.mxu1 %v4334_v54 }
0x1028   : > { %6418 = vmatmul.mubr.msk.bf16.vlgmr.msra.gmra.mxu1 %vm3374_vm5, %v4320_v23 }
0x10d8   : > { %v8713_v4 = vpop.f32.mrf.mxu1 }
0x10da   : > { %v8715_v24 = vpop.f32.mrf.mxu1 }
0x10dc   : > { %v8717_v47 = vpop.f32.mrf.mxu1 }
0x10de   : > { %v8721_v29 = vpop.f32.mrf.mxu1 }
0x10e8   : > { %v6419_v5 = vpop.f32.mrf.mxu1 }
0x10e9   : > { %v4382_v13 = vadd.f32 %v6419_v5, %v8400_v18 }
0x10ea   : > { %v4373_v53 = vpop.f32.mrf.mxu1 }
0x10eb   : > { %v4374_v58 = vadd.f32 %v4373_v53, %v8400_v18  ;;  %v4394_v61 = vsel %vm3374_vm5, %v4382_v13, -inf }
0x10ec   : > { %v6420_v44 = vpop.f32.mrf.mxu1 }
0x10ed   : > { %v4388_v25 = vsel %vm3374_vm5, %v4374_v58, -inf  ;;  %v4385_v16 = vadd.f32 %v6420_v44, %v8400_v18 }
0x10ee   : > { %v4376_v8 = vpop.f32.mrf.mxu1  ;;  %4389 = vmax.xlane.f32.xlu0 %v4388_v25 }
0x10ef   : > { %v4377_v0 = vadd.f32 %v4376_v8, %v8400_v18  ;;  %v4397_v35 = vsel %vm3374_vm5, %v4385_v16, -inf }
0x10f1   : > { %v4391_v60 = vsel %vm3374_vm5, %v4377_v0, -inf }
0x10f2   : > { %4392 = vmax.xlane.f32.xlu1 %v4391_v60  ;;  %4395 = vmax.xlane.f32.xlu0 %v4394_v61 }
0x10f6   : > { %4398 = vmax.xlane.f32.xlu0 %v4397_v35 }
0x1103   : > { %4436 = vrot.lane.b32.xlu1 %v8469_v46, %s7378_s23 }
0x1177   : > { %v4390_v2 = vpop.xlane.xlu0 %4389 }
0x1178   : > { %v4400_v63 = vsub.f32 %v4374_v58, %v4390_v2 }
0x117a   : > { %v4404_v5 = vmul.f32 1.442695, %v4400_v63 }
0x117b   : > { %v4393_v57 = vpop.xlane.xlu1 %4392  ;;  %v4396_v39 = vpop.xlane.xlu0 %4395 }
0x117c   : > { %v4402_v11 = vsub.f32 %v4382_v13, %v4396_v39  ;;  %v4401_v54 = vsub.f32 %v4377_v0, %v4393_v57 }
0x117e   : > { %v4408_v23 = vmul.f32 1.442695, %v4402_v11  ;;  %v4406_v25 = vmul.f32 1.442695, %v4401_v54 }
0x117f   : > { %v4399_v53 = vpop.xlane.xlu0 %4398  ;;  %v4437_v63 = vpop.permute.xlu1 %4436 }
0x1180   : > { %v4403_v44 = vsub.f32 %v4385_v16, %v4399_v53  ;;  %6998 = vpow2.f32 %v4408_v23 }
0x1181   : > { %7000 = vpow2.f32 %v4404_v5 }
0x1182   : > { %v4410_v8 = vmul.f32 1.442695, %v4403_v44 }
0x1184   : > { %7002 = vpow2.f32 %v4410_v8 }
0x1185   : > { %7004 = vpow2.f32 %v4406_v25 }
0x118d   : > { %v6999_v60 = vpop.eup %6998 }
0x118e   : > { %v4418_v61 = vsel %vm3374_vm5, %v6999_v60, 0.0  ;;  %v7001_v35 = vpop.eup %7000 }
0x118f   : > { %4419 = vadd.xlane.f32.xlu0 %v4418_v61  ;;  %v4412_v0 = vsel %vm3374_vm5, %v7001_v35, 0.0 }
0x1191   : > { %v7003_v58 = vpop.eup %7002 }
0x1192   : > { %v4421_v2 = vsel %vm3374_vm5, %v7003_v58, 0.0  ;;  %v7005_v13 = vpop.eup %7004 }
0x1193   : > { %4422 = vadd.xlane.f32.xlu1 %v4421_v2  ;;  %4413 = vadd.xlane.f32.xlu0 %v4412_v0  ;;  %v4415_v16 = vsel %vm3374_vm5, %v7005_v13, 0.0 }
0x1197   : > { %4416 = vadd.xlane.f32.xlu1 %v4415_v16 }
0x11a8   : > { %4505 = vrot.lane.b32.xlu1 %v8657_v30, %s7379_s0 }
0x11a9   : > { %4438 = vrot.lane.b32.xlu0 %v8467_v20, %s7378_s23 }
0x11ac   : > { %4503 = vrot.lane.b32.xlu1 %v8462_v10, %s7379_s0 }
0x11ad   : > { %4499 = vrot.lane.b32.xlu0 %v8460_v26, %s7379_s0 }
0x11b0   : > { %4501 = vrot.lane.b32.xlu1 %v8472_v1, %s7379_s0 }
0x1218   : > { %v4420_v57 = vpop.xlane.xlu0 %4419 }
0x121c   : > { %v4423_v39 = vpop.xlane.xlu1 %4422  ;;  %v4414_v11 = vpop.xlane.xlu0 %4413 }
0x121d   : > { %7006 = vrcp.f32 %v4423_v39 }
0x121e   : > { %7008 = vrcp.f32 %v4414_v11 }
0x121f   : > { %7010 = vrcp.f32 %v4420_v57 }
0x1220   : > { %v4417_v54 = vpop.xlane.xlu1 %4416  ;;  %v4439_v23 = vpop.permute.xlu0 %4438 }
0x1221   : > { %7012 = vrcp.f32 %v4417_v54  ;;  %6421 = vmatprep.subr.bf16.mxu0 %v4439_v23 }
0x1222   : > { %6422 = vmatpush3.bf16.msra.mxu0 %v4439_v23 }
0x1223   : > { %6423 = vmatprep.subr.bf16.mxu0 %v4437_v63 }
0x1224   : > { %v4506_v5 = vpop.permute.xlu1 %4505  ;;  %v4500_v54 = vpop.permute.xlu0 %4499 }
0x1225   : > { %v4517_v11 = vsel %vm3374_vm5, %v4506_v5, 0 }
0x1226   : > { %6424 = vmatpush3.bf16.msra.mxu0 %v4437_v63 }
0x1227   : > { %6545 = vmatprep.subr.msk.bf16.mxu0 %vm3374_vm5, %v4506_v5 }
0x1228   : > { %v4504_v63 = vpop.permute.xlu1 %4503 }
0x122a   : > { %v7007_v53 = vpop.eup %7006 }
0x122b   : > { %v7009_v44 = vpop.eup %7008  ;;  %v4431_v61 = vmul.f32 %v7007_v53, %v7003_v58  ;;  %v4514_v58 = vsel %vm3374_vm5, %v4504_v63, 0 }
0x122c   : > { %v7011_v25 = vpop.eup %7010  ;;  %v4428_v2 = vmul.f32 %v7009_v44, %v7001_v35  ;;  %v4502_v35 = vpop.permute.xlu1 %4501 }
0x122d   : > { %v4430_v16 = vmul.f32 %v7011_v25, %v6999_v60 }
0x122e   : > { %v7013_v8 = vpop.eup %7012 }
0x122f   : > { %v4429_v0 = vmul.f32 %v7013_v8, %v7005_v13  ;;  %v4433_v57 = vpack.c.bf16 %v4431_v61, %v4430_v16 }
0x1231   : > { %v4432_v39 = vpack.c.bf16 %v4429_v0, %v4428_v2 }
0x1233   : > { %6425 = vmatprep.mubr.msk.bf16.mxu0 %vm3374_vm5, %v4432_v39 }
0x1234   : > { %6426 = vmatmul.mubr.msk.bf16.vlgmr.msra.gmra.mxu0 %vm3374_vm5, %v4433_v57 }
0x1235   : > { %6430 = vmatpush3.bf16.xpose.msra.mxu0 %v4517_v11  ;;  %6433 = vmatprep.mubr.msk.bf16.mxu0 %vm3374_vm5, %v4500_v54 }
0x1236   : > { %6546 = vmatprep.subr.msk.bf16.mxu0 %vm3374_vm5, %v4504_v63 }
0x123d   : > { %6432 = vmatpush3.bf16.xpose.msra.mxu0 %v4514_v58 }
0x1244   : > { %6434 = vmatmul.mubr.msk.bf16.vlgmr.msra.gmra.mxu0 %vm3374_vm5, %v4502_v35 }
0x12f4   : > { %v8757_v60 = vpop.f32.mrf.mxu0 }
0x12f6   : > { %v8759_v13 = vpop.f32.mrf.mxu0 }
0x12f8   : > { %v8761_v23 = vpop.f32.mrf.mxu0 }
0x12fa   : > { %v8765_v53 = vpop.f32.mrf.mxu0 }
0x12fb   : > { %v4497_v44 = vpack.c.bf16 %v8765_v53, %v8759_v13 }
0x1304   : > { %v6435_v25 = vpop.f32.mrf.mxu0 }
0x1305   : > { %v4562_v0 = vadd.f32 %v6435_v25, %v8400_v18 }
0x1306   : > { %v4553_v8 = vpop.f32.mrf.mxu0 }
0x1307   : > { %v4554_v61 = vadd.f32 %v4553_v8, %v8400_v18  ;;  %v4574_v63 = vsel %vm3374_vm5, %v4562_v0, -inf }
0x1308   : > { %v6436_v2 = vpop.f32.mrf.mxu0 }
0x1309   : > { %v4568_v16 = vsel %vm3374_vm5, %v4554_v61, -inf  ;;  %v4565_v11 = vadd.f32 %v6436_v2, %v8400_v18 }
0x130a   : > { %v4556_v39 = vpop.f32.mrf.mxu0  ;;  %4569 = vmax.xlane.f32.xlu0 %v4568_v16 }
0x130b   : > { %v4557_v57 = vadd.f32 %v4556_v39, %v8400_v18  ;;  %v4577_v58 = vsel %vm3374_vm5, %v4565_v11, -inf }
0x130d   : > { %v4571_v54 = vsel %vm3374_vm5, %v4557_v57, -inf }
0x130e   : > { %4572 = vmax.xlane.f32.xlu1 %v4571_v54  ;;  %4575 = vmax.xlane.f32.xlu0 %v4574_v63 }
0x1312   : > { %4578 = vmax.xlane.f32.xlu0 %v4577_v58 }
0x131f   : > { %4614 = vrot.lane.b32.xlu1 %v8469_v46, %s7379_s0 }
0x1393   : > { %v4570_v35 = vpop.xlane.xlu0 %4569 }
0x1394   : > { %v4580_v25 = vsub.f32 %v4554_v61, %v4570_v35 }
0x1396   : > { %v4584_v2 = vmul.f32 1.442695, %v4580_v25 }
0x1397   : > { %v4573_v8 = vpop.xlane.xlu1 %4572  ;;  %v4576_v16 = vpop.xlane.xlu0 %4575 }
0x1398   : > { %v4582_v45 = vsub.f32 %v4562_v0, %v4576_v16  ;;  %v4581_v39 = vsub.f32 %v4557_v57, %v4573_v8 }
0x139a   : > { %v4588_v22 = vmul.f32 1.442695, %v4582_v45  ;;  %v4586_v5 = vmul.f32 1.442695, %v4581_v39 }
0x139b   : > { %v4579_v62 = vpop.xlane.xlu0 %4578 }
0x139c   : > { %v4583_v36 = vsub.f32 %v4565_v11, %v4579_v62  ;;  %7014 = vpow2.f32 %v4588_v22 }
0x139d   : > { %7016 = vpow2.f32 %v4584_v2 }
0x139e   : > { %v4590_v54 = vmul.f32 1.442695, %v4583_v36  ;;  %v4615_v36 = vpop.permute.xlu1 %4614 }
0x13a0   : > { %7018 = vpow2.f32 %v4590_v54 }
0x13a1   : > { %7020 = vpow2.f32 %v4586_v5 }
0x13a9   : > { %v7015_v63 = vpop.eup %7014 }
0x13aa   : > { %v4598_v58 = vsel %vm3374_vm5, %v7015_v63, 0.0  ;;  %v7017_v31 = vpop.eup %7016 }
0x13ab   : > { %4599 = vadd.xlane.f32.xlu0 %v4598_v58  ;;  %v4592_v45 = vsel %vm3374_vm5, %v7017_v31, 0.0 }
0x13ad   : > { %v7019_v61 = vpop.eup %7018 }
0x13ae   : > { %v4601_v35 = vsel %vm3374_vm5, %v7019_v61, 0.0  ;;  %v7021_v0 = vpop.eup %7020 }
0x13af   : > { %4602 = vadd.xlane.f32.xlu1 %v4601_v35  ;;  %4593 = vadd.xlane.f32.xlu0 %v4592_v45  ;;  %v4595_v22 = vsel %vm3374_vm5, %v7021_v0, 0.0 }
0x13b3   : > { %4596 = vadd.xlane.f32.xlu1 %v4595_v22 }
0x13c4   : > { %4683 = vrot.lane.b32.xlu1 %v8657_v30, %s7380_s28 }
0x13c5   : > { %4616 = vrot.lane.b32.xlu0 %v8467_v20, %s7379_s0 }
0x13c8   : > { %4681 = vrot.lane.b32.xlu1 %v8462_v10, %s7380_s28 }
0x13c9   : > { %4677 = vrot.lane.b32.xlu0 %v8460_v26, %s7380_s28 }
0x13cc   : > { %4679 = vrot.lane.b32.xlu1 %v8472_v1, %s7380_s28 }
0x1434   : > { %v4600_v62 = vpop.xlane.xlu0 %4599 }
0x1438   : > { %v4603_v5 = vpop.xlane.xlu1 %4602  ;;  %v4594_v57 = vpop.xlane.xlu0 %4593 }
0x1439   : > { %7022 = vrcp.f32 %v4603_v5 }
0x143a   : > { %7024 = vrcp.f32 %v4594_v57 }
0x143b   : > { %7026 = vrcp.f32 %v4600_v62 }
0x143c   : > { %v4597_v30 = vpop.xlane.xlu1 %4596  ;;  %v4617_v11 = vpop.permute.xlu0 %4616 }
0x143d   : > { %7028 = vrcp.f32 %v4597_v30  ;;  %6437 = vmatprep.subr.bf16.mxu1 %v4617_v11 }
0x143e   : > { %6438 = vmatpush3.bf16.msra.mxu1 %v4617_v11 }
0x143f   : > { %6439 = vmatprep.subr.bf16.mxu1 %v4615_v36 }
0x1440   : > { %v4684_v10 = vpop.permute.xlu1 %4683  ;;  %v4678_v22 = vpop.permute.xlu0 %4677 }
0x1441   : > { %v4695_v45 = vsel %vm3374_vm5, %v4684_v10, 0 }
0x1442   : > { %6440 = vmatpush3.bf16.msra.mxu1 %v4615_v36 }
0x1443   : > { %6547 = vmatprep.subr.msk.bf16.mxu1 %vm3374_vm5, %v4684_v10 }
0x1444   : > { %v4682_v36 = vpop.permute.xlu1 %4681 }
0x1446   : > { %v7023_v26 = vpop.eup %7022 }
0x1447   : > { %v7025_v25 = vpop.eup %7024  ;;  %v4611_v16 = vmul.f32 %v7023_v26, %v7019_v61  ;;  %v4692_v61 = vsel %vm3374_vm5, %v4682_v36, 0 }
0x1448   : > { %v7027_v1 = vpop.eup %7026  ;;  %v4608_v39 = vmul.f32 %v7025_v25, %v7017_v31  ;;  %v4680_v31 = vpop.permute.xlu1 %4679 }
0x1449   : > { %v4610_v54 = vmul.f32 %v7027_v1, %v7015_v63 }
0x144a   : > { %v7029_v8 = vpop.eup %7028 }
0x144b   : > { %v4609_v2 = vmul.f32 %v7029_v8, %v7021_v0  ;;  %v4613_v35 = vpack.c.bf16 %v4611_v16, %v4610_v54 }
0x144d   : > { %v4612_v58 = vpack.c.bf16 %v4609_v2, %v4608_v39 }
0x144f   : > { %6441 = vmatprep.mubr.msk.bf16.mxu1 %vm3374_vm5, %v4612_v58 }
0x1450   : > { %6442 = vmatmul.mubr.msk.bf16.vlgmr.msra.gmra.mxu1 %vm3374_vm5, %v4613_v35 }
0x1451   : > { %6446 = vmatpush3.bf16.xpose.msra.mxu1 %v4695_v45  ;;  %6449 = vmatprep.mubr.msk.bf16.mxu1 %vm3374_vm5, %v4678_v22 }
0x1452   : > { %6548 = vmatprep.subr.msk.bf16.mxu1 %vm3374_vm5, %v4682_v36 }
0x1459   : > { %6448 = vmatpush3.bf16.xpose.msra.mxu1 %v4692_v61 }
0x1460   : > { %6450 = vmatmul.mubr.msk.bf16.vlgmr.msra.gmra.mxu1 %vm3374_vm5, %v4680_v31 }
0x1510   : > { %v6443_v63 = vpop.f32.mrf.mxu1 }
0x1512   : > { %v4660_v0 = vpop.f32.mrf.mxu1 }
0x1514   : > { %v6444_v62 = vpop.f32.mrf.mxu1 }
0x1515   : > { %v4676_v5 = vpack.c.bf16 %v6444_v62, %v6443_v63 }
0x1516   : > { %v4663_v57 = vpop.f32.mrf.mxu1 }
0x1517   : > { %v4675_v30 = vpack.c.bf16 %v4663_v57, %v4660_v0 }
0x1520   : > { %v6451_v11 = vpop.f32.mrf.mxu1 }
0x1521   : > { %v4740_v1 = vadd.f32 %v6451_v11, %v8400_v18 }
0x1522   : > { %v4731_v10 = vpop.f32.mrf.mxu1 }
0x1523   : > { %v4732_v26 = vadd.f32 %v4731_v10, %v8400_v18  ;;  %v4752_v58 = vsel %vm3374_vm5, %v4740_v1, -inf }
0x1524   : > { %v6452_v25 = vpop.f32.mrf.mxu1 }
0x1525   : > { %v4746_v8 = vsel %vm3374_vm5, %v4732_v26, -inf  ;;  %v4743_v2 = vadd.f32 %v6452_v25, %v8400_v18 }
0x1526   : > { %v4734_v16 = vpop.f32.mrf.mxu1  ;;  %4747 = vmax.xlane.f32.xlu0 %v4746_v8 }
0x1527   : > { %v4735_v39 = vadd.f32 %v4734_v16, %v8400_v18  ;;  %v4755_v35 = vsel %vm3374_vm5, %v4743_v2, -inf }
0x1529   : > { %v4749_v54 = vsel %vm3374_vm5, %v4735_v39, -inf }
0x152a   : > { %4750 = vmax.xlane.f32.xlu1 %v4749_v54  ;;  %4753 = vmax.xlane.f32.xlu0 %v4752_v58 }
0x152e   : > { %4756 = vmax.xlane.f32.xlu0 %v4755_v35  ;;  %v9164_v35 = vpack.c.bf16 %v8721_v29, %v8715_v24 }
0x15af   : > { %v4748_v45 = vpop.xlane.xlu0 %4747 }
0x15b0   : > { %v4758_v22 = vsub.f32 %v4732_v26, %v4748_v45 }
0x15b2   : > { %v4762_v62 = vmul.f32 1.442695, %v4758_v22 }
0x15b3   : > { %v4751_v36 = vpop.xlane.xlu1 %4750  ;;  %v4754_v61 = vpop.xlane.xlu0 %4753 }
0x15b4   : > { %v4760_v31 = vsub.f32 %v4740_v1, %v4754_v61  ;;  %v4759_v63 = vsub.f32 %v4735_v39, %v4751_v36 }
0x15b6   : > { %v4766_v0 = vmul.f32 1.442695, %v4760_v31  ;;  %v4764_v18 = vmul.f32 1.442695, %v4759_v63  ;;  %v6843_v63 = vld [vmem:[#allocation13 + $0x30] sm:$0xff]  }
0x15b7   : > { %v4757_v57 = vpop.xlane.xlu0 %4756 }
0x15b8   : > { %v4761_v11 = vsub.f32 %v4743_v2, %v4757_v57  ;;  %7030 = vpow2.f32 %v4766_v0  ;;  %v9165_v0 = vpack.c.bf16 %v8525_v59, %v8521_v56  ;;  %v6846_v59 = vld [vmem:[#allocation13 + $0x20] sm:$0xff]  }
0x15b9   : > { %7032 = vpow2.f32 %v4762_v62 }
0x15ba   : > { %v4768_v10 = vmul.f32 1.442695, %v4761_v11 }
0x15bc   : > { %7034 = vpow2.f32 %v4768_v10 }
0x15bd   : > { %7036 = vpow2.f32 %v4764_v18 }
0x15c5   : > { %v7031_v25 = vpop.eup %7030 }
0x15c6   : > { %v4776_v8 = vsel %vm3374_vm5, %v7031_v25, 0.0  ;;  %v7033_v16 = vpop.eup %7032 }
0x15c7   : > { %4777 = vadd.xlane.f32.xlu0 %v4776_v8  ;;  %v4770_v39 = vsel %vm3374_vm5, %v7033_v16, 0.0  ;;  %v9166_v8 = vpack.c.bf16 %v8717_v47, %v8713_v4 }
0x15c9   : > { %v7035_v26 = vpop.eup %7034 }
0x15ca   : > { %v4779_v54 = vsel %vm3374_vm5, %v7035_v26, 0.0  ;;  %v7037_v1 = vpop.eup %7036 }
0x15cb   : > { %4780 = vadd.xlane.f32.xlu1 %v4779_v54  ;;  %4771 = vadd.xlane.f32.xlu0 %v4770_v39  ;;  %v4773_v2 = vsel %vm3374_vm5, %v7037_v1, 0.0  ;;  %v6848_v39 = vld [vmem:[#allocation13 + $0x10] sm:$0xff]  }
0x15cf   : > { %4774 = vadd.xlane.f32.xlu1 %v4773_v2  ;;  %v6849_v2 = vld [vmem:[#allocation13 + $0x8] sm:$0xff]  }
0x15e0   : > { %4792 = vrot.lane.b32.xlu1 %v8469_v46, %s7380_s28  ;;  %v9162_v46 = vpack.c.bf16 %v8761_v23, %v8757_v60 }
0x15e1   : > { %4794 = vrot.lane.b32.xlu0 %v8467_v20, %s7380_s28  ;;  %v9161_v20 = vpack.c.bf16 %v8677_v52, %v8673_v42 }
0x15e4   : > { %4081 = vrot.lane.b32.xlu1 %v3721_v49, %s7380_s28 }
0x15e5   : > { %4087 = vrot.lane.b32.xlu0 %v3899_v17, %s7379_s0 }
0x15e8   : > { %4083 = vrot.lane.b32.xlu1 %v3722_v32, %s7380_s28 }
0x15e9   : > { %4093 = vrot.lane.b32.xlu0 %v4077_v14, %s7378_s23 }
0x15ec   : > { %4089 = vrot.lane.b32.xlu1 %v3900_v33, %s7379_s0  ;;  %v9163_v33 = vpack.c.bf16 %v8529_v50, %v8523_v41 }
0x15ed   : > { %4857 = vrot.lane.b32.xlu0 %v4497_v44, %s7380_s28 }
0x15f0   : > { %4095 = vrot.lane.b32.xlu1 %v9161_v20, %s7378_s23  ;;  %v6850_v20 = vld [vmem:[#allocation13] sm:$0xff]  }
0x15f1   : > { %4863 = vrot.lane.b32.xlu0 %v4675_v30, %s7379_s0 }
0x15f4   : > { %4859 = vrot.lane.b32.xlu1 %v9162_v46, %s7380_s28  ;;  %s9170_s28 = sld [smem:[#allocation39_spill]] }
0x15f8   : > { %4865 = vrot.lane.b32.xlu1 %v4676_v5, %s7379_s0 }
0x1650   : > { %v4778_v34 = vpop.xlane.xlu0 %4777 }
0x1654   : > { %v4781_v12 = vpop.xlane.xlu1 %4780  ;;  %v4772_v19 = vpop.xlane.xlu0 %4771 }
0x1655   : > { %7038 = vrcp.f32 %v4781_v12 }
0x1656   : > { %7040 = vrcp.f32 %v4772_v19 }
0x1657   : > { %7042 = vrcp.f32 %v4778_v34 }
0x1658   : > { %v4775_v32 = vpop.xlane.xlu1 %4774  ;;  %v4795_v38 = vpop.permute.xlu0 %4794 }
0x1659   : > { %7044 = vrcp.f32 %v4775_v32  ;;  %6453 = vmatprep.subr.bf16.mxu0 %v4795_v38 }
0x165a   : > { %6454 = vmatpush3.bf16.msra.mxu0 %v4795_v38 }
0x165c   : > { %v4793_v49 = vpop.permute.xlu1 %4792  ;;  %v4088_v48 = vpop.permute.xlu0 %4087 }
0x165d   : > { %6455 = vmatprep.subr.bf16.mxu0 %v4793_v49 }
0x165e   : > { %6456 = vmatpush3.bf16.msra.mxu0 %v4793_v49  ;;  %v5908_v49 = vld [vmem:[%s9068_s12] ss:$0 sm:$0xff] }
0x165f   : > { %6461 = vmatprep.subr.bf16.mxu0 %v6842_v7 }
0x1660   : > { %v4082_v55 = vpop.permute.xlu1 %4081  ;;  %v4094_v17 = vpop.permute.xlu0 %4093 }
0x1661   : > { %v4099_v37 = vsel %vm3374_vm5, %v9163_v33, %v4082_v55 }
0x1662   : > { %v4105_v42 = vsel %vm4103_vm7, %v4099_v37, %v4088_v48  ;;  %v7039_v27 = vpop.eup %7038 }
0x1663   : > { %v4110_v52 = vsel %vm4108_vm8, %v4105_v42, %v4094_v17  ;;  %v7041_v21 = vpop.eup %7040  ;;  %v4789_v5 = vmul.f32 %v7039_v27, %v7035_v26 }
0x1664   : > { %v5883_v14 = vcombine.low %v4110_v52, %v4110_v52  ;;  %v5884_v60 = vcombine.high %v4110_v52, %v4110_v52  ;;  %v4084_v13 = vpop.permute.xlu1 %4083  ;;  %v7043_v23 = vpop.eup %7042  ;;  %v4786_v30 = vmul.f32 %v7041_v21, %v7033_v16 }
0x1665   : > { %v4858_v53 = vpop.permute.xlu0 %4857  ;;  %v4788_v58 = vmul.f32 %v7043_v23, %v7031_v25  ;;  %v4102_v62 = vsel %vm3374_vm5, %v9165_v0, %v4084_v13  ;;  %v6845_v25 = vld [vmem:[#allocation13 + $0x28] sm:$0xff]  }
0x1666   : > { %v7045_v44 = vpop.eup %7044  ;;  %4127 = vst [vmem:[#allocation3] sm:$0xf] %v5883_v14  ;;  %4128 = vst [vmem:[#allocation3 + $0x4] sm:$0xf] %v5884_v60  ;;  %v4875_v45 = vsel %vm3374_vm5, %v9164_v35, %v4858_v53 }
0x1667   : > { %v4787_v41 = vmul.f32 %v7045_v44, %v7037_v1  ;;  %v4791_v31 = vpack.c.bf16 %v4789_v5, %v4788_v58  ;;  %v6847_v1 = vld [vmem:[#allocation13 + $0x18] sm:$0xff]  }
0x1668   : > { %v4090_v50 = vpop.permute.xlu1 %4089 }
0x1669   : > { %v4864_v22 = vpop.permute.xlu0 %4863  ;;  %v4790_v36 = vpack.c.bf16 %v4787_v41, %v4786_v30  ;;  %v4107_v57 = vsel %vm4103_vm7, %v4102_v62, %v4090_v50 }
0x166a   : > { %v8862_v61 = vsel %vm4103_vm7, %v4875_v45, %v4864_v22 }
0x166b   : > { %6457 = vmatprep.mubr.msk.bf16.mxu0 %vm3374_vm5, %v4790_v36 }
0x166c   : > { %v4096_v11 = vpop.permute.xlu1 %4095  ;;  %6458 = vmatmul.mubr.msk.bf16.vlgmr.msra.gmra.mxu0 %vm3374_vm5, %v4791_v31 }
0x166d   : > { %v4112_v24 = vsel %vm4108_vm8, %v4107_v57, %v4096_v11  ;;  %6462 = vmatpush3.bf16.msra.mxu0 %v6842_v7  ;;  %v6844_v29 = vld [vmem:[#allocation3] sm:$0xff]  }
0x166e   : > { %v5885_v18 = vcombine.low %v4112_v24, %v4112_v24  ;;  %v5886_v10 = vcombine.high %v4112_v24, %v4112_v24  ;;  %6463 = vmatprep.subr.bf16.mxu0 %v6843_v63  ;;  %6477 = vmatprep.mubr.bf16.mxu0 %v6844_v29 }
0x1670   : > { %4129 = vst [vmem:[#allocation3 + $0x8] sm:$0xf] %v5885_v18  ;;  %4130 = vst [vmem:[#allocation3 + $0xc] sm:$0xf] %v5886_v10  ;;  %v4860_v56 = vpop.permute.xlu1 %4859 }
0x1671   : > { %6464 = vmatpush3.bf16.msra.mxu0 %v6843_v63  ;;  %v4878_v16 = vsel %vm3374_vm5, %v9166_v8, %v4860_v56 }
0x1672   : > { %6465 = vmatprep.subr.bf16.mxu0 %v6845_v25 }
0x1674   : > { %v4866_v26 = vpop.permute.xlu1 %4865 }
0x1675   : > { %v4882_v54 = vsel %vm4103_vm7, %v4878_v16, %v4866_v26  ;;  %6466 = vmatpush3.bf16.msra.mxu0 %v6845_v25 }
0x1676   : > { %6467 = vmatprep.subr.bf16.mxu0 %v6846_v59 }
0x1677   : > { %v6851_v4 = vld [vmem:[#allocation3 + $0x8] sm:$0xff]  }
0x1679   : > { %6468 = vmatpush3.bf16.msra.mxu0 %v6846_v59 }
0x167a   : > { %6469 = vmatprep.subr.bf16.mxu0 %v6847_v1 }
0x167d   : > { %6470 = vmatpush3.bf16.msra.mxu0 %v6847_v1  ;;  %v6856_v1 = vld [vmem:[#allocation14 + $0x28] sm:$0xff]  }
0x167e   : > { %6471 = vmatprep.subr.bf16.mxu0 %v6848_v39 }
0x1681   : > { %6472 = vmatpush3.bf16.msra.mxu0 %v6848_v39  ;;  %v6857_v39 = vld [vmem:[#allocation14 + $0x20] sm:$0xff]  }
0x1682   : > { %6473 = vmatprep.subr.bf16.mxu0 %v6849_v2 }
0x1685   : > { %6474 = vmatpush3.bf16.msra.mxu0 %v6849_v2  ;;  %v6858_v2 = vld [vmem:[#allocation14 + $0x18] sm:$0xff]  }
0x1686   : > { %6475 = vmatprep.subr.bf16.mxu0 %v6850_v20 }
0x1689   : > { %6476 = vmatpush3.bf16.msra.mxu0 %v6850_v20  ;;  %v6859_v20 = vld [vmem:[#allocation14 + $0x10] sm:$0xff]  }
0x168c   : > { %6478 = vmatmul.mubr.bf16.vlgmr.msra.gmra.mxu0 %v6851_v4  ;;  %v6860_v4 = vld [vmem:[#allocation14 + $0x8] sm:$0xff]  }
0x172c   : > { %v6459_v47 = vpop.f32.mrf.mxu0 }
0x172e   : > { %v4838_v46 = vpop.f32.mrf.mxu0 }
0x1730   : > { %v6460_v34 = vpop.f32.mrf.mxu0 }
0x1731   : > { %v4854_v12 = vpack.c.bf16 %v6460_v34, %v6459_v47  ;;  %v6861_v47 = vld [vmem:[#allocation14] sm:$0xff]  }
0x1732   : > { %v4841_v19 = vpop.f32.mrf.mxu0 }
0x1733   : > { %v4853_v32 = vpack.c.bf16 %v4841_v19, %v4838_v46  ;;  %4871 = vrot.lane.b32.xlu1 %v4854_v12, %s7378_s23 }
0x1735   : > { %4869 = vrot.lane.b32.xlu0 %v4853_v32, %s7378_s23 }
0x174c   : > { %v6479_v38 = vpop.f32.mrf.mxu0 }
0x174d   : > { %v5051_v33 = vadd.f32 %v6479_v38, %v5908_v49 }
0x174e   : > { %v5042_v7 = vpop.f32.mrf.mxu0 }
0x174f   : > { %v5043_v48 = vadd.f32 %v5908_v49, %v5042_v7  ;;  %v8890_v52 = vadd.f32 %v5051_v33, %v8307_v43 }
0x1750   : > { %v6480_v55 = vpop.f32.mrf.mxu0 }
0x1751   : > { %v8883_v37 = vadd.f32 %v5043_v48, %v8303_v15  ;;  %v5054_v21 = vadd.f32 %v6480_v55, %v5908_v49 }
0x1752   : > { %v5045_v17 = vpop.f32.mrf.mxu0 }
0x1753   : > { %v5046_v42 = vadd.f32 %v5908_v49, %v5045_v17  ;;  %v8895_v14 = vadd.f32 %v5054_v21, %v8315_v6 }
0x1754   : > { %5083 = vadd.xlane.f32.xlu0 %v8883_v37 }
0x1755   : > { %v8887_v27 = vadd.f32 %v5046_v42, %v8310_v3 }
0x1757   : > { %5085 = vadd.xlane.f32.xlu1 %v8887_v27 }
0x1758   : > { %5087 = vadd.xlane.f32.xlu0 %v8890_v52 }
0x175c   : > { %5089 = vadd.xlane.f32.xlu0 %v8895_v14 }
0x17a5   : > { %v4872_v15 = vpop.permute.xlu1 %4871 }
0x17a6   : > { %v4886_v60 = vsel %vm4108_vm8, %v4882_v54, %v4872_v15  ;;  %v6855_v54 = vld [vmem:[#allocation14 + $0x30] sm:$0xff]  }
0x17a7   : > { %v5906_v13 = vcombine.low %v4886_v60, %v4886_v60  ;;  %v5907_v23 = vcombine.high %v4886_v60, %v4886_v60  ;;  %v4870_v3 = vpop.permute.xlu0 %4869 }
0x17a8   : > { %v4884_v43 = vsel %vm4108_vm8, %v8862_v61, %v4870_v3 }
0x17a9   : > { %4903 = vst [vmem:[#allocation3 + $0x18] sm:$0xf] %v5906_v13  ;;  %4904 = vst [vmem:[#allocation3 + $0x1c] sm:$0xf] %v5907_v23  ;;  %v5904_v53 = vcombine.low %v4884_v43, %v4884_v43  ;;  %v5905_v44 = vcombine.high %v4884_v43, %v4884_v43 }
0x17ab   : > { %4901 = vst [vmem:[#allocation3 + $0x10] sm:$0xf] %v5904_v53  ;;  %4902 = vst [vmem:[#allocation3 + $0x14] sm:$0xf] %v5905_v44 }
0x17b0   : > { %v6853_v6 = vld [vmem:[#allocation3 + $0x18] sm:$0xff]  }
0x17b2   : > { %v6852_v5 = vld [vmem:[#allocation3 + $0x10] sm:$0xff]  }
0x17b3   : > { %6481 = vmatprep.mubr.bf16.mxu0 %v6852_v5 }
0x17b4   : > { %6482 = vmatmul.mubr.bf16.gmra.mxu0 %v6853_v6 }
0x17dd   : > { %v5084_v30 = vpop.xlane.xlu0 %5083 }
0x17de   : > { %v5099_v35 = vmul.f32 0.0078125, %v5084_v30 }
0x17e0   : > { %v5086_v36 = vpop.xlane.xlu1 %5085  ;;  %v8906_v62 = vsub.f32 %v8883_v37, %v5099_v35 }
0x17e1   : > { %v5088_v45 = vpop.xlane.xlu0 %5087  ;;  %v5100_v57 = vmul.f32 0.0078125, %v5086_v36 }
0x17e2   : > { %v5101_v11 = vmul.f32 0.0078125, %v5088_v45 }
0x17e3   : > { %v8919_v25 = vsub.f32 %v8887_v27, %v5100_v57  ;;  %v8968_v57 = vld [vmem:[%s9168_s22] ss:$0 sm:$0xff]  ;;  %s7381_s22 = smov [#allocation17]  }
0x17e4   : > { %v8922_v56 = vsub.f32 %v8890_v52, %v5101_v11  ;;  %s7278_s29 = sshll.u32 %s7381_s22, 4  ;;  %s7279_s29 = int_to_ptr.vmem [resolvable:$false] %s7278_s29 }
0x17e5   : > { %v5090_v10 = vpop.xlane.xlu0 %5089  ;;  %v5116_v8 = vmul.f32 %v8919_v25, %v8919_v25  ;;  %s7280_s24 = scalar_lea.vmem %s7279_s29, 2048  ;;  %p7281_p13 = scmp.lt.s32.totalorder %s9006_s27, %s7279_s29 }
0x17e6   : > { %v5117_v16 = vmul.f32 %v8922_v56, %v8922_v56  ;;  %p7282_p6 = scmp.lt.s32.totalorder %s7280_s24, %s7274_s1 }
0x17e8   : > { %p7283_p11 = por %p7282_p6, %p7281_p13 }
0x17ea   : > { %p7284_p10 = pnand %p7283_p11, %p7277_p3 }
0x1874   : > { %v6483_v41 = vpop.f32.mrf.mxu0 }
0x1875   : > { %v5067_v31 = vadd.f32 %v6483_v41, %v5908_v49 }
0x1876   : > { %v5058_v50 = vpop.f32.mrf.mxu0 }
0x1877   : > { %v5059_v58 = vadd.f32 %v5908_v49, %v5058_v50  ;;  %v8909_v24 = vadd.f32 %v5067_v31, %v8347_v28  ;;  %v5102_v28 = vmul.f32 0.0078125, %v5090_v10 }
0x1878   : > { %v6484_v22 = vpop.f32.mrf.mxu0 }
0x1879   : > { %v8902_v61 = vadd.f32 %v5059_v58, %v8341_v9  ;;  %v5070_v29 = vadd.f32 %v6484_v22, %v5908_v49  ;;  %v5115_v9 = vmul.f32 %v8906_v62, %v8906_v62  ;;  %v8961_v22 = vld [vmem:[%s9167_s16] ss:$0 sm:$0xff]  ;;  %s9171_s16 = sld [smem:[#allocation40_spill]] }
0x187a   : > { %v5061_v63 = vpop.f32.mrf.mxu0 }
0x187b   : > { %v5062_v0 = vadd.f32 %v5908_v49, %v5061_v63  ;;  %5091 = vadd.xlane.f32.xlu0 %v8902_v61  ;;  %v8925_v59 = vadd.f32 %v5070_v29, %v8355_v51  ;;  %v6854_v51 = vld [vmem:[#allocation14 + $0x38] sm:$0xff]  }
0x187c   : > { %6485 = vmatprep.subr.bf16.mxu1 %v6854_v51 }
0x187d   : > { %v8912_v18 = vadd.f32 %v5062_v0, %v8350_v40  ;;  %v8929_v40 = vsub.f32 %v8895_v14, %v5102_v28  ;;  %6486 = vmatpush3.bf16.msra.mxu1 %v6854_v51 }
0x187e   : > { %6487 = vmatprep.subr.bf16.mxu1 %v6855_v54 }
0x187f   : > { %5093 = vadd.xlane.f32.xlu1 %v8912_v18  ;;  %5095 = vadd.xlane.f32.xlu0 %v8909_v24  ;;  %v5118_v26 = vmul.f32 %v8929_v40, %v8929_v40  ;;  %s9012_s20 = scalar_lea.hbm %s9171_s16, %s5964_s3 }
0x1881   : > { %6488 = vmatpush3.bf16.msra.mxu1 %v6855_v54  ;;  %v6862_v54 = vld [vmem:[#allocation16 + $0x38] sm:$0xff]  }
0x1882   : > { %6489 = vmatprep.subr.bf16.mxu1 %v6856_v1  ;;  %6509 = vmatprep.subr.bf16.mxu0 %v6862_v54 }
0x1883   : > { %5097 = vadd.xlane.f32.xlu1 %v8925_v59  ;;  %5123 = vadd.xlane.f32.xlu0 %v5115_v9 }
0x1884   : > { %6510 = vmatpush3.bf16.msra.mxu0 %v6862_v54 }
0x1885   : > { %6490 = vmatpush3.bf16.msra.mxu1 %v6856_v1  ;;  %v6863_v1 = vld [vmem:[#allocation16 + $0x30] sm:$0xff]  }
0x1886   : > { %6491 = vmatprep.subr.bf16.mxu1 %v6857_v39  ;;  %6511 = vmatprep.subr.bf16.mxu0 %v6863_v1 }
0x1887   : > { %5125 = vadd.xlane.f32.xlu1 %v5116_v8  ;;  %5127 = vadd.xlane.f32.xlu0 %v5117_v16 }
0x1888   : > { %6512 = vmatpush3.bf16.msra.mxu0 %v6863_v1 }
0x1889   : > { %6492 = vmatpush3.bf16.msra.mxu1 %v6857_v39  ;;  %v6864_v39 = vld [vmem:[#allocation16 + $0x28] sm:$0xff]  }
0x188a   : > { %6493 = vmatprep.subr.bf16.mxu1 %v6858_v2  ;;  %6513 = vmatprep.subr.bf16.mxu0 %v6864_v39 }
0x188b   : > { %5129 = vadd.xlane.f32.xlu1 %v5118_v26 }
0x188c   : > { %6514 = vmatpush3.bf16.msra.mxu0 %v6864_v39 }
0x188d   : > { %6494 = vmatpush3.bf16.msra.mxu1 %v6858_v2  ;;  %v6866_v2 = vld [vmem:[#allocation16 + $0x18] sm:$0xff]  }
0x188e   : > { %6495 = vmatprep.subr.bf16.mxu1 %v6859_v20 }
0x1891   : > { %6496 = vmatpush3.bf16.msra.mxu1 %v6859_v20  ;;  %v6867_v20 = vld [vmem:[#allocation16 + $0x10] sm:$0xff]  }
0x1892   : > { %6497 = vmatprep.subr.bf16.mxu1 %v6860_v4 }
0x1895   : > { %6498 = vmatpush3.bf16.msra.mxu1 %v6860_v4  ;;  %v6868_v4 = vld [vmem:[#allocation16 + $0x8] sm:$0xff]  }
0x1896   : > { %6499 = vmatprep.subr.bf16.mxu1 %v6861_v47 }
0x1899   : > { %6500 = vmatpush3.bf16.msra.mxu1 %v6861_v47  ;;  %v6869_v47 = vld [vmem:[#allocation16] sm:$0xff]  }
0x1904   : > { %v5092_v46 = vpop.xlane.xlu0 %5091 }
0x1905   : > { %v5103_v34 = vmul.f32 0.0078125, %v5092_v46 }
0x1907   : > { %v8938_v12 = vsub.f32 %v8902_v61, %v5103_v34 }
0x1908   : > { %v5094_v19 = vpop.xlane.xlu1 %5093  ;;  %v5096_v32 = vpop.xlane.xlu0 %5095 }
0x1909   : > { %v5104_v38 = vmul.f32 0.0078125, %v5094_v19  ;;  %v5105_v49 = vmul.f32 0.0078125, %v5096_v32  ;;  %v5119_v7 = vmul.f32 %v8938_v12, %v8938_v12 }
0x190b   : > { %v8943_v48 = vsub.f32 %v8912_v18, %v5104_v38  ;;  %v8946_v55 = vsub.f32 %v8909_v24, %v5105_v49  ;;  %5131 = vadd.xlane.f32.xlu0 %v5119_v7 }
0x190c   : > { %v5098_v33 = vpop.xlane.xlu1 %5097  ;;  %v5124_v17 = vpop.xlane.xlu0 %5123 }
0x190d   : > { %v5106_v42 = vmul.f32 0.0078125, %v5098_v33  ;;  %v5139_v21 = vmul.f32 0.0078125, %v5124_v17  ;;  %v5120_v15 = vmul.f32 %v8943_v48, %v8943_v48  ;;  %v5121_v60 = vmul.f32 %v8946_v55, %v8946_v55 }
0x190f   : > { %v8953_v13 = vsub.f32 %v8925_v59, %v5106_v42  ;;  %v5147_v23 = vadd.f32 1e-05, %v5139_v21  ;;  %5133 = vadd.xlane.f32.xlu1 %v5120_v15  ;;  %5135 = vadd.xlane.f32.xlu0 %v5121_v60 }
0x1910   : > { %v5126_v3 = vpop.xlane.xlu1 %5125  ;;  %v5128_v43 = vpop.xlane.xlu0 %5127 }
0x1911   : > { %7046 = vrsqrt.f32 %v5147_v23  ;;  %v5140_v53 = vmul.f32 0.0078125, %v5126_v3  ;;  %v5141_v44 = vmul.f32 0.0078125, %v5128_v43  ;;  %v5122_v5 = vmul.f32 %v8953_v13, %v8953_v13 }
0x1913   : > { %v5148_v6 = vadd.f32 1e-05, %v5140_v53  ;;  %v5149_v30 = vadd.f32 1e-05, %v5141_v44  ;;  %5137 = vadd.xlane.f32.xlu1 %v5122_v5 }
0x1914   : > { %v5130_v41 = vpop.xlane.xlu1 %5129 }
0x1915   : > { %7048 = vrsqrt.f32 %v5148_v6  ;;  %v5142_v50 = vmul.f32 0.0078125, %v5130_v41 }
0x1916   : > { %7050 = vrsqrt.f32 %v5149_v30 }
0x1917   : > { %v5150_v58 = vadd.f32 1e-05, %v5142_v50 }
0x1919   : > { %7052 = vrsqrt.f32 %v5150_v58 }
0x191e   : > { %v7047_v35 = vpop.eup %7046 }
0x191f   : > { %v5163_v45 = vmul.f32 %v7047_v35, %v8906_v62 }
0x1921   : > { %v5177_v0 = vmul.f32 %v8961_v22, %v5163_v45 }
0x1922   : > { %v7049_v36 = vpop.eup %7048 }
0x1923   : > { %v7051_v31 = vpop.eup %7050  ;;  %v5164_v63 = vmul.f32 %v7049_v36, %v8919_v25  ;;  %v5191_v10 = vadd.f32 %v8968_v57, %v5177_v0  ;;  %v5923_v0 = vld [vmem:[%s9169_s9] ss:$0 sm:$0xff] }
0x1924   : > { %v5165_v11 = vmul.f32 %v7051_v31, %v8922_v56 }
0x1925   : > { %v5178_v62 = vmul.f32 %v8961_v22, %v5164_v63 }
0x1926   : > { %v7053_v29 = vpop.eup %7052  ;;  %v5179_v25 = vmul.f32 %v8961_v22, %v5165_v11 }
0x1927   : > { %v5192_v9 = vadd.f32 %v8968_v57, %v5178_v62  ;;  %v5166_v28 = vmul.f32 %v7053_v29, %v8929_v40  ;;  %v6865_v40 = vld [vmem:[#allocation16 + $0x20] sm:$0xff]  }
0x1928   : > { %v5193_v26 = vadd.f32 %v8968_v57, %v5179_v25  ;;  %6515 = vmatprep.subr.bf16.mxu0 %v6865_v40 }
0x1929   : > { %v5199_v8 = vpack.c.bf16 %v5192_v9, %v5191_v10  ;;  %v5180_v16 = vmul.f32 %v8961_v22, %v5166_v28  ;;  %6516 = vmatpush3.bf16.msra.mxu0 %v6865_v40 }
0x192a   : > { %6517 = vmatprep.subr.bf16.mxu0 %v6866_v2 }
0x192b   : > { %6501 = vmatprep.mubr.bf16.mxu1 %v5199_v8  ;;  %v5194_v51 = vadd.f32 %v8968_v57, %v5180_v16 }
0x192d   : > { %v5200_v56 = vpack.c.bf16 %v5194_v51, %v5193_v26  ;;  %6518 = vmatpush3.bf16.msra.mxu0 %v6866_v2 }
0x192e   : > { %6519 = vmatprep.subr.bf16.mxu0 %v6867_v20 }
0x192f   : > { %6502 = vmatmul.mubr.bf16.vlgmr.msra.gmra.mxu1 %v5200_v56 }
0x1931   : > { %6520 = vmatpush3.bf16.msra.mxu0 %v6867_v20 }
0x1932   : > { %6521 = vmatprep.subr.bf16.mxu0 %v6868_v4 }
0x1935   : > { %6522 = vmatpush3.bf16.msra.mxu0 %v6868_v4 }
0x1936   : > { %6523 = vmatprep.subr.bf16.mxu0 %v6869_v47 }
0x1939   : > { %6524 = vmatpush3.bf16.msra.mxu0 %v6869_v47 }
0x1994   : > { %v5132_v46 = vpop.xlane.xlu0 %5131 }
0x1995   : > { %v5143_v34 = vmul.f32 0.0078125, %v5132_v46 }
0x1997   : > { %v5151_v19 = vadd.f32 1e-05, %v5143_v34 }
0x1998   : > { %v5134_v32 = vpop.xlane.xlu1 %5133  ;;  %v5136_v38 = vpop.xlane.xlu0 %5135 }
0x1999   : > { %7054 = vrsqrt.f32 %v5151_v19  ;;  %v5144_v49 = vmul.f32 0.0078125, %v5134_v32  ;;  %v5145_v7 = vmul.f32 0.0078125, %v5136_v38  ;;  %v5932_v32 = vld [vmem:[%s9170_s28] ss:$0 sm:$0xff] }
0x199b   : > { %v5152_v33 = vadd.f32 1e-05, %v5144_v49  ;;  %v5153_v17 = vadd.f32 1e-05, %v5145_v7 }
0x199c   : > { %v5138_v42 = vpop.xlane.xlu1 %5137 }
0x199d   : > { %7056 = vrsqrt.f32 %v5152_v33  ;;  %v5146_v21 = vmul.f32 0.0078125, %v5138_v42 }
0x199e   : > { %7058 = vrsqrt.f32 %v5153_v17 }
0x199f   : > { %v5154_v15 = vadd.f32 1e-05, %v5146_v21 }
0x19a1   : > { %7060 = vrsqrt.f32 %v5154_v15 }
0x19a6   : > { %v7055_v60 = vpop.eup %7054 }
0x19a7   : > { %v5167_v23 = vmul.f32 %v7055_v60, %v8938_v12 }
0x19a9   : > { %v5181_v44 = vmul.f32 %v8961_v22, %v5167_v23 }
0x19aa   : > { %v7057_v3 = vpop.eup %7056 }
0x19ab   : > { %v7059_v43 = vpop.eup %7058  ;;  %v5168_v53 = vmul.f32 %v7057_v3, %v8943_v48  ;;  %v5195_v41 = vadd.f32 %v8968_v57, %v5181_v44 }
0x19ac   : > { %v5169_v5 = vmul.f32 %v7059_v43, %v8946_v55 }
0x19ad   : > { %v5182_v6 = vmul.f32 %v8961_v22, %v5168_v53 }
0x19ae   : > { %v7061_v30 = vpop.eup %7060  ;;  %v5183_v35 = vmul.f32 %v8961_v22, %v5169_v5 }
0x19af   : > { %v5196_v50 = vadd.f32 %v8968_v57, %v5182_v6  ;;  %v5170_v58 = vmul.f32 %v7061_v30, %v8953_v13 }
0x19b0   : > { %v5197_v48 = vadd.f32 %v8968_v57, %v5183_v35 }
0x19b1   : > { %v5201_v12 = vpack.c.bf16 %v5196_v50, %v5195_v41  ;;  %v5184_v45 = vmul.f32 %v8961_v22, %v5170_v58 }
0x19b3   : > { %6505 = vmatprep.mubr.bf16.mxu1 %v5201_v12  ;;  %v5198_v36 = vadd.f32 %v8968_v57, %v5184_v45 }
0x19b5   : > { %v5202_v55 = vpack.c.bf16 %v5198_v36, %v5197_v48 }
0x19b7   : > { %6506 = vmatmul.mubr.bf16.gmra.mxu1 %v5202_v55 }
0x19ef   : > { %v6503_v31 = vpop.f32.mrf.mxu1 }
0x19f0   : > { %v5317_v29 = vadd.f32 %v6503_v31, %v5923_v0 }
0x19f1   : > { %v5308_v63 = vpop.f32.mrf.mxu1 }
0x19f2   : > { %v5309_v13 = vadd.f32 %v5923_v0, %v5308_v63  ;;  %v5341_v8 = vmax.f32 %v5317_v29, 0.0 }
0x19f3   : > { %v6504_v11 = vpop.f32.mrf.mxu1 }
0x19f4   : > { %v5320_v62 = vadd.f32 %v6504_v11, %v5923_v0  ;;  %v5339_v28 = vmax.f32 %v5309_v13, 0.0 }
0x19f5   : > { %v5311_v10 = vpop.f32.mrf.mxu1 }
0x19f6   : > { %v5312_v9 = vadd.f32 %v5923_v0, %v5311_v10  ;;  %v5342_v22 = vmax.f32 %v5320_v62, 0.0 }
0x19f8   : > { %v5340_v25 = vmax.f32 %v5312_v9, 0.0  ;;  %v5348_v57 = vpack.c.bf16 %v5342_v22, %v5341_v8 }
0x19fa   : > { %v5347_v16 = vpack.c.bf16 %v5340_v25, %v5339_v28 }
0x19fc   : > { %6525 = vmatprep.mubr.bf16.mxu0 %v5347_v16 }
0x19fd   : > { %6526 = vmatmul.mubr.bf16.vlgmr.msra.gmra.mxu0 %v5348_v57 }
0x1a77   : > { %v6507_v26 = vpop.f32.mrf.mxu1 }
0x1a78   : > { %v5333_v39 = vadd.f32 %v6507_v26, %v5923_v0 }
0x1a79   : > { %v5324_v51 = vpop.f32.mrf.mxu1 }
0x1a7a   : > { %v5325_v54 = vadd.f32 %v5923_v0, %v5324_v51  ;;  %v5345_v46 = vmax.f32 %v5333_v39, 0.0 }
0x1a7b   : > { %v6508_v56 = vpop.f32.mrf.mxu1 }
0x1a7c   : > { %v5336_v1 = vadd.f32 %v6508_v56, %v5923_v0  ;;  %v5343_v4 = vmax.f32 %v5325_v54, 0.0 }
0x1a7d   : > { %v5327_v40 = vpop.f32.mrf.mxu1 }
0x1a7e   : > { %v5328_v2 = vadd.f32 %v5923_v0, %v5327_v40  ;;  %v5346_v20 = vmax.f32 %v5336_v1, 0.0 }
0x1a80   : > { %v5344_v47 = vmax.f32 %v5328_v2, 0.0  ;;  %v5350_v19 = vpack.c.bf16 %v5346_v20, %v5345_v46 }
0x1a82   : > { %v5349_v34 = vpack.c.bf16 %v5344_v47, %v5343_v4 }
0x1a84   : > { %6529 = vmatprep.mubr.bf16.mxu0 %v5349_v34 }
0x1a85   : > { %6530 = vmatmul.mubr.bf16.gmra.mxu0 %v5350_v19 }
0x1abd   : > { %v6527_v38 = vpop.f32.mrf.mxu0 }
0x1abe   : > { %v5465_v49 = vadd.f32 %v6527_v38, %v5932_v32 }
0x1abf   : > { %v5456_v7 = vpop.f32.mrf.mxu0 }
0x1ac0   : > { %v5489_v33 = vadd.f32 %v5465_v49, %v8890_v52  ;;  %v5457_v17 = vadd.f32 %v5932_v32, %v5456_v7 }
0x1ac1   : > { %v6528_v42 = vpop.f32.mrf.mxu0 }
0x1ac2   : > { %5497 = vst [vmem:[%s744_s26 + $0x10] sm:$0xff] %v5489_v33  ;;  %v5487_v21 = vadd.f32 %v5457_v17, %v8883_v37  ;;  %v5468_v15 = vadd.f32 %v6528_v42, %v5932_v32 }
0x1ac3   : > { %v5459_v60 = vpop.f32.mrf.mxu0 }
0x1ac4   : > { %5495 = vst [vmem:[%s744_s26] sm:$0xff] %v5487_v21  ;;  %v5490_v23 = vadd.f32 %v5468_v15, %v8895_v14  ;;  %v5460_v3 = vadd.f32 %v5932_v32, %v5459_v60 }
0x1ac6   : > { %5498 = vst [vmem:[%s744_s26 + $0x18] sm:$0xff] %v5490_v23  ;;  %v5488_v43 = vadd.f32 %v5460_v3, %v8887_v27 }
0x1ac8   : > { %5496 = vst [vmem:[%s744_s26 + $0x8] sm:$0xff] %v5488_v43 }
0x1b45   : > { %v6531_v53 = vpop.f32.mrf.mxu0 }
0x1b46   : > { %v5481_v52 = vadd.f32 %v6531_v53, %v5932_v32 }
0x1b47   : > { %v5472_v44 = vpop.f32.mrf.mxu0 }
0x1b48   : > { %v5493_v5 = vadd.f32 %v5481_v52, %v8909_v24  ;;  %v5473_v6 = vadd.f32 %v5932_v32, %v5472_v44 }
0x1b49   : > { %v6532_v37 = vpop.f32.mrf.mxu0 }
0x1b4a   : > { %5501 = vst [vmem:[%s744_s26 + $0x30] sm:$0xff] %v5493_v5  ;;  %v5491_v30 = vadd.f32 %v5473_v6, %v8902_v61  ;;  %v5484_v41 = vadd.f32 %v6532_v37, %v5932_v32 }
0x1b4b   : > { %v5475_v14 = vpop.f32.mrf.mxu0 }
0x1b4c   : > { %5499 = vst [vmem:[%s744_s26 + $0x20] sm:$0xff] %v5491_v30  ;;  %v5494_v27 = vadd.f32 %v5484_v41, %v8925_v59  ;;  %v5476_v24 = vadd.f32 %v5932_v32, %v5475_v14 }
0x1b4e   : > { %5502 = vst [vmem:[%s744_s26 + $0x38] sm:$0xff] %v5494_v27  ;;  %v5492_v61 = vadd.f32 %v5476_v24, %v8912_v18 }
0x1b50   : > { %5500 = vst [vmem:[%s744_s26 + $0x28] sm:$0xff] %v5492_v61 }
0x1b51   : > { %7287 = shalt.err (!%p7284_p10)
}
0x1b52   : > { %s7288_s9 = scalar_lea.hbm %s9012_s20, 1024  ;;  %s7292_s28 = scalar_lea.hbm %s9171_s16, 2048 }
0x1b53   : > { %p7289_p8 = scmp.ne.s32.totalorder %s9012_s20, %s7288_s9  ;;  %p7293_p5 = scmp.lt.s32.totalorder %s9012_s20, %s9171_s16 }
0x1b54   : > { %p7294_p12 = scmp.lt.s32.totalorder %s7292_s28, %s7288_s9 }
0x1b55   : > { %p7290_p9 = pnand %p7289_p8, %p9172_p1 }
0x1b56   : > { %p7295_p4 = por %p7294_p12, %p7293_p5 }
0x1b57   : > { %p7291_p0 = pneg %p7290_p9 }
0x1b59   : > { %p7296_p2 = pnand %p7295_p4, %p7291_p0 }
0x1b5b   : > { %7299 = shalt.err (!%p7296_p2)
}
0x1b5c   : > { %s7382_s18 = smov 128   ;;  %s7383_s15 = smov 8  }
0x1b5d   : > { %6577 = dma.vmem_to_hbm [thread:$0]  (%p9172_p1), %s9006_s27, 1024, %s9012_s20, %s5504_s2, %s7382_s18, %s7382_s18, %s7383_s15  }
0x1b5e PF: > { %s9173_s1 = sld [smem:[#allocation25_spill]]  ;;  %p9176_p3 = scmp.ge.s32.totalorder %s7358_s21, 2 }
0x1b5f   : > { %s9174_s22 = sld [smem:[#allocation29_spill]] }
0x1b64   : > { %s5532_s29 = sand.u32 1, %s9173_s1  }
0x1b65   : > { %p9175_p7 = scmp.ne.s32.totalorder %s9174_s22, 0  ;;  %s5533_s24 = scalar_lea.sflag [#allocation6], %s5532_s29 }
0x1b67   : > { %p6606_p13 = pnand %p9176_p3, %p9175_p7 }
0x1b69   : > { %p6607_p6 = pneg %p6606_p13 }
0x1b6b   : > { %7341 = dma.done.wait (%p6607_p6), %s5533_s24, 1024  }
0x1b6c   : > { %7343 = vsyncadd (%p6607_p6), %s5533_s24, 4294966272  ;;  %s9177_s21 = sld [smem:[#allocation27_spill]]  ;;  %s9180_s0 = smov %s7350_s30 }
0x1b6d   : > { %s9178_s9 = sld [smem:[#allocation26_spill]] }
0x1b6e   : > { %s9179_s20 = sld [smem:[#allocation28_spill]] }
0x1b72   : > { %p35_p11 = scmp.ge.s32.totalorder %s9177_s21, 4  }
0x1b73   : > { %s9181_s30 = smov %s9178_s9 }
0x1b74   :  { %37 = sbr.rel (!%p35_p11) target bundleno = 20 (0x14), region = 181 }
0x1b79   :  { %5538 = vsyncpa [#allocation5], 1 }
0x1b7a   :  { %5540 = vsyncpa [#allocation5 + $0x1], 1 }
0x1b7b   :  { %5541 = vsyncpa [#allocation8], 1 }
0x1b7c   :  { %5542 = vsyncpa [#allocation12], 1 }
0x1b7d   :  { %5543 = vsyncpa [#allocation15], 1 }
0x1b7e   :  { %5544 = vsyncpa [#allocation6], 1 }
0x1b7f   :  { %5546 = vsyncpa [#allocation6 + $0x1], 1 }

</bundles_post_ra>
